<compile_context>
chip_gen: v6e
topology: v6e:2x2x1
jax: 0.10.0
libtpu: 0.0.40
codegen_flags: <defaults>
</compile_context>

<pallas_src>
import jax
import jax.numpy as jnp
from jax.experimental import pallas as pl
from jax.experimental.pallas import tpu as pltpu

LANE = 128
SUBLANE = 8


def _round_up(n: int, m: int) -> int:
    return ((n + m - 1) // m) * m


def _pad2d(a, rows: int, cols: int, dtype):
    a = jnp.asarray(a, jnp.float32)
    a = jnp.pad(a, ((0, rows - a.shape[0]), (0, cols - a.shape[1])))
    return a.astype(dtype)


def _make_mlp_kernel(num_hidden: int, in_f: int, out_f: int, compute_dtype):
    """Fused MLP kernel for a fixed (static) number of hidden layers."""

    def kernel(*refs):
        # refs = (x, mean, inv_std, W1, b1, ..., Wn, bn, W_out, b_out, o_ref, xstage)
        x_ref, mean_ref, inv_std_ref = refs[0], refs[1], refs[2]
        o_ref, xstage = refs[-2], refs[-1]
        wb = refs[3:-2]

        # Input normalization + in-kernel zero-pad to the 128-lane MXU width.
        # (multiply by precomputed 1/std; the scratch is re-zeroed every step so
        #  the padded lanes are exactly zero and safe on every core.)
        xstage[...] = jnp.zeros_like(xstage)
        xstage[:, :in_f] = (x_ref[...] - mean_ref[...]) * inv_std_ref[...]
        h = xstage[...].astype(compute_dtype)

        # Hidden layers: relu(h @ W + b)  (static Python loop -> unrolled,
        # bf16 MXU inputs, f32 accumulation, f32 bias add).
        for i in range(num_hidden):
            w = wb[2 * i][...]
            b = wb[2 * i + 1][...]
            h = jnp.dot(h, w, preferred_element_type=jnp.float32) + b
            h = jnp.maximum(h, 0.0).astype(compute_dtype)

        # Output layer (identity activation); matmul stays lane-dense (padded N),
        # the store is at the natural output width.
        w_out = wb[-2][...]
        b_out = wb[-1][...]
        out = jnp.dot(h, w_out, preferred_element_type=jnp.float32) + b_out
        o_ref[...] = out[:, :out_f].astype(o_ref.dtype)

    return kernel


def prepare_params(state_means, state_std, layer_params, output_params,
                   input_bias=None, compute_dtype=jnp.bfloat16):
    """One-time parameter transforms (transpose / pad / 1/std / dtype cast).

    layer_params:  list of (W, b) with W of shape (out_f, in_f)  (PyTorch layout)
    output_params: (W_out, b_out) with W_out of shape (output_size, in_f)
    """
    state_means = jnp.asarray(state_means, jnp.float32)
    state_std = jnp.asarray(state_std, jnp.float32)
    in_f = int(state_means.shape[0])
    if input_bias is not None:
        # data += input_bias; (data - mean) == (x - (mean - input_bias))
        state_means = state_means - jnp.asarray(input_bias, jnp.float32)

    mean_row = state_means.reshape(1, in_f)
    inv_std_row = (1.0 / state_std).reshape(1, in_f)

    in_pad = _round_up(in_f, LANE)
    w_out, b_out = output_params
    out_f = int(w_out.shape[0])
    out_pad = _round_up(out_f, LANE)

    flat_wb = []
    prev_pad = in_pad
    for w, b in layer_params:
        cur = int(w.shape[0])
        cur_pad = _round_up(cur, LANE)
        flat_wb.append(_pad2d(jnp.asarray(w, jnp.float32).T, prev_pad, cur_pad, compute_dtype))
        flat_wb.append(_pad2d(jnp.asarray(b, jnp.float32).reshape(1, -1), 1, cur_pad, jnp.float32))
        prev_pad = cur_pad
    flat_wb.append(_pad2d(jnp.asarray(w_out, jnp.float32).T, prev_pad, out_pad, compute_dtype))
    flat_wb.append(_pad2d(jnp.asarray(b_out, jnp.float32).reshape(1, -1), 1, out_pad, jnp.float32))

    return {
        "mean": mean_row, "inv_std": inv_std_row, "wb": tuple(flat_wb),
        "in_f": in_f, "out_f": out_f, "in_pad": in_pad, "out_pad": out_pad,
    }


def mlp_forward(x, prepared, *, tile_b=512):
    """Run the fused MLP Pallas kernel on (B, in_f) f32 input."""
    x = jnp.asarray(x, jnp.float32)
    B, in_f = x.shape
    assert in_f == prepared["in_f"]
    out_f = prepared["out_f"]
    in_pad = prepared["in_pad"]
    mean_row, inv_std_row = prepared["mean"], prepared["inv_std"]
    flat_wb = list(prepared["wb"])
    num_hidden = (len(flat_wb) - 2) // 2
    compute_dtype = flat_wb[0].dtype

    # Large batch tile (amortizes ~0.35us per-grid-step overhead); for B > tile_b
    # the grid has >= 2 steps so the "parallel" axis shards across both v7x TCs.
    TB = _round_up(max(SUBLANE, min(tile_b, B)), SUBLANE)
    grid = (pl.cdiv(B, TB),)  # partial final tile allowed; no batch padding

    kernel = _make_mlp_kernel(num_hidden, in_f, out_f, compute_dtype)

    # Advisory cost estimate: padded FLOPs actually executed, natural-width bytes.
    rows = int(grid[0]) * TB
    flops = 0
    for i in range(num_hidden + 1):
        w = flat_wb[2 * i]
        flops += 2 * rows * int(w.shape[0]) * int(w.shape[1])
    param_bytes = (sum(int(p.size) * p.dtype.itemsize for p in flat_wb)
                   + int(mean_row.size) * 4 + int(inv_std_row.size) * 4)
    bytes_accessed = int(x.size) * 4 + param_bytes + B * out_f * 4
    cost = pl.CostEstimate(flops=int(flops), transcendentals=0,
                           bytes_accessed=int(bytes_accessed))

    def run(single_buffer_params: bool):
        param_kw = {}
        if single_buffer_params:
            # Constant (index-invariant) blocks do not need double-buffering.
            param_kw = dict(pipeline_mode=pl.Buffered(1))

        in_specs = [
            pl.BlockSpec((TB, in_f), lambda i: (i, 0)),                 # x (batch-tiled)
            pl.BlockSpec((1, in_f), lambda i: (0, 0), **param_kw),      # mean (resident)
            pl.BlockSpec((1, in_f), lambda i: (0, 0), **param_kw),      # 1/std (resident)
        ]
        for p in flat_wb:                                               # weights / biases
            in_specs.append(pl.BlockSpec(p.shape, lambda i: (0, 0), **param_kw))
        out_specs = pl.BlockSpec((TB, out_f), lambda i: (i, 0))

        # VMEM budget from the actual buffer footprint (+ headroom).
        param_bufs = 1 if single_buffer_params else 2
        buf_bytes = (TB * in_f * 4 * 2            # x, double-buffered
                     + TB * out_f * 4 * 2         # out, double-buffered
                     + param_bytes * param_bufs   # resident params
                     + TB * in_pad * 4)           # staging scratch
        vmem_limit = min(int(2 * buf_bytes) + (4 << 20), 96 * 1024 * 1024)

        return pl.pallas_call(
            kernel,
            out_shape=jax.ShapeDtypeStruct((B, out_f), jnp.float32),
            grid_spec=pltpu.PrefetchScalarGridSpec(
                num_scalar_prefetch=0,
                grid=grid,
                in_specs=in_specs,
                out_specs=out_specs,
                scratch_shapes=[pltpu.VMEM((TB, in_pad), jnp.float32)],
            ),
            compiler_params=pltpu.CompilerParams(
                dimension_semantics=("parallel",),
                vmem_limit_bytes=vmem_limit,
            ),
            cost_estimate=cost,
        )(x, mean_row, inv_std_row, *flat_wb)

    try:
        return run(single_buffer_params=True)
    except Exception:
        # Fallback for JAX versions that reject pipeline_mode=pl.Buffered(1).
        return run(single_buffer_params=False)


# ----------------------------- test harness ---------------------------------

def _init_params(key, input_size, output_size, num_layers, layer_size):
    """Deterministic synthetic init matching the PyTorch module's shapes.

    PyTorch nn.Linear stores weight as (out_features, in_features)."""
    params = []
    in_f = input_size
    for _ in range(num_layers):
        key, kw, kb = jax.random.split(key, 3)
        bound = 1.0 / jnp.sqrt(in_f)
        w = jax.random.uniform(kw, (layer_size, in_f), jnp.float32, -bound, bound)
        b = jax.random.uniform(kb, (layer_size,), jnp.float32, -bound, bound)
        params.append((w, b))
        in_f = layer_size
    key, kw, kb = jax.random.split(key, 3)
    bound = 1.0 / jnp.sqrt(in_f)
    w_out = jax.random.uniform(kw, (output_size, in_f), jnp.float32, -bound, bound)
    b_out = jax.random.uniform(kb, (output_size,), jnp.float32, -bound, bound)
    return params, (w_out, b_out), key


def _reference_forward(x, state_means, state_std, layer_params, output_params):
    """Pure-JAX reference mirroring the PyTorch forward (f32)."""
    h = (x - state_means) / state_std
    for w, b in layer_params:
        h = jnp.maximum(h @ w.T + b, 0.0)
    w_out, b_out = output_params
    return h @ w_out.T + b_out


def _reference_forward_bf16(x, state_means, state_std, layer_params, output_params):
    """Reference that emulates the kernel's bf16-matmul / f32-accumulate path."""
    bf16, f32 = jnp.bfloat16, jnp.float32
    h = (x - state_means) * (1.0 / state_std)
    for w, b in layer_params:
        h = jnp.dot(h.astype(bf16), jnp.asarray(w, f32).T.astype(bf16),
                    preferred_element_type=f32) + b
        h = jnp.maximum(h, 0.0)
    w_out, b_out = output_params
    return jnp.dot(h.astype(bf16), jnp.asarray(w_out, f32).T.astype(bf16),
                   preferred_element_type=f32) + b_out


if __name__ == "__main__":
    # MLP(input_size=4, output_size=2, num_layers=2, layer_size=32)
    input_size, output_size, num_layers, layer_size = 4, 2, 2, 32

    key = jax.random.PRNGKey(0)
    layer_params, output_params, key = _init_params(
        key, input_size, output_size, num_layers, layer_size)

    # state_means / state_std as in __init__ (zeros / ones); input_bias=None.
    state_means = jnp.zeros((input_size,), jnp.float32)
    state_std = jnp.ones((input_size,), jnp.float32)

    # One-time parameter preparation (transpose / pad / bf16 / 1/std).
    prepared = prepare_params(state_means, state_std, layer_params, output_params,
                              compute_dtype=jnp.bfloat16)

    # Batch of 1024 -> TB=512 -> grid=(2,), so the "parallel" batch axis can use
    # both v7x TensorCores; single-TC chips just run the 2-step loop.
    key, kx = jax.random.split(key)
    x = jax.random.normal(kx, (1024, input_size), jnp.float32)

    out = jax.block_until_ready(mlp_forward(x, prepared))
    ref = _reference_forward(x, state_means, state_std, layer_params, output_params)
    ref_bf16 = _reference_forward_bf16(x, state_means, state_std, layer_params, output_params)
    assert out.shape == (1024, output_size)
    assert jnp.allclose(out, ref_bf16, atol=1e-3, rtol=1e-3), "mismatch vs bf16-emulated reference"
    assert jnp.allclose(out, ref, atol=5e-2, rtol=5e-2), "mismatch vs f32 reference"

    # Ragged batch (not a multiple of the tile): exercises the partial final
    # grid tile (no batch padding anywhere).
    key, kx2 = jax.random.split(key)
    x2 = jax.random.normal(kx2, (1000, input_size), jnp.float32)
    out2 = jax.block_until_ready(mlp_forward(x2, prepared))
    ref2_bf16 = _reference_forward_bf16(x2, state_means, state_std, layer_params, output_params)
    assert out2.shape == (1000, output_size)
    assert jnp.allclose(out2, ref2_bf16, atol=1e-3, rtol=1e-3), "ragged-batch mismatch"

    print("KERNEL_OK")
</pallas_src>

<mosaic_0001>
module attributes {stable_mosaic.version = 11 : i64} {
  func.func @kernel(%arg0: i32, %arg1: memref<512x4xf32, #tpu.memory_space<vmem>>, %arg2: memref<1x4xf32, #tpu.memory_space<vmem>>, %arg3: memref<1x4xf32, #tpu.memory_space<vmem>>, %arg4: memref<128x128xbf16, #tpu.memory_space<vmem>>, %arg5: memref<1x128xf32, #tpu.memory_space<vmem>>, %arg6: memref<128x128xbf16, #tpu.memory_space<vmem>>, %arg7: memref<1x128xf32, #tpu.memory_space<vmem>>, %arg8: memref<128x128xbf16, #tpu.memory_space<vmem>>, %arg9: memref<1x128xf32, #tpu.memory_space<vmem>>, %arg10: memref<512x2xf32, #tpu.memory_space<vmem>>, %arg11: memref<512x128xf32, #tpu.memory_space<vmem>>) attributes {dimension_semantics = [#tpu.dimension_semantics<parallel>], iteration_bounds = array<i64: 2>, scalar_prefetch = 0 : i64, scratch_operands = 1 : i64, tpu.core_type = #tpu.core_type<tc>, window_params = [{transform_indices = @transform_0, window_bounds = array<i64: 512, 4>}, {pipeline_mode = #tpu.pipeline_mode<synchronous>, transform_indices = @transform_1, window_bounds = array<i64: 1, 4>}, {pipeline_mode = #tpu.pipeline_mode<synchronous>, transform_indices = @transform_2, window_bounds = array<i64: 1, 4>}, {pipeline_mode = #tpu.pipeline_mode<synchronous>, transform_indices = @transform_3, window_bounds = array<i64: 128, 128>}, {pipeline_mode = #tpu.pipeline_mode<synchronous>, transform_indices = @transform_4, window_bounds = array<i64: 1, 128>}, {pipeline_mode = #tpu.pipeline_mode<synchronous>, transform_indices = @transform_5, window_bounds = array<i64: 128, 128>}, {pipeline_mode = #tpu.pipeline_mode<synchronous>, transform_indices = @transform_6, window_bounds = array<i64: 1, 128>}, {pipeline_mode = #tpu.pipeline_mode<synchronous>, transform_indices = @transform_7, window_bounds = array<i64: 128, 128>}, {pipeline_mode = #tpu.pipeline_mode<synchronous>, transform_indices = @transform_8, window_bounds = array<i64: 1, 128>}, {transform_indices = @transform_9, window_bounds = array<i64: 512, 2>}]} {
    %cst = arith.constant 0.000000e+00 : f32
    %0 = vector.broadcast %cst : f32 to vector<512x128xf32>
    %c0 = arith.constant 0 : index
    %c0_0 = arith.constant 0 : index
    %1 = vector.load %arg11[%c0, %c0_0] : memref<512x128xf32, #tpu.memory_space<vmem>>, vector<512x128xf32>
    tpu.vector_store %arg11[%c0, %c0_0], %0 {strides = array<i32>} : memref<512x128xf32, #tpu.memory_space<vmem>>, vector<512x128xf32>,
    %c0_1 = arith.constant 0 : index
    %c0_2 = arith.constant 0 : index
    %2 = vector.load %arg1[%c0_1, %c0_2] : memref<512x4xf32, #tpu.memory_space<vmem>>, vector<512x4xf32>
    %c0_3 = arith.constant 0 : index
    %c0_4 = arith.constant 0 : index
    %3 = vector.load %arg2[%c0_3, %c0_4] : memref<1x4xf32, #tpu.memory_space<vmem>>, vector<1x4xf32>
    %4 = vector.broadcast %3 : vector<1x4xf32> to vector<512x4xf32>
    %5 = arith.subf %2, %4 : vector<512x4xf32>
    %c0_5 = arith.constant 0 : index
    %c0_6 = arith.constant 0 : index
    %6 = vector.load %arg3[%c0_5, %c0_6] : memref<1x4xf32, #tpu.memory_space<vmem>>, vector<1x4xf32>
    %7 = vector.broadcast %6 : vector<1x4xf32> to vector<512x4xf32>
    %8 = arith.mulf %5, %7 : vector<512x4xf32>
    %c0_7 = arith.constant 0 : index
    %c0_8 = arith.constant 0 : index
    %9 = vector.load %arg11[%c0_7, %c0_8] : memref<512x128xf32, #tpu.memory_space<vmem>>, vector<512x4xf32>
    tpu.vector_store %arg11[%c0_7, %c0_8], %8 {strides = array<i32>} : memref<512x128xf32, #tpu.memory_space<vmem>>, vector<512x4xf32>,
    %c0_9 = arith.constant 0 : index
    %c0_10 = arith.constant 0 : index
    %10 = vector.load %arg11[%c0_9, %c0_10] : memref<512x128xf32, #tpu.memory_space<vmem>>, vector<512x128xf32>
    %11 = arith.truncf %10 : vector<512x128xf32> to vector<512x128xbf16>
    %c0_11 = arith.constant 0 : index
    %c0_12 = arith.constant 0 : index
    %12 = vector.load %arg4[%c0_11, %c0_12] : memref<128x128xbf16, #tpu.memory_space<vmem>>, vector<128x128xbf16>
    %c0_13 = arith.constant 0 : index
    %c0_14 = arith.constant 0 : index
    %13 = vector.load %arg5[%c0_13, %c0_14] : memref<1x128xf32, #tpu.memory_space<vmem>>, vector<1x128xf32>
    %cst_15 = arith.constant dense<0.000000e+00> : vector<512x128xf32>
    %14 = tpu.matmul %11, %12, %cst_15 {dimension_numbers = #tpu.dot_dimension_numbers<[1], [0], [0], [1], [0, 0, 1, 1], [], []>} : vector<512x128xbf16>, vector<128x128xbf16>, vector<512x128xf32> -> vector<512x128xf32>
    %15 = vector.broadcast %13 : vector<1x128xf32> to vector<512x128xf32>
    %16 = arith.addf %14, %15 : vector<512x128xf32>
    %cst_16 = arith.constant 0.000000e+00 : f32
    %17 = vector.broadcast %cst_16 : f32 to vector<512x128xf32>
    %18 = arith.maximumf %16, %17 : vector<512x128xf32>
    %19 = arith.truncf %18 : vector<512x128xf32> to vector<512x128xbf16>
    %c0_17 = arith.constant 0 : index
    %c0_18 = arith.constant 0 : index
    %20 = vector.load %arg6[%c0_17, %c0_18] : memref<128x128xbf16, #tpu.memory_space<vmem>>, vector<128x128xbf16>
    %c0_19 = arith.constant 0 : index
    %c0_20 = arith.constant 0 : index
    %21 = vector.load %arg7[%c0_19, %c0_20] : memref<1x128xf32, #tpu.memory_space<vmem>>, vector<1x128xf32>
    %cst_21 = arith.constant dense<0.000000e+00> : vector<512x128xf32>
    %22 = tpu.matmul %19, %20, %cst_21 {dimension_numbers = #tpu.dot_dimension_numbers<[1], [0], [0], [1], [0, 0, 1, 1], [], []>} : vector<512x128xbf16>, vector<128x128xbf16>, vector<512x128xf32> -> vector<512x128xf32>
    %23 = vector.broadcast %21 : vector<1x128xf32> to vector<512x128xf32>
    %24 = arith.addf %22, %23 : vector<512x128xf32>
    %cst_22 = arith.constant 0.000000e+00 : f32
    %25 = vector.broadcast %cst_22 : f32 to vector<512x128xf32>
    %26 = arith.maximumf %24, %25 : vector<512x128xf32>
    %27 = arith.truncf %26 : vector<512x128xf32> to vector<512x128xbf16>
    %c0_23 = arith.constant 0 : index
    %c0_24 = arith.constant 0 : index
    %28 = vector.load %arg8[%c0_23, %c0_24] : memref<128x128xbf16, #tpu.memory_space<vmem>>, vector<128x128xbf16>
    %c0_25 = arith.constant 0 : index
    %c0_26 = arith.constant 0 : index
    %29 = vector.load %arg9[%c0_25, %c0_26] : memref<1x128xf32, #tpu.memory_space<vmem>>, vector<1x128xf32>
    %cst_27 = arith.constant dense<0.000000e+00> : vector<512x128xf32>
    %30 = tpu.matmul %27, %28, %cst_27 {dimension_numbers = #tpu.dot_dimension_numbers<[1], [0], [0], [1], [0, 0, 1, 1], [], []>} : vector<512x128xbf16>, vector<128x128xbf16>, vector<512x128xf32> -> vector<512x128xf32>
    %31 = vector.broadcast %29 : vector<1x128xf32> to vector<512x128xf32>
    %32 = arith.addf %30, %31 : vector<512x128xf32>
    %33 = vector.extract_strided_slice %32 {offsets = [0, 0], sizes = [512, 2], strides = [1, 1]} : vector<512x128xf32> to vector<512x2xf32>
    %c0_28 = arith.constant 0 : index
    %c0_29 = arith.constant 0 : index
    %34 = vector.load %arg10[%c0_28, %c0_29] : memref<512x2xf32, #tpu.memory_space<vmem>>, vector<512x2xf32>
    tpu.vector_store %arg10[%c0_28, %c0_29], %33 {strides = array<i32>} : memref<512x2xf32, #tpu.memory_space<vmem>>, vector<512x2xf32>,
    return
  }
  func.func @transform_0(%arg0: i32) -> (i32, i32) {
    %c0_i32 = arith.constant 0 : i32
    %c0_i32_0 = arith.constant 0 : i32
    return %arg0, %c0_i32 : i32, i32
  }
  func.func @transform_1(%arg0: i32) -> (i32, i32) {
    %c0_i32 = arith.constant 0 : i32
    %c0_i32_0 = arith.constant 0 : i32
    %c0_i32_1 = arith.constant 0 : i32
    return %c0_i32, %c0_i32_0 : i32, i32
  }
  func.func @transform_2(%arg0: i32) -> (i32, i32) {
    %c0_i32 = arith.constant 0 : i32
    %c0_i32_0 = arith.constant 0 : i32
    %c0_i32_1 = arith.constant 0 : i32
    return %c0_i32, %c0_i32_0 : i32, i32
  }
  func.func @transform_3(%arg0: i32) -> (i32, i32) {
    %c0_i32 = arith.constant 0 : i32
    %c0_i32_0 = arith.constant 0 : i32
    %c0_i32_1 = arith.constant 0 : i32
    return %c0_i32, %c0_i32_0 : i32, i32
  }
  func.func @transform_4(%arg0: i32) -> (i32, i32) {
    %c0_i32 = arith.constant 0 : i32
    %c0_i32_0 = arith.constant 0 : i32
    %c0_i32_1 = arith.constant 0 : i32
    return %c0_i32, %c0_i32_0 : i32, i32
  }
  func.func @transform_5(%arg0: i32) -> (i32, i32) {
    %c0_i32 = arith.constant 0 : i32
    %c0_i32_0 = arith.constant 0 : i32
    %c0_i32_1 = arith.constant 0 : i32
    return %c0_i32, %c0_i32_0 : i32, i32
  }
  func.func @transform_6(%arg0: i32) -> (i32, i32) {
    %c0_i32 = arith.constant 0 : i32
    %c0_i32_0 = arith.constant 0 : i32
    %c0_i32_1 = arith.constant 0 : i32
    return %c0_i32, %c0_i32_0 : i32, i32
  }
  func.func @transform_7(%arg0: i32) -> (i32, i32) {
    %c0_i32 = arith.constant 0 : i32
    %c0_i32_0 = arith.constant 0 : i32
    %c0_i32_1 = arith.constant 0 : i32
    return %c0_i32, %c0_i32_0 : i32, i32
  }
  func.func @transform_8(%arg0: i32) -> (i32, i32) {
    %c0_i32 = arith.constant 0 : i32
    %c0_i32_0 = arith.constant 0 : i32
    %c0_i32_1 = arith.constant 0 : i32
    return %c0_i32, %c0_i32_0 : i32, i32
  }
  func.func @transform_9(%arg0: i32) -> (i32, i32) {
    %c0_i32 = arith.constant 0 : i32
    %c0_i32_0 = arith.constant 0 : i32
    return %arg0, %c0_i32 : i32, i32
  }
}

module attributes {stable_mosaic.version = 11 : i64} {
  func.func @kernel(%arg0: i32, %arg1: memref<512x4xf32, #tpu.memory_space<vmem>>, %arg2: memref<1x4xf32, #tpu.memory_space<vmem>>, %arg3: memref<1x4xf32, #tpu.memory_space<vmem>>, %arg4: memref<128x128xbf16, #tpu.memory_space<vmem>>, %arg5: memref<1x128xf32, #tpu.memory_space<vmem>>, %arg6: memref<128x128xbf16, #tpu.memory_space<vmem>>, %arg7: memref<1x128xf32, #tpu.memory_space<vmem>>, %arg8: memref<128x128xbf16, #tpu.memory_space<vmem>>, %arg9: memref<1x128xf32, #tpu.memory_space<vmem>>, %arg10: memref<512x2xf32, #tpu.memory_space<vmem>>, %arg11: memref<512x128xf32, #tpu.memory_space<vmem>>) attributes {dimension_semantics = [#tpu.dimension_semantics<parallel>], iteration_bounds = array<i64: 2>, scalar_prefetch = 0 : i64, scratch_operands = 1 : i64, tpu.core_type = #tpu.core_type<tc>, window_params = [{transform_indices = @transform_0, window_bounds = array<i64: 512, 4>}, {pipeline_mode = #tpu.pipeline_mode<synchronous>, transform_indices = @transform_1, window_bounds = array<i64: 1, 4>}, {pipeline_mode = #tpu.pipeline_mode<synchronous>, transform_indices = @transform_2, window_bounds = array<i64: 1, 4>}, {pipeline_mode = #tpu.pipeline_mode<synchronous>, transform_indices = @transform_3, window_bounds = array<i64: 128, 128>}, {pipeline_mode = #tpu.pipeline_mode<synchronous>, transform_indices = @transform_4, window_bounds = array<i64: 1, 128>}, {pipeline_mode = #tpu.pipeline_mode<synchronous>, transform_indices = @transform_5, window_bounds = array<i64: 128, 128>}, {pipeline_mode = #tpu.pipeline_mode<synchronous>, transform_indices = @transform_6, window_bounds = array<i64: 1, 128>}, {pipeline_mode = #tpu.pipeline_mode<synchronous>, transform_indices = @transform_7, window_bounds = array<i64: 128, 128>}, {pipeline_mode = #tpu.pipeline_mode<synchronous>, transform_indices = @transform_8, window_bounds = array<i64: 1, 128>}, {transform_indices = @transform_9, window_bounds = array<i64: 512, 2>}]} {
    %cst = arith.constant 0.000000e+00 : f32
    %0 = vector.broadcast %cst : f32 to vector<512x128xf32>
    %c0 = arith.constant 0 : index
    %c0_0 = arith.constant 0 : index
    %1 = vector.load %arg11[%c0, %c0_0] : memref<512x128xf32, #tpu.memory_space<vmem>>, vector<512x128xf32>
    tpu.vector_store %arg11[%c0, %c0_0], %0 {strides = array<i32>} : memref<512x128xf32, #tpu.memory_space<vmem>>, vector<512x128xf32>,
    %c0_1 = arith.constant 0 : index
    %c0_2 = arith.constant 0 : index
    %2 = vector.load %arg1[%c0_1, %c0_2] : memref<512x4xf32, #tpu.memory_space<vmem>>, vector<512x4xf32>
    %c0_3 = arith.constant 0 : index
    %c0_4 = arith.constant 0 : index
    %3 = vector.load %arg2[%c0_3, %c0_4] : memref<1x4xf32, #tpu.memory_space<vmem>>, vector<1x4xf32>
    %4 = vector.broadcast %3 : vector<1x4xf32> to vector<512x4xf32>
    %5 = arith.subf %2, %4 : vector<512x4xf32>
    %c0_5 = arith.constant 0 : index
    %c0_6 = arith.constant 0 : index
    %6 = vector.load %arg3[%c0_5, %c0_6] : memref<1x4xf32, #tpu.memory_space<vmem>>, vector<1x4xf32>
    %7 = vector.broadcast %6 : vector<1x4xf32> to vector<512x4xf32>
    %8 = arith.mulf %5, %7 : vector<512x4xf32>
    %c0_7 = arith.constant 0 : index
    %c0_8 = arith.constant 0 : index
    %9 = vector.load %arg11[%c0_7, %c0_8] : memref<512x128xf32, #tpu.memory_space<vmem>>, vector<512x4xf32>
    tpu.vector_store %arg11[%c0_7, %c0_8], %8 {strides = array<i32>} : memref<512x128xf32, #tpu.memory_space<vmem>>, vector<512x4xf32>,
    %c0_9 = arith.constant 0 : index
    %c0_10 = arith.constant 0 : index
    %10 = vector.load %arg11[%c0_9, %c0_10] : memref<512x128xf32, #tpu.memory_space<vmem>>, vector<512x128xf32>
    %11 = arith.truncf %10 : vector<512x128xf32> to vector<512x128xbf16>
    %c0_11 = arith.constant 0 : index
    %c0_12 = arith.constant 0 : index
    %12 = vector.load %arg4[%c0_11, %c0_12] : memref<128x128xbf16, #tpu.memory_space<vmem>>, vector<128x128xbf16>
    %c0_13 = arith.constant 0 : index
    %c0_14 = arith.constant 0 : index
    %13 = vector.load %arg5[%c0_13, %c0_14] : memref<1x128xf32, #tpu.memory_space<vmem>>, vector<1x128xf32>
    %cst_15 = arith.constant dense<0.000000e+00> : vector<512x128xf32>
    %14 = tpu.matmul %11, %12, %cst_15 {dimension_numbers = #tpu.dot_dimension_numbers<[1], [0], [0], [1], [0, 0, 1, 1], [], []>} : vector<512x128xbf16>, vector<128x128xbf16>, vector<512x128xf32> -> vector<512x128xf32>
    %15 = vector.broadcast %13 : vector<1x128xf32> to vector<512x128xf32>
    %16 = arith.addf %14, %15 : vector<512x128xf32>
    %cst_16 = arith.constant 0.000000e+00 : f32
    %17 = vector.broadcast %cst_16 : f32 to vector<512x128xf32>
    %18 = arith.maximumf %16, %17 : vector<512x128xf32>
    %19 = arith.truncf %18 : vector<512x128xf32> to vector<512x128xbf16>
    %c0_17 = arith.constant 0 : index
    %c0_18 = arith.constant 0 : index
    %20 = vector.load %arg6[%c0_17, %c0_18] : memref<128x128xbf16, #tpu.memory_space<vmem>>, vector<128x128xbf16>
    %c0_19 = arith.constant 0 : index
    %c0_20 = arith.constant 0 : index
    %21 = vector.load %arg7[%c0_19, %c0_20] : memref<1x128xf32, #tpu.memory_space<vmem>>, vector<1x128xf32>
    %cst_21 = arith.constant dense<0.000000e+00> : vector<512x128xf32>
    %22 = tpu.matmul %19, %20, %cst_21 {dimension_numbers = #tpu.dot_dimension_numbers<[1], [0], [0], [1], [0, 0, 1, 1], [], []>} : vector<512x128xbf16>, vector<128x128xbf16>, vector<512x128xf32> -> vector<512x128xf32>
    %23 = vector.broadcast %21 : vector<1x128xf32> to vector<512x128xf32>
    %24 = arith.addf %22, %23 : vector<512x128xf32>
    %cst_22 = arith.constant 0.000000e+00 : f32
    %25 = vector.broadcast %cst_22 : f32 to vector<512x128xf32>
    %26 = arith.maximumf %24, %25 : vector<512x128xf32>
    %27 = arith.truncf %26 : vector<512x128xf32> to vector<512x128xbf16>
    %c0_23 = arith.constant 0 : index
    %c0_24 = arith.constant 0 : index
    %28 = vector.load %arg8[%c0_23, %c0_24] : memref<128x128xbf16, #tpu.memory_space<vmem>>, vector<128x128xbf16>
    %c0_25 = arith.constant 0 : index
    %c0_26 = arith.constant 0 : index
    %29 = vector.load %arg9[%c0_25, %c0_26] : memref<1x128xf32, #tpu.memory_space<vmem>>, vector<1x128xf32>
    %cst_27 = arith.constant dense<0.000000e+00> : vector<512x128xf32>
    %30 = tpu.matmul %27, %28, %cst_27 {dimension_numbers = #tpu.dot_dimension_numbers<[1], [0], [0], [1], [0, 0, 1, 1], [], []>} : vector<512x128xbf16>, vector<128x128xbf16>, vector<512x128xf32> -> vector<512x128xf32>
    %31 = vector.broadcast %29 : vector<1x128xf32> to vector<512x128xf32>
    %32 = arith.addf %30, %31 : vector<512x128xf32>
    %33 = vector.extract_strided_slice %32 {offsets = [0, 0], sizes = [512, 2], strides = [1, 1]} : vector<512x128xf32> to vector<512x2xf32>
    %c0_28 = arith.constant 0 : index
    %c0_29 = arith.constant 0 : index
    %34 = vector.load %arg10[%c0_28, %c0_29] : memref<512x2xf32, #tpu.memory_space<vmem>>, vector<512x2xf32>
    tpu.vector_store %arg10[%c0_28, %c0_29], %33 {strides = array<i32>} : memref<512x2xf32, #tpu.memory_space<vmem>>, vector<512x2xf32>,
    return
  }
  func.func @transform_0(%arg0: i32) -> (i32, i32) {
    %c0_i32 = arith.constant 0 : i32
    %c0_i32_0 = arith.constant 0 : i32
    return %arg0, %c0_i32 : i32, i32
  }
  func.func @transform_1(%arg0: i32) -> (i32, i32) {
    %c0_i32 = arith.constant 0 : i32
    %c0_i32_0 = arith.constant 0 : i32
    %c0_i32_1 = arith.constant 0 : i32
    return %c0_i32, %c0_i32_0 : i32, i32
  }
  func.func @transform_2(%arg0: i32) -> (i32, i32) {
    %c0_i32 = arith.constant 0 : i32
    %c0_i32_0 = arith.constant 0 : i32
    %c0_i32_1 = arith.constant 0 : i32
    return %c0_i32, %c0_i32_0 : i32, i32
  }
  func.func @transform_3(%arg0: i32) -> (i32, i32) {
    %c0_i32 = arith.constant 0 : i32
    %c0_i32_0 = arith.constant 0 : i32
    %c0_i32_1 = arith.constant 0 : i32
    return %c0_i32, %c0_i32_0 : i32, i32
  }
  func.func @transform_4(%arg0: i32) -> (i32, i32) {
    %c0_i32 = arith.constant 0 : i32
    %c0_i32_0 = arith.constant 0 : i32
    %c0_i32_1 = arith.constant 0 : i32
    return %c0_i32, %c0_i32_0 : i32, i32
  }
  func.func @transform_5(%arg0: i32) -> (i32, i32) {
    %c0_i32 = arith.constant 0 : i32
    %c0_i32_0 = arith.constant 0 : i32
    %c0_i32_1 = arith.constant 0 : i32
    return %c0_i32, %c0_i32_0 : i32, i32
  }
  func.func @transform_6(%arg0: i32) -> (i32, i32) {
    %c0_i32 = arith.constant 0 : i32
    %c0_i32_0 = arith.constant 0 : i32
    %c0_i32_1 = arith.constant 0 : i32
    return %c0_i32, %c0_i32_0 : i32, i32
  }
  func.func @transform_7(%arg0: i32) -> (i32, i32) {
    %c0_i32 = arith.constant 0 : i32
    %c0_i32_0 = arith.constant 0 : i32
    %c0_i32_1 = arith.constant 0 : i32
    return %c0_i32, %c0_i32_0 : i32, i32
  }
  func.func @transform_8(%arg0: i32) -> (i32, i32) {
    %c0_i32 = arith.constant 0 : i32
    %c0_i32_0 = arith.constant 0 : i32
    %c0_i32_1 = arith.constant 0 : i32
    return %c0_i32, %c0_i32_0 : i32, i32
  }
  func.func @transform_9(%arg0: i32) -> (i32, i32) {
    %c0_i32 = arith.constant 0 : i32
    %c0_i32_0 = arith.constant 0 : i32
    return %arg0, %c0_i32 : i32, i32
  }
}

</mosaic_0001>

<bundles_post_ra>
// kernel: tpu_custom_call.1
= control target key start
LH: loop header
LB: loop body
LE: loop exit
PB: predicated region body
PF: predicated region fallthrough
CT: control target
= control target key end

     0   :  { %s2669_s30 = smov 0   ;;  %s3554_s0 = inlined_call_operand.vmem [shape: f32[1024,4], index: 0, kind: input, shape index: {}]   ;;  %s3555_s1 = inlined_call_operand.vmem [shape: f32[1,4], index: 1, kind: input, shape index: {}]   ;;  %s3556_s2 = inlined_call_operand.vmem [shape: f32[1,4], index: 2, kind: input, shape index: {}]   ;;  %s3557_s3 = inlined_call_operand.vmem [shape: bf16[128,128], index: 3, kind: input, shape index: {}]   ;;  %s3558_s4 = inlined_call_operand.vmem [shape: f32[1,128], index: 4, kind: input, shape index: {}]   ;;  %s3559_s5 = inlined_call_operand.vmem [shape: bf16[128,128], index: 5, kind: input, shape index: {}]   ;;  %s3560_s6 = inlined_call_operand.vmem [shape: f32[1,128], index: 6, kind: input, shape index: {}]   ;;  %s3561_s7 = inlined_call_operand.vmem [shape: bf16[128,128], index: 7, kind: input, shape index: {}]   ;;  %s3562_s8 = inlined_call_operand.vmem [shape: f32[1,128], index: 8, kind: input, shape index: {}]   ;;  %s3563_s9 = inlined_call_operand.vmem [shape: f32[1024,2], index: 9, kind: output, shape index: {}]  }
   0x1 LB: > { %s2161_s10 = sadd.s32 4294967295, %s2616_s30   ;;  %p2165_p0 = scmp.ge.s32.totalorder %s2616_s30, 1  ;;  %s2616_s30 = sphi %s2669_s30, %s19_s30  }
   0x2   : > { %p288_p1 = scmp.lt.s32.totalorder %s2616_s30, 3 }
   0x4   : > { %p289_p2 = pnand %p2165_p0, %p288_p1 }
   0x5   : > { %s2166_s13 = sshll.u32 (!%p289_p2), %s2161_s10, 6 }
   0x6   : > { %292 = sbr.rel (%p289_p2) target bundleno = 791 (0x317), region = 56  ;;  %p325_p3 = scmp.lt.s32.totalorder (!%p289_p2), %s2166_s13, 127 }
   0xb   : > { %v2680_v0 = vld [vmem:[%s3557_s3 + $0x38] sm:$0xff]   ;;  %v2685_v1 = vld [vmem:[%s3557_s3 + $0x30] sm:$0xff]   ;;  %s3565_s13 = smov (!%p325_p3, %s2166_s13), 127  ;;  %v2618_v2 = vmov 0.0   ;;  %v2588_v3 = vld [vmem:[%s3557_s3 + $0x28] sm:$0xff]   ;;  %vm607_vm0 = vcmask 31744  }
   0xc   : > { %2321 = vmatprep.subr.bf16.mxu0 %v2680_v0  ;;  %2561 = vmatprep.subr.bf16.mxu1 %v2680_v0  ;;  %337 = vst [vmem:[#allocation2] sm:$0xff] %v2618_v2  ;;  %338 = vst [vmem:[#allocation2 + $0x8] sm:$0xff] %v2618_v2  ;;  %s2167_s18 = sshll.u32 %s3565_s13, 3  ;;  %v2774_v4 = vld [vmem:[%s3557_s3 + $0x20] sm:$0xff]   ;;  %v2796_v13 = vld [vmem:[%s3557_s3 + $0x18] sm:$0xff]   ;;  %vm2040_vm1 = vcmask 15360  }
   0xd   : > { %2322 = vmatpush3.bf16.msra.mxu0 %v2680_v0  ;;  %339 = vst [vmem:[#allocation2 + $0x10] sm:$0xff] %v2618_v2  ;;  %340 = vst [vmem:[#allocation2 + $0x18] sm:$0xff] %v2618_v2  ;;  %2569 = vmatpush3.bf16.msra.mxu1 %v2680_v0  ;;  %s2768_s21 = scalar_lea.vmem %s3554_s0, %s2167_s18  ;;  %v2782_v7 = vld [vmem:[%s3555_s1] ss:$0 sm:$0xff]  ;;  %v2849_v52 = vld [vmem:[%s3557_s3 + $0x10] sm:$0xff]   ;;  %s3357_s22 = scalar_lea.vmem %s3563_s9, %s2167_s18 }
   0xe   : > { %341 = vst [vmem:[#allocation2 + $0x20] sm:$0xff] %v2618_v2  ;;  %342 = vst [vmem:[#allocation2 + $0x28] sm:$0xff] %v2618_v2  ;;  %2323 = vmatprep.subr.bf16.mxu0 %v2685_v1  ;;  %2562 = vmatprep.subr.bf16.mxu1 %v2685_v1  ;;  %v401_v5 = vld [vmem:[%s2768_s21] sm:$0xff]  ;;  %v402_v6 = vld [vmem:[%s2768_s21 + $0x8] sm:$0xff] }
   0xf   : > { %343 = vst [vmem:[#allocation2 + $0x30] sm:$0xff] %v2618_v2  ;;  %344 = vst [vmem:[#allocation2 + $0x38] sm:$0xff] %v2618_v2  ;;  %v472_v8 = vsub.f32 %v401_v5, %v2782_v7  ;;  %v473_v9 = vsub.f32 %v402_v6, %v2782_v7  ;;  %v2789_v10 = vld [vmem:[%s3556_s2] ss:$0 sm:$0xff]  ;;  %v403_v11 = vld [vmem:[%s2768_s21 + $0x10] sm:$0xff] }
  0x10   : > { %345 = vst [vmem:[#allocation2 + $0x40] sm:$0xff] %v2618_v2  ;;  %346 = vst [vmem:[#allocation2 + $0x48] sm:$0xff] %v2618_v2  ;;  %v404_v12 = vld [vmem:[%s2768_s21 + $0x18] sm:$0xff]  ;;  %v474_v14 = vsub.f32 %v403_v11, %v2782_v7  ;;  %v405_v16 = vld [vmem:[%s2768_s21 + $0x20] sm:$0xff] }
  0x11   : > { %347 = vst [vmem:[#allocation2 + $0x50] sm:$0xff] %v2618_v2  ;;  %348 = vst [vmem:[#allocation2 + $0x58] sm:$0xff] %v2618_v2  ;;  %2324 = vmatpush3.bf16.msra.mxu0 %v2685_v1  ;;  %2570 = vmatpush3.bf16.msra.mxu1 %v2685_v1  ;;  %v475_v15 = vsub.f32 %v404_v12, %v2782_v7  ;;  %v406_v17 = vld [vmem:[%s2768_s21 + $0x28] sm:$0xff]  ;;  %v407_v18 = vld [vmem:[%s2768_s21 + $0x30] sm:$0xff]  ;;  %v543_v19 = vmul.f32 %v2789_v10, %v472_v8 }
  0x12   : > { %349 = vst [vmem:[#allocation2 + $0x60] sm:$0xff] %v2618_v2  ;;  %350 = vst [vmem:[#allocation2 + $0x68] sm:$0xff] %v2618_v2  ;;  %2325 = vmatprep.subr.bf16.mxu0 %v2588_v3  ;;  %2563 = vmatprep.subr.bf16.mxu1 %v2588_v3  ;;  %v544_v20 = vmul.f32 %v2789_v10, %v473_v9  ;;  %v476_v21 = vsub.f32 %v405_v16, %v2782_v7  ;;  %v408_v23 = vld [vmem:[%s2768_s21 + $0x38] sm:$0xff]  ;;  %v409_v24 = vld [vmem:[%s2768_s21 + $0x40] sm:$0xff] }
  0x13   : > { %351 = vst [vmem:[#allocation2 + $0x70] sm:$0xff] %v2618_v2  ;;  %352 = vst [vmem:[#allocation2 + $0x78] sm:$0xff] %v2618_v2  ;;  %v477_v22 = vsub.f32 %v406_v17, %v2782_v7  ;;  %v410_v25 = vld [vmem:[%s2768_s21 + $0x48] sm:$0xff]  ;;  %v545_v26 = vmul.f32 %v2789_v10, %v474_v14  ;;  %v546_v27 = vmul.f32 %v2789_v10, %v475_v15  ;;  %v411_v30 = vld [vmem:[%s2768_s21 + $0x50] sm:$0xff] }
  0x14   : > { %353 = vst [vmem:[#allocation2 + $0x80] sm:$0xff] %v2618_v2  ;;  %354 = vst [vmem:[#allocation2 + $0x88] sm:$0xff] %v2618_v2  ;;  %v478_v28 = vsub.f32 %v407_v18, %v2782_v7  ;;  %v479_v29 = vsub.f32 %v408_v23, %v2782_v7  ;;  %v412_v31 = vld [vmem:[%s2768_s21 + $0x58] sm:$0xff]  ;;  %v413_v32 = vld [vmem:[%s2768_s21 + $0x60] sm:$0xff]  ;;  %v547_v33 = vmul.f32 %v2789_v10, %v476_v21 }
  0x15   : > { %355 = vst [vmem:[#allocation2 + $0x90] sm:$0xff] %v2618_v2  ;;  %356 = vst [vmem:[#allocation2 + $0x98] sm:$0xff] %v2618_v2  ;;  %2326 = vmatpush3.bf16.msra.mxu0 %v2588_v3  ;;  %v548_v34 = vmul.f32 %v2789_v10, %v477_v22  ;;  %v480_v35 = vsub.f32 %v409_v24, %v2782_v7  ;;  %v481_v36 = vsub.f32 %v410_v25, %v2782_v7  ;;  %v414_v37 = vld [vmem:[%s2768_s21 + $0x68] sm:$0xff]  ;;  %v415_v38 = vld [vmem:[%s2768_s21 + $0x70] sm:$0xff] }
  0x16   : > { %357 = vst [vmem:[#allocation2 + $0xa0] sm:$0xff] %v2618_v2  ;;  %358 = vst [vmem:[#allocation2 + $0xa8] sm:$0xff] %v2618_v2  ;;  %2327 = vmatprep.subr.bf16.mxu0 %v2774_v4  ;;  %v416_v39 = vld [vmem:[%s2768_s21 + $0x78] sm:$0xff]  ;;  %2571 = vmatpush3.bf16.msra.mxu1 %v2588_v3  ;;  %v549_v40 = vmul.f32 %v2789_v10, %v478_v28  ;;  %v550_v41 = vmul.f32 %v2789_v10, %v479_v29  ;;  %v417_v44 = vld [vmem:[%s2768_s21 + $0x80] sm:$0xff] }
  0x17   : > { %359 = vst [vmem:[#allocation2 + $0xb0] sm:$0xff] %v2618_v2  ;;  %360 = vst [vmem:[#allocation2 + $0xb8] sm:$0xff] %v2618_v2  ;;  %v482_v42 = vsub.f32 %v411_v30, %v2782_v7  ;;  %v483_v43 = vsub.f32 %v412_v31, %v2782_v7  ;;  %v418_v45 = vld [vmem:[%s2768_s21 + $0x88] sm:$0xff]  ;;  %2564 = vmatprep.subr.bf16.mxu1 %v2774_v4  ;;  %v551_v46 = vmul.f32 %v2789_v10, %v480_v35  ;;  %v419_v50 = vld [vmem:[%s2768_s21 + $0x90] sm:$0xff] }
  0x18   : > { %361 = vst [vmem:[#allocation2 + $0xc0] sm:$0xff] %v2618_v2  ;;  %362 = vst [vmem:[#allocation2 + $0xc8] sm:$0xff] %v2618_v2  ;;  %v552_v47 = vmul.f32 %v2789_v10, %v481_v36  ;;  %v484_v48 = vsub.f32 %v413_v32, %v2782_v7  ;;  %v485_v49 = vsub.f32 %v414_v37, %v2782_v7  ;;  %v420_v51 = vld [vmem:[%s2768_s21 + $0x98] sm:$0xff]  ;;  %v421_v57 = vld [vmem:[%s2768_s21 + $0xa0] sm:$0xff] }
  0x19   : > { %363 = vst [vmem:[#allocation2 + $0xd0] sm:$0xff] %v2618_v2  ;;  %364 = vst [vmem:[#allocation2 + $0xd8] sm:$0xff] %v2618_v2  ;;  %2328 = vmatpush3.bf16.msra.mxu0 %v2774_v4  ;;  %v553_v53 = vmul.f32 %v2789_v10, %v482_v42  ;;  %v554_v54 = vmul.f32 %v2789_v10, %v483_v43  ;;  %v486_v55 = vsub.f32 %v415_v38, %v2782_v7  ;;  %v422_v58 = vld [vmem:[%s2768_s21 + $0xa8] sm:$0xff]  ;;  %v423_v63 = vld [vmem:[%s2768_s21 + $0xb0] sm:$0xff] }
  0x1a   : > { %365 = vst [vmem:[#allocation2 + $0xe0] sm:$0xff] %v2618_v2  ;;  %366 = vst [vmem:[#allocation2 + $0xe8] sm:$0xff] %v2618_v2  ;;  %2329 = vmatprep.subr.bf16.mxu0 %v2796_v13  ;;  %v487_v56 = vsub.f32 %v416_v39, %v2782_v7  ;;  %v555_v59 = vmul.f32 %v2789_v10, %v484_v48  ;;  %v556_v60 = vmul.f32 %v2789_v10, %v485_v49  ;;  %v424_v0 = vld [vmem:[%s2768_s21 + $0xb8] sm:$0xff]  ;;  %v425_v6 = vld [vmem:[%s2768_s21 + $0xc0] sm:$0xff] }
  0x1b   : > { %367 = vst [vmem:[#allocation2 + $0xf0] sm:$0xff] %v2618_v2  ;;  %368 = vst [vmem:[#allocation2 + $0xf8] sm:$0xff] %v2618_v2  ;;  %v488_v61 = vsub.f32 %v417_v44, %v2782_v7  ;;  %v489_v62 = vsub.f32 %v418_v45, %v2782_v7  ;;  %2572 = vmatpush3.bf16.msra.mxu1 %v2774_v4  ;;  %v557_v1 = vmul.f32 %v2789_v10, %v486_v55  ;;  %v2880_v4 = vld [vmem:[%s3557_s3 + $0x8] sm:$0xff]   ;;  %v427_v21 = vld [vmem:[%s2768_s21 + $0xd0] sm:$0xff] }
  0x1c   : > { %369 = vst [vmem:[#allocation2 + $0x100] sm:$0xff] %v2618_v2  ;;  %370 = vst [vmem:[#allocation2 + $0x108] sm:$0xff] %v2618_v2  ;;  %v490_v3 = vsub.f32 %v419_v50, %v2782_v7  ;;  %v491_v5 = vsub.f32 %v420_v51, %v2782_v7  ;;  %2565 = vmatprep.subr.bf16.mxu1 %v2796_v13  ;;  %v492_v11 = vsub.f32 %v421_v57, %v2782_v7  ;;  %v426_v14 = vld [vmem:[%s2768_s21 + $0xc8] sm:$0xff]  ;;  %v2923_v35 = vld [vmem:[%s3557_s3] sm:$0xff]  }
  0x1d   : > { %371 = vst [vmem:[#allocation2 + $0x110] sm:$0xff] %v2618_v2  ;;  %372 = vst [vmem:[#allocation2 + $0x118] sm:$0xff] %v2618_v2  ;;  %2330 = vmatpush3.bf16.msra.mxu0 %v2796_v13  ;;  %v559_v8 = vmul.f32 %v2789_v10, %v488_v61  ;;  %v560_v9 = vmul.f32 %v2789_v10, %v489_v62  ;;  %v493_v12 = vsub.f32 %v422_v58, %v2782_v7  ;;  %v430_v31 = vld [vmem:[%s2768_s21 + $0xe8] sm:$0xff]  ;;  %v433_v39 = vld [vmem:[%s2768_s21 + $0x100] sm:$0xff] }
  0x1e   : > { %373 = vst [vmem:[#allocation2 + $0x120] sm:$0xff] %v2618_v2  ;;  %374 = vst [vmem:[#allocation2 + $0x128] sm:$0xff] %v2618_v2  ;;  %2331 = vmatprep.subr.bf16.mxu0 %v2849_v52  ;;  %v561_v17 = vmul.f32 %v2789_v10, %v490_v3  ;;  %v562_v18 = vmul.f32 %v2789_v10, %v491_v5  ;;  %v563_v23 = vmul.f32 %v2789_v10, %v492_v11  ;;  %v434_v43 = vld [vmem:[%s2768_s21 + $0x108] sm:$0xff]  ;;  %v435_v44 = vld [vmem:[%s2768_s21 + $0x110] sm:$0xff] }
  0x1f   : > { %375 = vst [vmem:[#allocation2 + $0x130] sm:$0xff] %v2618_v2  ;;  %376 = vst [vmem:[#allocation2 + $0x138] sm:$0xff] %v2618_v2  ;;  %v564_v24 = vmul.f32 %v2789_v10, %v493_v12  ;;  %2573 = vmatpush3.bf16.msra.mxu1 %v2796_v13  ;;  %v496_v25 = vsub.f32 %v425_v6, %v2782_v7  ;;  %v497_v30 = vsub.f32 %v426_v14, %v2782_v7  ;;  %v431_v13 = vld [vmem:[%s2768_s21 + $0xf0] sm:$0xff]  ;;  %v436_v48 = vld [vmem:[%s2768_s21 + $0x118] sm:$0xff] }
  0x20   : > { %377 = vst [vmem:[#allocation2 + $0x140] sm:$0xff] %v2618_v2  ;;  %378 = vst [vmem:[#allocation2 + $0x148] sm:$0xff] %v2618_v2  ;;  %2566 = vmatprep.subr.bf16.mxu1 %v2849_v52  ;;  %v502_v42 = vsub.f32 %v431_v13, %v2782_v7  ;;  %v437_v49 = vld [vmem:[%s2768_s21 + $0x120] sm:$0xff]  ;;  %v438_v55 = vld [vmem:[%s2768_s21 + $0x128] sm:$0xff] }
  0x21   : > { %379 = vst [vmem:[#allocation2 + $0x150] sm:$0xff] %v2618_v2  ;;  %380 = vst [vmem:[#allocation2 + $0x158] sm:$0xff] %v2618_v2  ;;  %2332 = vmatpush3.bf16.msra.mxu0 %v2849_v52  ;;  %v567_v32 = vmul.f32 %v2789_v10, %v496_v25  ;;  %v568_v36 = vmul.f32 %v2789_v10, %v497_v30  ;;  %v439_v61 = vld [vmem:[%s2768_s21 + $0x130] sm:$0xff]  ;;  %v444_v11 = vld [vmem:[%s2768_s21 + $0x158] sm:$0xff] }
  0x22   : > { %381 = vst [vmem:[#allocation2 + $0x160] sm:$0xff] %v2618_v2  ;;  %382 = vst [vmem:[#allocation2 + $0x168] sm:$0xff] %v2618_v2  ;;  %2333 = vmatprep.subr.bf16.mxu0 %v2880_v4 }
  0x23   : > { %383 = vst [vmem:[#allocation2 + $0x170] sm:$0xff] %v2618_v2  ;;  %384 = vst [vmem:[#allocation2 + $0x178] sm:$0xff] %v2618_v2  ;;  %2574 = vmatpush3.bf16.msra.mxu1 %v2849_v52 }
  0x24   : > { %385 = vst [vmem:[#allocation2 + $0x180] sm:$0xff] %v2618_v2  ;;  %386 = vst [vmem:[#allocation2 + $0x188] sm:$0xff] %v2618_v2  ;;  %2567 = vmatprep.subr.bf16.mxu1 %v2880_v4 }
  0x25   : > { %387 = vst [vmem:[#allocation2 + $0x190] sm:$0xff] %v2618_v2  ;;  %388 = vst [vmem:[#allocation2 + $0x198] sm:$0xff] %v2618_v2  ;;  %2334 = vmatpush3.bf16.msra.mxu0 %v2880_v4 }
  0x26   : > { %389 = vst [vmem:[#allocation2 + $0x1a0] sm:$0xff] %v2618_v2  ;;  %390 = vst [vmem:[#allocation2 + $0x1a8] sm:$0xff] %v2618_v2  ;;  %2335 = vmatprep.subr.bf16.mxu0 %v2923_v35 }
  0x27   : > { %391 = vst [vmem:[#allocation2 + $0x1b0] sm:$0xff] %v2618_v2  ;;  %392 = vst [vmem:[#allocation2 + $0x1b8] sm:$0xff] %v2618_v2  ;;  %2575 = vmatpush3.bf16.msra.mxu1 %v2880_v4  ;;  %v509_v4 = vsub.f32 %v438_v55, %v2782_v7 }
  0x28   : > { %393 = vst [vmem:[#allocation2 + $0x1c0] sm:$0xff] %v2618_v2  ;;  %394 = vst [vmem:[#allocation2 + $0x1c8] sm:$0xff] %v2618_v2  ;;  %2568 = vmatprep.subr.bf16.mxu1 %v2923_v35 }
  0x29   : > { %395 = vst [vmem:[#allocation2 + $0x1d0] sm:$0xff] %v2618_v2  ;;  %396 = vst [vmem:[#allocation2 + $0x1d8] sm:$0xff] %v2618_v2  ;;  %2336 = vmatpush3.bf16.msra.mxu0 %v2923_v35 }
  0x2a   : > { %397 = vst [vmem:[#allocation2 + $0x1e0] sm:$0xff] %v2618_v2  ;;  %398 = vst [vmem:[#allocation2 + $0x1e8] sm:$0xff] %v2618_v2 }
  0x2b   : > { %399 = vst [vmem:[#allocation2 + $0x1f0] sm:$0xff] %v2618_v2  ;;  %400 = vst [vmem:[#allocation2 + $0x1f8] sm:$0xff] %v2618_v2  ;;  %v558_v2 = vmul.f32 %v2789_v10, %v487_v56  ;;  %2576 = vmatpush3.bf16.msra.mxu1 %v2923_v35 }
  0x2c   : > { %608 = vst.msk [vmem:[#allocation2] sm:$0xff] %vm607_vm0, %v543_v19  ;;  %609 = vst.msk [vmem:[#allocation2 + $0x8] sm:$0xff] %vm607_vm0, %v544_v20  ;;  %v494_v19 = vsub.f32 %v423_v63, %v2782_v7  ;;  %v495_v20 = vsub.f32 %v424_v0, %v2782_v7  ;;  %v507_v63 = vsub.f32 %v436_v48, %v2782_v7 }
  0x2d   : > { %610 = vst.msk [vmem:[#allocation2 + $0x10] sm:$0xff] %vm607_vm0, %v545_v26  ;;  %611 = vst.msk [vmem:[#allocation2 + $0x18] sm:$0xff] %vm607_vm0, %v546_v27  ;;  %v428_v26 = vld [vmem:[%s2768_s21 + $0xd8] sm:$0xff]  ;;  %v429_v27 = vld [vmem:[%s2768_s21 + $0xe0] sm:$0xff]  ;;  %v508_v0 = vsub.f32 %v437_v49, %v2782_v7 }
  0x2e   : > { %612 = vst.msk [vmem:[#allocation2 + $0x20] sm:$0xff] %vm607_vm0, %v547_v33  ;;  %613 = vst.msk [vmem:[#allocation2 + $0x28] sm:$0xff] %vm607_vm0, %v548_v34  ;;  %v565_v28 = vmul.f32 %v2789_v10, %v494_v19  ;;  %v566_v29 = vmul.f32 %v2789_v10, %v495_v20  ;;  %v498_v33 = vsub.f32 %v427_v21, %v2782_v7  ;;  %v432_v34 = vld [vmem:[%s2768_s21 + $0xf8] sm:$0xff]  ;;  %v446_v21 = vld [vmem:[%s2768_s21 + $0x168] sm:$0xff] }
  0x2f   : > { %614 = vst.msk [vmem:[#allocation2 + $0x30] sm:$0xff] %vm607_vm0, %v549_v40  ;;  %615 = vst.msk [vmem:[#allocation2 + $0x38] sm:$0xff] %vm607_vm0, %v550_v41  ;;  %v499_v37 = vsub.f32 %v428_v26, %v2782_v7  ;;  %v500_v38 = vsub.f32 %v429_v27, %v2782_v7  ;;  %v501_v41 = vsub.f32 %v430_v31, %v2782_v7  ;;  %v447_v27 = vld [vmem:[%s2768_s21 + $0x170] sm:$0xff] }
  0x30   : > { %616 = vst.msk [vmem:[#allocation2 + $0x40] sm:$0xff] %vm607_vm0, %v551_v46  ;;  %617 = vst.msk [vmem:[#allocation2 + $0x48] sm:$0xff] %vm607_vm0, %v552_v47  ;;  %v569_v40 = vmul.f32 %v2789_v10, %v498_v33  ;;  %v503_v47 = vsub.f32 %v432_v34, %v2782_v7  ;;  %v578_v14 = vmul.f32 %v2789_v10, %v507_v63  ;;  %v450_v33 = vld [vmem:[%s2768_s21 + $0x188] sm:$0xff] }
  0x31   : > { %618 = vst.msk [vmem:[#allocation2 + $0x50] sm:$0xff] %vm607_vm0, %v553_v53  ;;  %619 = vst.msk [vmem:[#allocation2 + $0x58] sm:$0xff] %vm607_vm0, %v554_v54  ;;  %v570_v45 = vmul.f32 %v2789_v10, %v499_v37  ;;  %v571_v46 = vmul.f32 %v2789_v10, %v500_v38  ;;  %v572_v52 = vmul.f32 %v2789_v10, %v501_v41 }
  0x32   : > { %620 = vst.msk [vmem:[#allocation2 + $0x60] sm:$0xff] %vm607_vm0, %v555_v59  ;;  %621 = vst.msk [vmem:[#allocation2 + $0x68] sm:$0xff] %vm607_vm0, %v556_v60  ;;  %v573_v53 = vmul.f32 %v2789_v10, %v502_v42  ;;  %v504_v54 = vsub.f32 %v433_v39, %v2782_v7  ;;  %v574_v58 = vmul.f32 %v2789_v10, %v503_v47 }
  0x33   : > { %v672_v15 = vld [vmem:[#allocation2] sm:$0xff]  ;;  %v673_v16 = vld [vmem:[#allocation2 + $0x8] sm:$0xff]  ;;  %622 = vst.msk [vmem:[#allocation2 + $0x70] sm:$0xff] %vm607_vm0, %v557_v1  ;;  %623 = vst.msk [vmem:[#allocation2 + $0x78] sm:$0xff] %vm607_vm0, %v558_v2  ;;  %v505_v59 = vsub.f32 %v434_v43, %v2782_v7  ;;  %v506_v60 = vsub.f32 %v435_v44, %v2782_v7  ;;  %v515_v26 = vsub.f32 %v444_v11, %v2782_v7 }
  0x34   : > { %v736_v22 = vpack.c.bf16 %v673_v16, %v672_v15  ;;  %624 = vst.msk [vmem:[#allocation2 + $0x80] sm:$0xff] %vm607_vm0, %v559_v8  ;;  %625 = vst.msk [vmem:[#allocation2 + $0x88] sm:$0xff] %vm607_vm0, %v560_v9  ;;  %v674_v50 = vld [vmem:[#allocation2 + $0x10] sm:$0xff]  ;;  %v675_v51 = vld [vmem:[#allocation2 + $0x18] sm:$0xff]  ;;  %v575_v62 = vmul.f32 %v2789_v10, %v504_v54  ;;  %v579_v15 = vmul.f32 %v2789_v10, %v508_v0 }
  0x35   : > { %626 = vst.msk [vmem:[#allocation2 + $0x90] sm:$0xff] %vm607_vm0, %v561_v17  ;;  %627 = vst.msk [vmem:[#allocation2 + $0x98] sm:$0xff] %vm607_vm0, %v562_v18  ;;  %v676_v56 = vld [vmem:[#allocation2 + $0x20] sm:$0xff]  ;;  %v677_v57 = vld [vmem:[#allocation2 + $0x28] sm:$0xff]  ;;  %v737_v3 = vpack.c.bf16 %v675_v51, %v674_v50  ;;  %v576_v5 = vmul.f32 %v2789_v10, %v505_v59  ;;  %v577_v6 = vmul.f32 %v2789_v10, %v506_v60 }
  0x36   : > { %2337 = vmatprep.mubr.bf16.mxu0 %v736_v22  ;;  %628 = vst.msk [vmem:[#allocation2 + $0xa0] sm:$0xff] %vm607_vm0, %v563_v23  ;;  %629 = vst.msk [vmem:[#allocation2 + $0xa8] sm:$0xff] %vm607_vm0, %v564_v24  ;;  %v440_v1 = vld [vmem:[%s2768_s21 + $0x138] sm:$0xff]  ;;  %v441_v2 = vld [vmem:[%s2768_s21 + $0x140] sm:$0xff]  ;;  %v738_v12 = vpack.c.bf16 %v677_v57, %v676_v56  ;;  %v510_v16 = vsub.f32 %v439_v61, %v2782_v7  ;;  %v580_v18 = vmul.f32 %v2789_v10, %v509_v4 }
  0x37   : > { %630 = vst.msk [vmem:[#allocation2 + $0xb0] sm:$0xff] %vm607_vm0, %v565_v28  ;;  %631 = vst.msk [vmem:[#allocation2 + $0xb8] sm:$0xff] %vm607_vm0, %v566_v29  ;;  %v442_v8 = vld [vmem:[%s2768_s21 + $0x148] sm:$0xff]  ;;  %v443_v9 = vld [vmem:[%s2768_s21 + $0x150] sm:$0xff]  ;;  %v511_v19 = vsub.f32 %v440_v1, %v2782_v7  ;;  %v512_v20 = vsub.f32 %v441_v2, %v2782_v7  ;;  %2338 = vmatmul.mubr.bf16.vlgmr.msra.gmra.mxu0 %v737_v3  ;;  %v586_v38 = vmul.f32 %v2789_v10, %v515_v26 }
  0x38   : > { %632 = vst.msk [vmem:[#allocation2 + $0xc0] sm:$0xff] %vm607_vm0, %v567_v32  ;;  %633 = vst.msk [vmem:[#allocation2 + $0xc8] sm:$0xff] %vm607_vm0, %v568_v36  ;;  %v445_v17 = vld [vmem:[%s2768_s21 + $0x160] sm:$0xff]  ;;  %v2986_v22 = vld [vmem:[#allocation2 + $0x30] sm:$0xff]  ;;  %v581_v23 = vmul.f32 %v2789_v10, %v510_v16  ;;  %v513_v24 = vsub.f32 %v442_v8, %v2782_v7  ;;  %v514_v25 = vsub.f32 %v443_v9, %v2782_v7  ;;  %2341 = vmatprep.mubr.bf16.mxu0 %v738_v12 }
  0x39   : > { %634 = vst.msk [vmem:[#allocation2 + $0xd0] sm:$0xff] %vm607_vm0, %v569_v40  ;;  %635 = vst.msk [vmem:[#allocation2 + $0xd8] sm:$0xff] %vm607_vm0, %v570_v45  ;;  %v448_v28 = vld [vmem:[%s2768_s21 + $0x178] sm:$0xff]  ;;  %v582_v30 = vmul.f32 %v2789_v10, %v511_v19  ;;  %v583_v31 = vmul.f32 %v2789_v10, %v512_v20  ;;  %v516_v13 = vsub.f32 %v445_v17, %v2782_v7  ;;  %v449_v32 = vld [vmem:[%s2768_s21 + $0x180] sm:$0xff] }
  0x3a   : > { %636 = vst.msk [vmem:[#allocation2 + $0xe0] sm:$0xff] %vm607_vm0, %v571_v46  ;;  %637 = vst.msk [vmem:[#allocation2 + $0xe8] sm:$0xff] %vm607_vm0, %v572_v52  ;;  %v2997_v29 = vld [vmem:[#allocation2 + $0x38] sm:$0xff]  ;;  %v3005_v34 = vld [vmem:[#allocation2 + $0x40] sm:$0xff]  ;;  %v584_v36 = vmul.f32 %v2789_v10, %v513_v24  ;;  %v585_v37 = vmul.f32 %v2789_v10, %v514_v25  ;;  %v517_v39 = vsub.f32 %v446_v21, %v2782_v7 }
  0x3b   : > { %638 = vst.msk [vmem:[#allocation2 + $0xf0] sm:$0xff] %vm607_vm0, %v573_v53  ;;  %639 = vst.msk [vmem:[#allocation2 + $0xf8] sm:$0xff] %vm607_vm0, %v574_v58  ;;  %v3007_v35 = vld [vmem:[#allocation2 + $0x48] sm:$0xff]  ;;  %v451_v40 = vld [vmem:[%s2768_s21 + $0x190] sm:$0xff]  ;;  %v587_v41 = vmul.f32 %v2789_v10, %v516_v13  ;;  %v518_v42 = vsub.f32 %v447_v27, %v2782_v7  ;;  %v519_v43 = vsub.f32 %v448_v28, %v2782_v7 }
  0x3c   : > { %640 = vst.msk [vmem:[#allocation2 + $0x100] sm:$0xff] %vm607_vm0, %v575_v62  ;;  %641 = vst.msk [vmem:[#allocation2 + $0x108] sm:$0xff] %vm607_vm0, %v576_v5  ;;  %v452_v44 = vld [vmem:[%s2768_s21 + $0x198] sm:$0xff]  ;;  %v453_v45 = vld [vmem:[%s2768_s21 + $0x1a0] sm:$0xff]  ;;  %v739_v46 = vpack.c.bf16 %v2997_v29, %v2986_v22  ;;  %v588_v47 = vmul.f32 %v2789_v10, %v517_v39  ;;  %v520_v48 = vsub.f32 %v449_v32, %v2782_v7 }
  0x3d   : > { %642 = vst.msk [vmem:[#allocation2 + $0x110] sm:$0xff] %vm607_vm0, %v577_v6  ;;  %643 = vst.msk [vmem:[#allocation2 + $0x118] sm:$0xff] %vm607_vm0, %v578_v14  ;;  %v521_v49 = vsub.f32 %v450_v33, %v2782_v7  ;;  %v454_v50 = vld [vmem:[%s2768_s21 + $0x1a8] sm:$0xff]  ;;  %v455_v51 = vld [vmem:[%s2768_s21 + $0x1b0] sm:$0xff]  ;;  %v740_v52 = vpack.c.bf16 %v3007_v35, %v3005_v34  ;;  %v589_v54 = vmul.f32 %v2789_v10, %v518_v42 }
  0x3e   : > { %644 = vst.msk [vmem:[#allocation2 + $0x120] sm:$0xff] %vm607_vm0, %v579_v15  ;;  %645 = vst.msk [vmem:[#allocation2 + $0x128] sm:$0xff] %vm607_vm0, %v580_v18  ;;  %v590_v55 = vmul.f32 %v2789_v10, %v519_v43  ;;  %v522_v56 = vsub.f32 %v451_v40, %v2782_v7  ;;  %v456_v57 = vld [vmem:[%s2768_s21 + $0x1b8] sm:$0xff]  ;;  %v457_v58 = vld [vmem:[%s2768_s21 + $0x1c0] sm:$0xff]  ;;  %v591_v61 = vmul.f32 %v2789_v10, %v520_v48 }
  0x3f   : > { %646 = vst.msk [vmem:[#allocation2 + $0x130] sm:$0xff] %vm607_vm0, %v581_v23  ;;  %647 = vst.msk [vmem:[#allocation2 + $0x138] sm:$0xff] %vm607_vm0, %v582_v30  ;;  %v592_v62 = vmul.f32 %v2789_v10, %v521_v49  ;;  %v523_v63 = vsub.f32 %v452_v44, %v2782_v7  ;;  %v524_v0 = vsub.f32 %v453_v45, %v2782_v7  ;;  %v458_v1 = vld [vmem:[%s2768_s21 + $0x1c8] sm:$0xff]  ;;  %v3046_v2 = vld [vmem:[#allocation2 + $0x50] sm:$0xff]  ;;  %2342 = vmatmul.mubr.bf16.gmra.mxu0 %v739_v46 }
  0x40   : > { %648 = vst.msk [vmem:[#allocation2 + $0x140] sm:$0xff] %vm607_vm0, %v583_v31  ;;  %649 = vst.msk [vmem:[#allocation2 + $0x148] sm:$0xff] %vm607_vm0, %v584_v36  ;;  %v3048_v3 = vld [vmem:[#allocation2 + $0x58] sm:$0xff]  ;;  %v593_v8 = vmul.f32 %v2789_v10, %v522_v56  ;;  %v525_v9 = vsub.f32 %v454_v50, %v2782_v7  ;;  %v526_v11 = vsub.f32 %v455_v51, %v2782_v7  ;;  %v459_v12 = vld [vmem:[%s2768_s21 + $0x1d0] sm:$0xff]  ;;  %2345 = vmatprep.mubr.bf16.mxu0 %v740_v52 }
  0x41   : > { %650 = vst.msk [vmem:[#allocation2 + $0x150] sm:$0xff] %vm607_vm0, %v585_v37  ;;  %651 = vst.msk [vmem:[#allocation2 + $0x158] sm:$0xff] %vm607_vm0, %v586_v38  ;;  %v594_v16 = vmul.f32 %v2789_v10, %v523_v63  ;;  %v595_v17 = vmul.f32 %v2789_v10, %v524_v0  ;;  %v527_v18 = vsub.f32 %v456_v57, %v2782_v7  ;;  %v460_v19 = vld [vmem:[%s2768_s21 + $0x1d8] sm:$0xff]  ;;  %v461_v20 = vld [vmem:[%s2768_s21 + $0x1e0] sm:$0xff] }
  0x42   : > { %652 = vst.msk [vmem:[#allocation2 + $0x160] sm:$0xff] %vm607_vm0, %v587_v41  ;;  %653 = vst.msk [vmem:[#allocation2 + $0x168] sm:$0xff] %vm607_vm0, %v588_v47  ;;  %v684_v21 = vld [vmem:[#allocation2 + $0x60] sm:$0xff]  ;;  %v685_v22 = vld [vmem:[#allocation2 + $0x68] sm:$0xff]  ;;  %v596_v24 = vmul.f32 %v2789_v10, %v525_v9  ;;  %v597_v25 = vmul.f32 %v2789_v10, %v526_v11  ;;  %v528_v29 = vsub.f32 %v457_v58, %v2782_v7 }
  0x43   : > { %v704_v53 = vld [vmem:[#allocation2 + $0x100] sm:$0xff]  ;;  %v705_v59 = vld [vmem:[#allocation2 + $0x108] sm:$0xff]  ;;  %654 = vst.msk [vmem:[#allocation2 + $0x170] sm:$0xff] %vm607_vm0, %v589_v54  ;;  %655 = vst.msk [vmem:[#allocation2 + $0x178] sm:$0xff] %vm607_vm0, %v590_v55  ;;  %v598_v28 = vmul.f32 %v2789_v10, %v527_v18  ;;  %v529_v30 = vsub.f32 %v458_v1, %v2782_v7  ;;  %v530_v33 = vsub.f32 %v459_v12, %v2782_v7 }
  0x44   : > { %v706_v60 = vld [vmem:[#allocation2 + $0x110] sm:$0xff]  ;;  %v752_v5 = vpack.c.bf16 %v705_v59, %v704_v53  ;;  %v707_v6 = vld [vmem:[#allocation2 + $0x118] sm:$0xff]  ;;  %656 = vst.msk [vmem:[#allocation2 + $0x180] sm:$0xff] %vm607_vm0, %v591_v61  ;;  %657 = vst.msk [vmem:[#allocation2 + $0x188] sm:$0xff] %vm607_vm0, %v592_v62  ;;  %v531_v34 = vsub.f32 %v460_v19, %v2782_v7  ;;  %v532_v35 = vsub.f32 %v461_v20, %v2782_v7 }
  0x45   : > { %v708_v4 = vld [vmem:[#allocation2 + $0x120] sm:$0xff]  ;;  %v753_v14 = vpack.c.bf16 %v707_v6, %v706_v60  ;;  %v709_v15 = vld [vmem:[#allocation2 + $0x128] sm:$0xff]  ;;  %658 = vst.msk [vmem:[#allocation2 + $0x190] sm:$0xff] %vm607_vm0, %v593_v8  ;;  %659 = vst.msk [vmem:[#allocation2 + $0x198] sm:$0xff] %vm607_vm0, %v594_v16  ;;  %v741_v37 = vpack.c.bf16 %v3048_v3, %v3046_v2  ;;  %v599_v39 = vmul.f32 %v2789_v10, %v528_v29 }
  0x46   : > { %2369 = vmatprep.mubr.bf16.mxu1 %v752_v5  ;;  %v754_v23 = vpack.c.bf16 %v709_v15, %v708_v4  ;;  %v462_v26 = vld [vmem:[%s2768_s21 + $0x1e8] sm:$0xff]  ;;  %v710_v27 = vld [vmem:[#allocation2 + $0x130] sm:$0xff]  ;;  %660 = vst.msk [vmem:[#allocation2 + $0x1a0] sm:$0xff] %vm607_vm0, %v595_v17  ;;  %v711_v13 = vld [vmem:[#allocation2 + $0x138] sm:$0xff]  ;;  %v600_v40 = vmul.f32 %v2789_v10, %v529_v30  ;;  %v601_v42 = vmul.f32 %v2789_v10, %v530_v33 }
  0x47   : > { %2370 = vmatmul.mubr.bf16.vlgmr.msra.gmra.mxu1 %v753_v14  ;;  %v463_v31 = vld [vmem:[%s2768_s21 + $0x1f0] sm:$0xff]  ;;  %v712_v32 = vld [vmem:[#allocation2 + $0x140] sm:$0xff]  ;;  %661 = vst.msk [vmem:[#allocation2 + $0x1a8] sm:$0xff] %vm607_vm0, %v596_v24  ;;  %662 = vst.msk [vmem:[#allocation2 + $0x1b0] sm:$0xff] %vm607_vm0, %v597_v25  ;;  %v602_v43 = vmul.f32 %v2789_v10, %v531_v34  ;;  %v533_v44 = vsub.f32 %v462_v26, %v2782_v7  ;;  %v603_v45 = vmul.f32 %v2789_v10, %v532_v35 }
  0x48   : > { %2373 = vmatprep.mubr.bf16.mxu1 %v754_v23  ;;  %v464_v36 = vld [vmem:[%s2768_s21 + $0x1f8] sm:$0xff]  ;;  %v713_v38 = vld [vmem:[#allocation2 + $0x148] sm:$0xff]  ;;  %663 = vst.msk [vmem:[#allocation2 + $0x1b8] sm:$0xff] %vm607_vm0, %v598_v28  ;;  %v742_v46 = vpack.c.bf16 %v685_v22, %v684_v21  ;;  %v755_v47 = vpack.c.bf16 %v711_v13, %v710_v27  ;;  %664 = vst.msk [vmem:[#allocation2 + $0x1c0] sm:$0xff] %vm607_vm0, %v599_v39  ;;  %v534_v48 = vsub.f32 %v463_v31, %v2782_v7 }
  0x49   : > { %v2594_v41 = vld [vmem:[%s3559_s5 + $0x38] sm:$0xff]   ;;  %665 = vst.msk [vmem:[#allocation2 + $0x1c8] sm:$0xff] %vm607_vm0, %v600_v40  ;;  %v535_v49 = vsub.f32 %v464_v36, %v2782_v7  ;;  %v2595_v50 = vld [vmem:[%s3559_s5 + $0x30] sm:$0xff]   ;;  %v756_v51 = vpack.c.bf16 %v713_v38, %v712_v32  ;;  %666 = vst.msk [vmem:[#allocation2 + $0x1d0] sm:$0xff] %vm607_vm0, %v601_v42  ;;  %v604_v52 = vmul.f32 %v2789_v10, %v533_v44  ;;  %2346 = vmatmul.mubr.bf16.gmra.mxu0 %v741_v37 }
  0x4a   : > { %2401 = vmatprep.subr.bf16.mxu1 %v2594_v41  ;;  %667 = vst.msk [vmem:[#allocation2 + $0x1d8] sm:$0xff] %vm607_vm0, %v602_v43  ;;  %668 = vst.msk [vmem:[#allocation2 + $0x1e0] sm:$0xff] %vm607_vm0, %v603_v45  ;;  %v686_v53 = vld [vmem:[#allocation2 + $0x70] sm:$0xff]  ;;  %v687_v54 = vld [vmem:[#allocation2 + $0x78] sm:$0xff]  ;;  %v605_v55 = vmul.f32 %v2789_v10, %v534_v48  ;;  %2349 = vmatprep.mubr.bf16.mxu0 %v742_v46 }
  0x4b   : > { %2402 = vmatpush3.bf16.msra.mxu1 %v2594_v41  ;;  %v606_v7 = vmul.f32 %v2789_v10, %v535_v49  ;;  %v2596_v56 = vld [vmem:[%s3559_s5 + $0x28] sm:$0xff]   ;;  %v688_v57 = vld [vmem:[#allocation2 + $0x80] sm:$0xff]  ;;  %669 = vst.msk [vmem:[#allocation2 + $0x1e8] sm:$0xff] %vm607_vm0, %v604_v52  ;;  %v714_v59 = vld [vmem:[#allocation2 + $0x150] sm:$0xff]  ;;  %v743_v63 = vpack.c.bf16 %v687_v54, %v686_v53 }
  0x4c   : > { %2403 = vmatprep.subr.bf16.mxu1 %v2595_v50  ;;  %v689_v58 = vld [vmem:[#allocation2 + $0x88] sm:$0xff]  ;;  %v715_v60 = vld [vmem:[#allocation2 + $0x158] sm:$0xff]  ;;  %670 = vst.msk [vmem:[#allocation2 + $0x1f0] sm:$0xff] %vm607_vm0, %v605_v55  ;;  %v716_v10 = vld [vmem:[#allocation2 + $0x160] sm:$0xff] }
  0x4d   : > { %671 = vst.msk [vmem:[#allocation2 + $0x1f8] sm:$0xff] %vm607_vm0, %v606_v7  ;;  %v717_v61 = vld [vmem:[#allocation2 + $0x168] sm:$0xff]  ;;  %v2597_v62 = vld [vmem:[%s3559_s5 + $0x20] sm:$0xff]   ;;  %v744_v0 = vpack.c.bf16 %v689_v58, %v688_v57  ;;  %v757_v1 = vpack.c.bf16 %v715_v60, %v714_v59  ;;  %v690_v3 = vld [vmem:[#allocation2 + $0x90] sm:$0xff] }
  0x4e   : > { %v758_v2 = vpack.c.bf16 %v717_v61, %v716_v10  ;;  %v691_v5 = vld [vmem:[#allocation2 + $0x98] sm:$0xff]  ;;  %v692_v4 = vld [vmem:[#allocation2 + $0xa0] sm:$0xff]  ;;  %v693_v8 = vld [vmem:[#allocation2 + $0xa8] sm:$0xff] }
  0x4f   : > { %2374 = vmatmul.mubr.bf16.gmra.mxu1 %v755_v47  ;;  %v2598_v6 = vld [vmem:[%s3559_s5 + $0x18] sm:$0xff]   ;;  %v718_v9 = vld [vmem:[#allocation2 + $0x170] sm:$0xff]  ;;  %v720_v12 = vld [vmem:[#allocation2 + $0x180] sm:$0xff]  ;;  %v745_v16 = vpack.c.bf16 %v691_v5, %v690_v3  ;;  %v746_v17 = vpack.c.bf16 %v693_v8, %v692_v4 }
  0x50   : > { %2377 = vmatprep.mubr.bf16.mxu1 %v756_v51  ;;  %2404 = vmatpush3.bf16.msra.mxu1 %v2595_v50  ;;  %v719_v11 = vld [vmem:[#allocation2 + $0x178] sm:$0xff]  ;;  %v721_v14 = vld [vmem:[#allocation2 + $0x188] sm:$0xff]  ;;  %v2599_v15 = vld [vmem:[%s3559_s5 + $0x10] sm:$0xff]  }
  0x51   : > { %2405 = vmatprep.subr.bf16.mxu1 %v2596_v56  ;;  %2350 = vmatmul.mubr.bf16.gmra.mxu0 %v743_v63  ;;  %v759_v18 = vpack.c.bf16 %v719_v11, %v718_v9  ;;  %v760_v19 = vpack.c.bf16 %v721_v14, %v720_v12  ;;  %v2600_v20 = vld [vmem:[%s3559_s5 + $0x8] sm:$0xff]   ;;  %v694_v21 = vld [vmem:[#allocation2 + $0xb0] sm:$0xff]  ;;  %v695_v22 = vld [vmem:[#allocation2 + $0xb8] sm:$0xff] }
  0x52   : > { %2353 = vmatprep.mubr.bf16.mxu0 %v744_v0  ;;  %v696_v23 = vld [vmem:[#allocation2 + $0xc0] sm:$0xff]  ;;  %v697_v24 = vld [vmem:[#allocation2 + $0xc8] sm:$0xff]  ;;  %v722_v25 = vld [vmem:[#allocation2 + $0x190] sm:$0xff]  ;;  %v747_v29 = vpack.c.bf16 %v695_v22, %v694_v21 }
  0x53   : > { %v723_v26 = vld [vmem:[#allocation2 + $0x198] sm:$0xff]  ;;  %v724_v27 = vld [vmem:[#allocation2 + $0x1a0] sm:$0xff]  ;;  %v725_v28 = vld [vmem:[#allocation2 + $0x1a8] sm:$0xff]  ;;  %v748_v30 = vpack.c.bf16 %v697_v24, %v696_v23 }
  0x54   : > { %2406 = vmatpush3.bf16.msra.mxu1 %v2596_v56  ;;  %v761_v31 = vpack.c.bf16 %v723_v26, %v722_v25  ;;  %v762_v13 = vpack.c.bf16 %v725_v28, %v724_v27  ;;  %v698_v32 = vld [vmem:[#allocation2 + $0xd0] sm:$0xff]  ;;  %v699_v33 = vld [vmem:[#allocation2 + $0xd8] sm:$0xff]  ;;  %v700_v34 = vld [vmem:[#allocation2 + $0xe0] sm:$0xff] }
  0x55   : > { %2407 = vmatprep.subr.bf16.mxu1 %v2597_v62  ;;  %v701_v35 = vld [vmem:[#allocation2 + $0xe8] sm:$0xff]  ;;  %v726_v36 = vld [vmem:[#allocation2 + $0x1b0] sm:$0xff]  ;;  %v727_v37 = vld [vmem:[#allocation2 + $0x1b8] sm:$0xff]  ;;  %v749_v40 = vpack.c.bf16 %v699_v33, %v698_v32 }
  0x56   : > { %v728_v38 = vld [vmem:[#allocation2 + $0x1c0] sm:$0xff]  ;;  %v729_v39 = vld [vmem:[#allocation2 + $0x1c8] sm:$0xff]  ;;  %v750_v41 = vpack.c.bf16 %v701_v35, %v700_v34  ;;  %v763_v42 = vpack.c.bf16 %v727_v37, %v726_v36  ;;  %v702_v44 = vld [vmem:[#allocation2 + $0xf0] sm:$0xff] }
  0x57   : > { %2378 = vmatmul.mubr.bf16.gmra.mxu1 %v757_v1  ;;  %v764_v43 = vpack.c.bf16 %v729_v39, %v728_v38  ;;  %v703_v45 = vld [vmem:[#allocation2 + $0xf8] sm:$0xff]  ;;  %v730_v46 = vld [vmem:[#allocation2 + $0x1d0] sm:$0xff]  ;;  %v732_v48 = vld [vmem:[#allocation2 + $0x1e0] sm:$0xff] }
  0x58   : > { %2381 = vmatprep.mubr.bf16.mxu1 %v758_v2  ;;  %2408 = vmatpush3.bf16.msra.mxu1 %v2597_v62  ;;  %v731_v47 = vld [vmem:[#allocation2 + $0x1d8] sm:$0xff]  ;;  %v733_v49 = vld [vmem:[#allocation2 + $0x1e8] sm:$0xff]  ;;  %v751_v50 = vpack.c.bf16 %v703_v45, %v702_v44  ;;  %v734_v53 = vld [vmem:[#allocation2 + $0x1f0] sm:$0xff] }
  0x59   : > { %2409 = vmatprep.subr.bf16.mxu1 %v2598_v6  ;;  %2354 = vmatmul.mubr.bf16.gmra.mxu0 %v745_v16  ;;  %v765_v51 = vpack.c.bf16 %v731_v47, %v730_v46  ;;  %v766_v52 = vpack.c.bf16 %v733_v49, %v732_v48  ;;  %v735_v54 = vld [vmem:[#allocation2 + $0x1f8] sm:$0xff]  ;;  %v2601_v7 = vld [vmem:[%s3559_s5] sm:$0xff]   ;;  %v2603_v0 = vld [vmem:[%s3561_s7 + $0x30] sm:$0xff]  }
  0x5a   : > { %2357 = vmatprep.mubr.bf16.mxu0 %v746_v17  ;;  %v767_v55 = vpack.c.bf16 %v735_v54, %v734_v53  ;;  %v3128_v58 = vld [vmem:[%s3558_s4] ss:$0 sm:$0xff]  ;;  %v2602_v63 = vld [vmem:[%s3561_s7 + $0x38] sm:$0xff]   ;;  %v2604_v11 = vld [vmem:[%s3561_s7 + $0x28] sm:$0xff]  }
  0x5b   : > { %2481 = vmatprep.subr.bf16.mxu0 %v2602_v63  ;;  %v2605_v22 = vld [vmem:[%s3561_s7 + $0x20] sm:$0xff]  }
  0x5c   : > { %2410 = vmatpush3.bf16.msra.mxu1 %v2598_v6  ;;  %2482 = vmatpush3.bf16.msra.mxu0 %v2602_v63 }
  0x5d   : > { %2411 = vmatprep.subr.bf16.mxu1 %v2599_v15  ;;  %2483 = vmatprep.subr.bf16.mxu0 %v2603_v0 }
  0x5f   : > { %2382 = vmatmul.mubr.bf16.gmra.mxu1 %v759_v18 }
  0x60   : > { %2385 = vmatprep.mubr.bf16.mxu1 %v760_v19  ;;  %2412 = vmatpush3.bf16.msra.mxu1 %v2599_v15 }
  0x61   : > { %2413 = vmatprep.subr.bf16.mxu1 %v2600_v20  ;;  %2358 = vmatmul.mubr.bf16.gmra.mxu0 %v747_v29 }
  0x62   : > { %2361 = vmatprep.mubr.bf16.mxu0 %v748_v30  ;;  %2484 = vmatpush3.bf16.msra.mxu0 %v2603_v0 }
  0x63   : > { %2485 = vmatprep.subr.bf16.mxu0 %v2604_v11 }
  0x64   : > { %2414 = vmatpush3.bf16.msra.mxu1 %v2600_v20 }
  0x65   : > { %2415 = vmatprep.subr.bf16.mxu1 %v2601_v7 }
  0x66   : > { %2486 = vmatpush3.bf16.msra.mxu0 %v2604_v11 }
  0x67   : > { %2386 = vmatmul.mubr.bf16.gmra.mxu1 %v761_v31  ;;  %2487 = vmatprep.subr.bf16.mxu0 %v2605_v22 }
  0x68   : > { %2389 = vmatprep.mubr.bf16.mxu1 %v762_v13  ;;  %2416 = vmatpush3.bf16.msra.mxu1 %v2601_v7  ;;  %v2606_v13 = vld [vmem:[%s3561_s7 + $0x18] sm:$0xff]  }
  0x69   : > { %2362 = vmatmul.mubr.bf16.gmra.mxu0 %v749_v40 }
  0x6a   : > { %2365 = vmatprep.mubr.bf16.mxu0 %v750_v41  ;;  %2488 = vmatpush3.bf16.msra.mxu0 %v2605_v22  ;;  %v2607_v41 = vld [vmem:[%s3561_s7 + $0x10] sm:$0xff]  }
  0x6b   : > { %2489 = vmatprep.subr.bf16.mxu0 %v2606_v13 }
  0x6e   : > { %2490 = vmatpush3.bf16.msra.mxu0 %v2606_v13 }
  0x6f   : > { %2390 = vmatmul.mubr.bf16.gmra.mxu1 %v763_v42  ;;  %2491 = vmatprep.subr.bf16.mxu0 %v2607_v41 }
  0x70   : > { %2393 = vmatprep.mubr.bf16.mxu1 %v764_v43 }
  0x71   : > { %2366 = vmatmul.mubr.bf16.gmra.mxu0 %v751_v50 }
  0x72   : > { %2492 = vmatpush3.bf16.msra.mxu0 %v2607_v41 }
  0x77   : > { %2394 = vmatmul.mubr.bf16.gmra.mxu1 %v765_v51  ;;  %v2608_v51 = vld [vmem:[%s3561_s7 + $0x8] sm:$0xff]  }
  0x78   : > { %2397 = vmatprep.mubr.bf16.mxu1 %v766_v52  ;;  %2493 = vmatprep.subr.bf16.mxu0 %v2608_v51 }
  0x79   : > { %2494 = vmatpush3.bf16.msra.mxu0 %v2608_v51 }
  0x7f   : > { %2398 = vmatmul.mubr.bf16.gmra.mxu1 %v767_v55 }
  0xf7   : > { %v2339_v56 = vpop.f32.mrf.mxu0 }
  0xf8   : > { %v882_v61 = vadd.f32 %v2339_v56, %v3128_v58 }
  0xf9   : > { %v873_v57 = vpop.f32.mrf.mxu0 }
  0xfa   : > { %v874_v60 = vadd.f32 %v3128_v58, %v873_v57  ;;  %v1130_v8 = vmax.f32 %v882_v61, 0.0 }
  0xfb   : > { %v2340_v59 = vpop.f32.mrf.mxu0 }
  0xfc   : > { %v885_v10 = vadd.f32 %v2340_v59, %v3128_v58  ;;  %v1128_v5 = vmax.f32 %v874_v60, 0.0 }
  0xfd   : > { %v876_v62 = vpop.f32.mrf.mxu0 }
  0xfe   : > { %v877_v1 = vadd.f32 %v3128_v58, %v876_v62  ;;  %v1131_v2 = vmax.f32 %v885_v10, 0.0 }
  0xff   : > { %v2343_v3 = vpop.f32.mrf.mxu0 }
 0x100   : > { %v1129_v6 = vmax.f32 %v877_v1, 0.0  ;;  %v1193_v15 = vpack.c.bf16 %v1131_v2, %v1130_v8  ;;  %v898_v20 = vadd.f32 %v2343_v3, %v3128_v58 }
 0x101   : > { %v889_v9 = vpop.f32.mrf.mxu0 }
 0x102   : > { %v1192_v12 = vpack.c.bf16 %v1129_v6, %v1128_v5  ;;  %v890_v17 = vadd.f32 %v3128_v58, %v889_v9  ;;  %v1134_v30 = vmax.f32 %v898_v20, 0.0 }
 0x103   : > { %v2344_v16 = vpop.f32.mrf.mxu0 }
 0x104   : > { %v901_v18 = vadd.f32 %v2344_v16, %v3128_v58  ;;  %2417 = vmatprep.mubr.bf16.mxu1 %v1192_v12  ;;  %v1132_v27 = vmax.f32 %v890_v17, 0.0 }
 0x105   : > { %v892_v21 = vpop.f32.mrf.mxu0  ;;  %2418 = vmatmul.mubr.bf16.vlgmr.msra.gmra.mxu1 %v1193_v15 }
 0x106   : > { %v893_v23 = vadd.f32 %v3128_v58, %v892_v21  ;;  %v1135_v25 = vmax.f32 %v901_v18, 0.0 }
 0x107   : > { %v3140_v4 = vpop.f32.mrf.mxu1 }
 0x108   : > { %v1133_v28 = vmax.f32 %v893_v23, 0.0  ;;  %v1195_v34 = vpack.c.bf16 %v1135_v25, %v1134_v30 }
 0x109   : > { %v3145_v14 = vpop.f32.mrf.mxu1  ;;  %v2347_v26 = vpop.f32.mrf.mxu0 }
 0x10a   : > { %v1194_v32 = vpack.c.bf16 %v1133_v28, %v1132_v27  ;;  %v914_v39 = vadd.f32 %v2347_v26, %v3128_v58 }
 0x10b   : > { %v3149_v19 = vpop.f32.mrf.mxu1  ;;  %v905_v31 = vpop.f32.mrf.mxu0 }
 0x10c   : > { %v906_v36 = vadd.f32 %v3128_v58, %v905_v31  ;;  %2421 = vmatprep.mubr.bf16.mxu1 %v1194_v32  ;;  %v1138_v49 = vmax.f32 %v914_v39, 0.0 }
 0x10d   : > { %v3156_v24 = vpop.f32.mrf.mxu1  ;;  %v2348_v35 = vpop.f32.mrf.mxu0  ;;  %2422 = vmatmul.mubr.bf16.gmra.mxu1 %v1195_v34 }
 0x10e   : > { %v917_v37 = vadd.f32 %v2348_v35, %v3128_v58  ;;  %v1136_v46 = vmax.f32 %v906_v36, 0.0 }
 0x10f   : > { %v3158_v29 = vpop.f32.mrf.mxu1  ;;  %v908_v40 = vpop.f32.mrf.mxu0 }
 0x110   : > { %v909_v42 = vadd.f32 %v3128_v58, %v908_v40  ;;  %v1139_v44 = vmax.f32 %v917_v37, 0.0 }
 0x111   : > { %v3163_v33 = vpop.f32.mrf.mxu1  ;;  %v2351_v45 = vpop.f32.mrf.mxu0 }
 0x112   : > { %v1137_v47 = vmax.f32 %v909_v42, 0.0  ;;  %v1197_v54 = vpack.c.bf16 %v1139_v44, %v1138_v49  ;;  %v930_v59 = vadd.f32 %v2351_v45, %v3128_v58 }
 0x113   : > { %v3167_v38 = vpop.f32.mrf.mxu1  ;;  %v921_v50 = vpop.f32.mrf.mxu0 }
 0x114   : > { %v1196_v52 = vpack.c.bf16 %v1137_v47, %v1136_v46  ;;  %v922_v7 = vadd.f32 %v3128_v58, %v921_v50  ;;  %v1142_v2 = vmax.f32 %v930_v59, 0.0 }
 0x115   : > { %v3174_v43 = vpop.f32.mrf.mxu1  ;;  %v2352_v55 = vpop.f32.mrf.mxu0 }
 0x116   : > { %v933_v56 = vadd.f32 %v2352_v55, %v3128_v58  ;;  %2425 = vmatprep.mubr.bf16.mxu1 %v1196_v52  ;;  %v1140_v0 = vmax.f32 %v922_v7, 0.0 }
 0x117   : > { %v3176_v48 = vpop.f32.mrf.mxu1  ;;  %v924_v60 = vpop.f32.mrf.mxu0  ;;  %2426 = vmatmul.mubr.bf16.gmra.mxu1 %v1197_v54 }
 0x118   : > { %v925_v10 = vadd.f32 %v3128_v58, %v924_v60  ;;  %v1143_v61 = vmax.f32 %v933_v56, 0.0 }
 0x119   : > { %v3181_v53 = vpop.f32.mrf.mxu1  ;;  %v2355_v62 = vpop.f32.mrf.mxu0 }
 0x11a   : > { %v1141_v1 = vmax.f32 %v925_v10, 0.0  ;;  %v1199_v6 = vpack.c.bf16 %v1143_v61, %v1142_v2  ;;  %v946_v15 = vadd.f32 %v2355_v62, %v3128_v58  ;;  %v1002_v2 = vadd.f32 %v3128_v58, %v3145_v14 }
 0x11b   : > { %v3185_v57 = vpop.f32.mrf.mxu1  ;;  %v937_v3 = vpop.f32.mrf.mxu0 }
 0x11c   : > { %v1198_v5 = vpack.c.bf16 %v1141_v1, %v1140_v0  ;;  %v938_v11 = vadd.f32 %v3128_v58, %v937_v3  ;;  %v1146_v25 = vmax.f32 %v946_v15, 0.0  ;;  %v1005_v3 = vadd.f32 %v3128_v58, %v3156_v24 }
 0x11d   : > { %v3189_v63 = vpop.f32.mrf.mxu1  ;;  %v2356_v8 = vpop.f32.mrf.mxu0 }
 0x11e   : > { %v949_v12 = vadd.f32 %v2356_v8, %v3128_v58  ;;  %2429 = vmatprep.mubr.bf16.mxu1 %v1198_v5  ;;  %v1144_v22 = vmax.f32 %v938_v11, 0.0  ;;  %v1161_v14 = vmax.f32 %v1005_v3, 0.0 }
 0x11f   : > { %v3191_v9 = vpop.f32.mrf.mxu1  ;;  %v940_v16 = vpop.f32.mrf.mxu0  ;;  %2430 = vmatmul.mubr.bf16.gmra.mxu1 %v1199_v6 }
 0x120   : > { %v941_v17 = vadd.f32 %v3128_v58, %v940_v16  ;;  %v1147_v18 = vmax.f32 %v949_v12, 0.0 }
 0x121   : > { %v2359_v20 = vpop.f32.mrf.mxu0  ;;  %v3197_v21 = vpop.f32.mrf.mxu1 }
 0x122   : > { %v1145_v23 = vmax.f32 %v941_v17, 0.0  ;;  %v1201_v28 = vpack.c.bf16 %v1147_v18, %v1146_v25  ;;  %v962_v34 = vadd.f32 %v2359_v20, %v3128_v58  ;;  %v1160_v17 = vmax.f32 %v1002_v2, 0.0 }
 0x123   : > { %v953_v26 = vpop.f32.mrf.mxu0  ;;  %v3199_v31 = vpop.f32.mrf.mxu1  ;;  %v1058_v2 = vadd.f32 %v3191_v9, %v3128_v58 }
 0x124   : > { %v1200_v27 = vpack.c.bf16 %v1145_v23, %v1144_v22  ;;  %v954_v13 = vadd.f32 %v3128_v58, %v953_v26  ;;  %v1150_v44 = vmax.f32 %v962_v34, 0.0  ;;  %v1013_v34 = vadd.f32 %v3149_v19, %v3128_v58 }
 0x125   : > { %v2360_v30 = vpop.f32.mrf.mxu0  ;;  %v3205_v40 = vpop.f32.mrf.mxu1  ;;  %v1026_v19 = vadd.f32 %v3158_v29, %v3128_v58  ;;  %v1042_v29 = vadd.f32 %v3176_v48, %v3128_v58  ;;  %v1061_v3 = vadd.f32 %v3199_v31, %v3128_v58 }
 0x126   : > { %v965_v32 = vadd.f32 %v2360_v30, %v3128_v58  ;;  %2433 = vmatprep.mubr.bf16.mxu1 %v1200_v27  ;;  %v1148_v41 = vmax.f32 %v954_v13, 0.0  ;;  %v1208_v27 = vpack.c.bf16 %v1161_v14, %v1160_v17  ;;  %v1021_v30 = vadd.f32 %v3128_v58, %v3174_v43 }
 0x127   : > { %v956_v35 = vpop.f32.mrf.mxu0  ;;  %2434 = vmatmul.mubr.bf16.gmra.mxu1 %v1201_v28  ;;  %v3207_v50 = vpop.f32.mrf.mxu1  ;;  %v1018_v28 = vadd.f32 %v3128_v58, %v3163_v33  ;;  %v1010_v13 = vadd.f32 %v3140_v4, %v3128_v58  ;;  %v1034_v43 = vadd.f32 %v3128_v58, %v3181_v53  ;;  %v1037_v4 = vadd.f32 %v3128_v58, %v3189_v63 }
 0x128   : > { %v957_v36 = vadd.f32 %v3128_v58, %v956_v35  ;;  %v1151_v37 = vmax.f32 %v965_v32, 0.0  ;;  %v1050_v53 = vadd.f32 %v3128_v58, %v3197_v21  ;;  %v1053_v63 = vadd.f32 %v3128_v58, %v3205_v40 }
 0x129   : > { %v2363_v39 = vpop.f32.mrf.mxu0  ;;  %v3213_v60 = vpop.f32.mrf.mxu1  ;;  %v1170_v21 = vmax.f32 %v1042_v29, 0.0  ;;  %v1074_v9 = vadd.f32 %v3207_v50, %v3128_v58 }
 0x12a   : > { %v1149_v42 = vmax.f32 %v957_v36, 0.0  ;;  %v1203_v47 = vpack.c.bf16 %v1151_v37, %v1150_v44  ;;  %v978_v54 = vadd.f32 %v2363_v39, %v3128_v58  ;;  %v1164_v36 = vmax.f32 %v1018_v28, 0.0 }
 0x12b   : > { %v969_v45 = vpop.f32.mrf.mxu0  ;;  %v3219_v8 = vpop.f32.mrf.mxu1  ;;  %v1165_v37 = vmax.f32 %v1021_v30, 0.0  ;;  %v1162_v39 = vmax.f32 %v1010_v13, 0.0  ;;  %v1066_v48 = vadd.f32 %v3128_v58, %v3213_v60 }
 0x12c   : > { %v1202_v46 = vpack.c.bf16 %v1149_v42, %v1148_v41  ;;  %v970_v51 = vadd.f32 %v3128_v58, %v969_v45  ;;  %v1154_v62 = vmax.f32 %v978_v54, 0.0  ;;  %v1163_v41 = vmax.f32 %v1013_v34, 0.0 }
 0x12d   : > { %v2364_v49 = vpop.f32.mrf.mxu0  ;;  %v1068_v22 = vpop.f32.mrf.mxu1  ;;  %v1210_v42 = vpack.c.bf16 %v1165_v37, %v1164_v36  ;;  %v1029_v45 = vadd.f32 %v3167_v38, %v3128_v58  ;;  %v1045_v38 = vadd.f32 %v3185_v57, %v3128_v58  ;;  %v1077_v31 = vadd.f32 %v3219_v8, %v3128_v58 }
 0x12e   : > { %v981_v52 = vadd.f32 %v2364_v49, %v3128_v58  ;;  %2437 = vmatprep.mubr.bf16.mxu1 %v1202_v46  ;;  %v1152_v10 = vmax.f32 %v970_v51, 0.0  ;;  %v1209_v44 = vpack.c.bf16 %v1163_v41, %v1162_v39  ;;  %v1169_v49 = vmax.f32 %v1037_v4, 0.0 }
 0x12f   : > { %v972_v55 = vpop.f32.mrf.mxu0  ;;  %2438 = vmatmul.mubr.bf16.gmra.mxu1 %v1203_v47  ;;  %v3233_v35 = vpop.f32.mrf.mxu1  ;;  %v1168_v47 = vmax.f32 %v1034_v43, 0.0  ;;  %v1166_v51 = vmax.f32 %v1026_v19, 0.0  ;;  %v1069_v57 = vadd.f32 %v3128_v58, %v1068_v22 }
 0x130   : > { %v973_v7 = vadd.f32 %v3128_v58, %v972_v55  ;;  %v1155_v56 = vmax.f32 %v981_v52, 0.0  ;;  %v1167_v52 = vmax.f32 %v1029_v45, 0.0  ;;  %v1090_v50 = vadd.f32 %v3233_v35, %v3128_v58 }
 0x131   : > { %v2367_v59 = vpop.f32.mrf.mxu0  ;;  %v1081_v33 = vpop.f32.mrf.mxu1  ;;  %v1212_v55 = vpack.c.bf16 %v1169_v49, %v1168_v47 }
 0x132   : > { %v1153_v61 = vmax.f32 %v973_v7, 0.0  ;;  %v1205_v5 = vpack.c.bf16 %v1155_v56, %v1154_v62  ;;  %v994_v15 = vadd.f32 %v2367_v59, %v3128_v58  ;;  %v1211_v7 = vpack.c.bf16 %v1167_v52, %v1166_v51  ;;  %v2609_v59 = vld [vmem:[%s3561_s7] sm:$0xff]  }
 0x133   : > { %v985_v0 = vpop.f32.mrf.mxu0  ;;  %v2392_v46 = vpop.f32.mrf.mxu1  ;;  %v1171_v62 = vmax.f32 %v1045_v38, 0.0  ;;  %2495 = vmatprep.subr.bf16.mxu0 %v2609_v59  ;;  %v1082_v60 = vadd.f32 %v3128_v58, %v1081_v33  ;;  %v1182_v37 = vmax.f32 %v1090_v50, 0.0  ;;  %v3281_v38 = vld [vmem:[%s3560_s6] ss:$0 sm:$0xff] }
 0x134   : > { %v1204_v1 = vpack.c.bf16 %v1153_v61, %v1152_v10  ;;  %v986_v11 = vadd.f32 %v3128_v58, %v985_v0  ;;  %v1158_v25 = vmax.f32 %v994_v15, 0.0  ;;  %v1172_v10 = vmax.f32 %v1050_v53, 0.0  ;;  %2496 = vmatpush3.bf16.msra.mxu0 %v2609_v59 }
 0x135   : > { %v2368_v6 = vpop.f32.mrf.mxu0  ;;  %v1084_v54 = vpop.f32.mrf.mxu1  ;;  %v1173_v61 = vmax.f32 %v1053_v63, 0.0  ;;  %v1175_v15 = vmax.f32 %v1061_v3, 0.0  ;;  %v1180_v22 = vmax.f32 %v1082_v60, 0.0 }
 0x136   : > { %v997_v12 = vadd.f32 %v2368_v6, %v3128_v58  ;;  %2441 = vmatprep.mubr.bf16.mxu1 %v1204_v1  ;;  %v1156_v24 = vmax.f32 %v986_v11, 0.0  ;;  %v1213_v1 = vpack.c.bf16 %v1171_v62, %v1170_v21  ;;  %v1176_v6 = vmax.f32 %v1066_v48, 0.0 }
 0x137   : > { %v988_v16 = vpop.f32.mrf.mxu0  ;;  %2442 = vmatmul.mubr.bf16.gmra.mxu1 %v1205_v5  ;;  %v2395_v56 = vpop.f32.mrf.mxu1  ;;  %v1214_v40 = vpack.c.bf16 %v1173_v61, %v1172_v10  ;;  %v1177_v11 = vmax.f32 %v1069_v57, 0.0 }
 0x138   : > { %v989_v18 = vadd.f32 %v3128_v58, %v988_v16  ;;  %v1159_v20 = vmax.f32 %v997_v12, 0.0  ;;  %v1174_v12 = vmax.f32 %v1058_v2, 0.0 }
 0x139   : > { %v1097_v0 = vpop.f32.mrf.mxu1  ;;  %v1216_v17 = vpack.c.bf16 %v1177_v11, %v1176_v6 }
 0x13a   : > { %v1157_v23 = vmax.f32 %v989_v18, 0.0  ;;  %v1207_v32 = vpack.c.bf16 %v1159_v20, %v1158_v25  ;;  %v1085_v18 = vadd.f32 %v3128_v58, %v1084_v54  ;;  %v1215_v14 = vpack.c.bf16 %v1175_v15, %v1174_v12 }
 0x13b   : > { %v2396_v5 = vpop.f32.mrf.mxu1  ;;  %v1179_v25 = vmax.f32 %v1077_v31, 0.0  ;;  %v1098_v28 = vadd.f32 %v3128_v58, %v1097_v0 }
 0x13c   : > { %v1206_v26 = vpack.c.bf16 %v1157_v23, %v1156_v24  ;;  %v1181_v24 = vmax.f32 %v1085_v18, 0.0  ;;  %v1178_v23 = vmax.f32 %v1074_v9, 0.0  ;;  %v1109_v35 = vadd.f32 %v2396_v5, %v3128_v58 }
 0x13d   : > { %v1100_v16 = vpop.f32.mrf.mxu1  ;;  %v1184_v34 = vmax.f32 %v1098_v28, 0.0 }
 0x13e   : > { %2445 = vmatprep.mubr.bf16.mxu1 %v1206_v26  ;;  %v1101_v30 = vadd.f32 %v3128_v58, %v1100_v16  ;;  %v1217_v13 = vpack.c.bf16 %v1179_v25, %v1178_v23  ;;  %v1187_v47 = vmax.f32 %v1109_v35, 0.0 }
 0x13f   : > { %2446 = vmatmul.mubr.bf16.gmra.mxu1 %v1207_v32  ;;  %v2399_v20 = vpop.f32.mrf.mxu1  ;;  %v1093_v32 = vadd.f32 %v2392_v46, %v3128_v58 }
 0x140   : > { %2449 = vmatprep.mubr.bf16.mxu1 %v1208_v27  ;;  %v1218_v27 = vpack.c.bf16 %v1181_v24, %v1180_v22  ;;  %v1185_v36 = vmax.f32 %v1101_v30, 0.0  ;;  %v1122_v52 = vadd.f32 %v2399_v20, %v3128_v58 }
 0x141   : > { %v1113_v26 = vpop.f32.mrf.mxu1  ;;  %v1183_v39 = vmax.f32 %v1093_v32, 0.0 }
 0x142   : > { %v1220_v33 = vpack.c.bf16 %v1185_v36, %v1184_v34 }
 0x143   : > { %v2400_v8 = vpop.f32.mrf.mxu1  ;;  %v1219_v4 = vpack.c.bf16 %v1183_v39, %v1182_v37 }
 0x144   : > { %v1125_v54 = vadd.f32 %v2400_v8, %v3128_v58 }
 0x145   : > { %v1116_v41 = vpop.f32.mrf.mxu1 }
 0x146   : > { %v1117_v43 = vadd.f32 %v3128_v58, %v1116_v41  ;;  %v1191_v53 = vmax.f32 %v1125_v54, 0.0 }
 0x147   : > { %2450 = vmatmul.mubr.bf16.gmra.mxu1 %v1209_v44  ;;  %v1106_v44 = vadd.f32 %v2395_v56, %v3128_v58 }
 0x148   : > { %2453 = vmatprep.mubr.bf16.mxu1 %v1210_v42  ;;  %v1114_v42 = vadd.f32 %v3128_v58, %v1113_v26  ;;  %v1189_v45 = vmax.f32 %v1117_v43, 0.0 }
 0x149   : > { %v1186_v46 = vmax.f32 %v1106_v44, 0.0 }
 0x14a   : > { %v1188_v19 = vmax.f32 %v1114_v42, 0.0 }
 0x14b   : > { %v1221_v51 = vpack.c.bf16 %v1187_v47, %v1186_v46 }
 0x14c   : > { %v1222_v49 = vpack.c.bf16 %v1189_v45, %v1188_v19 }
 0x14f   : > { %2454 = vmatmul.mubr.bf16.gmra.mxu1 %v1211_v7 }
 0x150   : > { %2457 = vmatprep.mubr.bf16.mxu1 %v1212_v55  ;;  %v1190_v55 = vmax.f32 %v1122_v52, 0.0 }
 0x152   : > { %v1223_v63 = vpack.c.bf16 %v1191_v53, %v1190_v55 }
 0x157   : > { %2458 = vmatmul.mubr.bf16.gmra.mxu1 %v1213_v1 }
 0x158   : > { %2461 = vmatprep.mubr.bf16.mxu1 %v1214_v40 }
 0x15f   : > { %2462 = vmatmul.mubr.bf16.gmra.mxu1 %v1215_v14 }
 0x160   : > { %2465 = vmatprep.mubr.bf16.mxu1 %v1216_v17 }
 0x167   : > { %2466 = vmatmul.mubr.bf16.gmra.mxu1 %v1217_v13 }
 0x168   : > { %2469 = vmatprep.mubr.bf16.mxu1 %v1218_v27 }
 0x16f   : > { %2470 = vmatmul.mubr.bf16.gmra.mxu1 %v1219_v4 }
 0x170   : > { %2473 = vmatprep.mubr.bf16.mxu1 %v1220_v33 }
 0x177   : > { %2474 = vmatmul.mubr.bf16.gmra.mxu1 %v1221_v51 }
 0x178   : > { %2477 = vmatprep.mubr.bf16.mxu1 %v1222_v49 }
 0x17f   : > { %2478 = vmatmul.mubr.bf16.gmra.mxu1 %v1223_v63 }
 0x1c5   : > { %v2419_v7 = vpop.f32.mrf.mxu1 }
 0x1c6   : > { %v1338_v58 = vadd.f32 %v2419_v7, %v3281_v38 }
 0x1c7   : > { %v1329_v29 = vpop.f32.mrf.mxu1 }
 0x1c8   : > { %v1330_v59 = vadd.f32 %v3281_v38, %v1329_v29  ;;  %v1586_v57 = vmax.f32 %v1338_v58, 0.0 }
 0x1c9   : > { %v2420_v56 = vpop.f32.mrf.mxu1 }
 0x1ca   : > { %v1341_v10 = vadd.f32 %v2420_v56, %v3281_v38  ;;  %v1584_v40 = vmax.f32 %v1330_v59, 0.0 }
 0x1cb   : > { %v1332_v61 = vpop.f32.mrf.mxu1 }
 0x1cc   : > { %v1333_v21 = vadd.f32 %v3281_v38, %v1332_v61  ;;  %v1587_v62 = vmax.f32 %v1341_v10, 0.0 }
 0x1cd   : > { %v2423_v0 = vpop.f32.mrf.mxu1 }
 0x1ce   : > { %v1585_v48 = vmax.f32 %v1333_v21, 0.0  ;;  %v1649_v3 = vpack.c.bf16 %v1587_v62, %v1586_v57  ;;  %v1354_v12 = vadd.f32 %v2423_v0, %v3281_v38 }
 0x1cf   : > { %v1345_v1 = vpop.f32.mrf.mxu1 }
 0x1d0   : > { %v1648_v2 = vpack.c.bf16 %v1585_v48, %v1584_v40  ;;  %v1346_v6 = vadd.f32 %v3281_v38, %v1345_v1  ;;  %v1590_v9 = vmax.f32 %v1354_v12, 0.0 }
 0x1d1   : > { %v2424_v5 = vpop.f32.mrf.mxu1 }
 0x1d2   : > { %v1357_v11 = vadd.f32 %v2424_v5, %v3281_v38  ;;  %2497 = vmatprep.mubr.bf16.mxu0 %v1648_v2  ;;  %v1588_v18 = vmax.f32 %v1346_v6, 0.0 }
 0x1d3   : > { %v1348_v15 = vpop.f32.mrf.mxu1  ;;  %2498 = vmatmul.mubr.bf16.vlgmr.msra.gmra.mxu0 %v1649_v3 }
 0x1d4   : > { %v1349_v16 = vadd.f32 %v3281_v38, %v1348_v15  ;;  %v1591_v17 = vmax.f32 %v1357_v11, 0.0 }
 0x1d6   : > { %v1589_v14 = vmax.f32 %v1349_v16, 0.0  ;;  %v1651_v22 = vpack.c.bf16 %v1591_v17, %v1590_v9 }
 0x1d7   : > { %v2427_v60 = vpop.f32.mrf.mxu1 }
 0x1d8   : > { %v1650_v20 = vpack.c.bf16 %v1589_v14, %v1588_v18  ;;  %v1370_v26 = vadd.f32 %v2427_v60, %v3281_v38 }
 0x1d9   : > { %v1361_v31 = vpop.f32.mrf.mxu1 }
 0x1da   : > { %v1362_v23 = vadd.f32 %v3281_v38, %v1361_v31  ;;  %2501 = vmatprep.mubr.bf16.mxu0 %v1650_v20  ;;  %v1594_v8 = vmax.f32 %v1370_v26, 0.0 }
 0x1db   : > { %v2428_v24 = vpop.f32.mrf.mxu1  ;;  %2502 = vmatmul.mubr.bf16.gmra.mxu0 %v1651_v22 }
 0x1dc   : > { %v1373_v25 = vadd.f32 %v2428_v24, %v3281_v38  ;;  %v1592_v50 = vmax.f32 %v1362_v23, 0.0 }
 0x1dd   : > { %v1364_v27 = vpop.f32.mrf.mxu1 }
 0x1de   : > { %v1365_v28 = vadd.f32 %v3281_v38, %v1364_v27  ;;  %v1595_v30 = vmax.f32 %v1373_v25, 0.0 }
 0x1df   : > { %v2431_v13 = vpop.f32.mrf.mxu1 }
 0x1e0   : > { %v1593_v32 = vmax.f32 %v1365_v28, 0.0  ;;  %v1653_v37 = vpack.c.bf16 %v1595_v30, %v1594_v8  ;;  %v1386_v42 = vadd.f32 %v2431_v13, %v3281_v38 }
 0x1e1   : > { %v1377_v34 = vpop.f32.mrf.mxu1 }
 0x1e2   : > { %v1652_v36 = vpack.c.bf16 %v1593_v32, %v1592_v50  ;;  %v1378_v41 = vadd.f32 %v3281_v38, %v1377_v34  ;;  %v1598_v46 = vmax.f32 %v1386_v42, 0.0 }
 0x1e3   : > { %v2432_v39 = vpop.f32.mrf.mxu1 }
 0x1e4   : > { %v1389_v33 = vadd.f32 %v2432_v39, %v3281_v38  ;;  %2505 = vmatprep.mubr.bf16.mxu0 %v1652_v36  ;;  %v1596_v19 = vmax.f32 %v1378_v41, 0.0 }
 0x1e5   : > { %v1380_v43 = vpop.f32.mrf.mxu1  ;;  %2506 = vmatmul.mubr.bf16.gmra.mxu0 %v1653_v37 }
 0x1e6   : > { %v1381_v4 = vadd.f32 %v3281_v38, %v1380_v43  ;;  %v1599_v44 = vmax.f32 %v1389_v33, 0.0 }
 0x1e7   : > { %v2435_v35 = vpop.f32.mrf.mxu1 }
 0x1e8   : > { %v1597_v45 = vmax.f32 %v1381_v4, 0.0  ;;  %v1655_v51 = vpack.c.bf16 %v1599_v44, %v1598_v46  ;;  %v1402_v53 = vadd.f32 %v2435_v35, %v3281_v38 }
 0x1e9   : > { %v1393_v47 = vpop.f32.mrf.mxu1 }
 0x1ea   : > { %v1654_v49 = vpack.c.bf16 %v1597_v45, %v1596_v19  ;;  %v1394_v54 = vadd.f32 %v3281_v38, %v1393_v47  ;;  %v1602_v58 = vmax.f32 %v1402_v53, 0.0 }
 0x1eb   : > { %v2436_v52 = vpop.f32.mrf.mxu1 }
 0x1ec   : > { %v1405_v55 = vadd.f32 %v2436_v52, %v3281_v38  ;;  %2509 = vmatprep.mubr.bf16.mxu0 %v1654_v49  ;;  %v1600_v59 = vmax.f32 %v1394_v54, 0.0 }
 0x1ed   : > { %v1396_v63 = vpop.f32.mrf.mxu1  ;;  %2510 = vmatmul.mubr.bf16.gmra.mxu0 %v1655_v51 }
 0x1ee   : > { %v1397_v7 = vadd.f32 %v3281_v38, %v1396_v63  ;;  %v1603_v29 = vmax.f32 %v1405_v55, 0.0 }
 0x1ef   : > { %v2439_v56 = vpop.f32.mrf.mxu1 }
 0x1f0   : > { %v1601_v10 = vmax.f32 %v1397_v7, 0.0  ;;  %v1657_v62 = vpack.c.bf16 %v1603_v29, %v1602_v58  ;;  %v1418_v57 = vadd.f32 %v2439_v56, %v3281_v38 }
 0x1f1   : > { %v1409_v61 = vpop.f32.mrf.mxu1 }
 0x1f2   : > { %v1656_v21 = vpack.c.bf16 %v1601_v10, %v1600_v59  ;;  %v1410_v40 = vadd.f32 %v3281_v38, %v1409_v61  ;;  %v1606_v12 = vmax.f32 %v1418_v57, 0.0 }
 0x1f3   : > { %v2440_v0 = vpop.f32.mrf.mxu1 }
 0x1f4   : > { %v1421_v48 = vadd.f32 %v2440_v0, %v3281_v38  ;;  %2513 = vmatprep.mubr.bf16.mxu0 %v1656_v21  ;;  %v1604_v6 = vmax.f32 %v1410_v40, 0.0 }
 0x1f5   : > { %v1412_v1 = vpop.f32.mrf.mxu1  ;;  %2514 = vmatmul.mubr.bf16.gmra.mxu0 %v1657_v62 }
 0x1f6   : > { %v1413_v2 = vadd.f32 %v3281_v38, %v1412_v1  ;;  %v1607_v3 = vmax.f32 %v1421_v48, 0.0 }
 0x1f7   : > { %v2443_v5 = vpop.f32.mrf.mxu1 }
 0x1f8   : > { %v1605_v11 = vmax.f32 %v1413_v2, 0.0  ;;  %v1659_v17 = vpack.c.bf16 %v1607_v3, %v1606_v12  ;;  %v1434_v9 = vadd.f32 %v2443_v5, %v3281_v38 }
 0x1f9   : > { %v1425_v15 = vpop.f32.mrf.mxu1 }
 0x1fa   : > { %v1658_v16 = vpack.c.bf16 %v1605_v11, %v1604_v6  ;;  %v1426_v18 = vadd.f32 %v3281_v38, %v1425_v15  ;;  %v1610_v26 = vmax.f32 %v1434_v9, 0.0 }
 0x1fb   : > { %v2444_v60 = vpop.f32.mrf.mxu1 }
 0x1fc   : > { %v1437_v14 = vadd.f32 %v2444_v60, %v3281_v38  ;;  %2517 = vmatprep.mubr.bf16.mxu0 %v1658_v16  ;;  %v1608_v23 = vmax.f32 %v1426_v18, 0.0 }
 0x1fd   : > { %v1428_v31 = vpop.f32.mrf.mxu1  ;;  %2518 = vmatmul.mubr.bf16.gmra.mxu0 %v1659_v17 }
 0x1fe   : > { %v1429_v20 = vadd.f32 %v3281_v38, %v1428_v31  ;;  %v1611_v22 = vmax.f32 %v1437_v14, 0.0 }
 0x1ff   : > { %v2447_v24 = vpop.f32.mrf.mxu1 }
 0x200   : > { %v1609_v25 = vmax.f32 %v1429_v20, 0.0  ;;  %v1661_v30 = vpack.c.bf16 %v1611_v22, %v1610_v26  ;;  %v1450_v8 = vadd.f32 %v2447_v24, %v3281_v38 }
 0x201   : > { %v1441_v27 = vpop.f32.mrf.mxu1 }
 0x202   : > { %v1660_v28 = vpack.c.bf16 %v1609_v25, %v1608_v23  ;;  %v1442_v50 = vadd.f32 %v3281_v38, %v1441_v27  ;;  %v1614_v42 = vmax.f32 %v1450_v8, 0.0 }
 0x203   : > { %v2448_v13 = vpop.f32.mrf.mxu1 }
 0x204   : > { %v1453_v32 = vadd.f32 %v2448_v13, %v3281_v38  ;;  %2521 = vmatprep.mubr.bf16.mxu0 %v1660_v28  ;;  %v1612_v41 = vmax.f32 %v1442_v50, 0.0 }
 0x205   : > { %v1444_v34 = vpop.f32.mrf.mxu1  ;;  %2522 = vmatmul.mubr.bf16.gmra.mxu0 %v1661_v30 }
 0x206   : > { %v1445_v36 = vadd.f32 %v3281_v38, %v1444_v34  ;;  %v1615_v37 = vmax.f32 %v1453_v32, 0.0 }
 0x207   : > { %v2451_v39 = vpop.f32.mrf.mxu1 }
 0x208   : > { %v1613_v33 = vmax.f32 %v1445_v36, 0.0  ;;  %v1663_v44 = vpack.c.bf16 %v1615_v37, %v1614_v42  ;;  %v1466_v46 = vadd.f32 %v2451_v39, %v3281_v38 }
 0x209   : > { %v1457_v43 = vpop.f32.mrf.mxu1 }
 0x20a   : > { %v1662_v4 = vpack.c.bf16 %v1613_v33, %v1612_v41  ;;  %v1458_v19 = vadd.f32 %v3281_v38, %v1457_v43  ;;  %v1618_v53 = vmax.f32 %v1466_v46, 0.0 }
 0x20b   : > { %v2452_v35 = vpop.f32.mrf.mxu1 }
 0x20c   : > { %v1469_v45 = vadd.f32 %v2452_v35, %v3281_v38  ;;  %2525 = vmatprep.mubr.bf16.mxu0 %v1662_v4  ;;  %v1616_v54 = vmax.f32 %v1458_v19, 0.0 }
 0x20d   : > { %v1460_v47 = vpop.f32.mrf.mxu1  ;;  %2526 = vmatmul.mubr.bf16.gmra.mxu0 %v1663_v44 }
 0x20e   : > { %v1461_v49 = vadd.f32 %v3281_v38, %v1460_v47  ;;  %v1619_v51 = vmax.f32 %v1469_v45, 0.0 }
 0x20f   : > { %v2455_v52 = vpop.f32.mrf.mxu1 }
 0x210   : > { %v1617_v55 = vmax.f32 %v1461_v49, 0.0  ;;  %v1665_v29 = vpack.c.bf16 %v1619_v51, %v1618_v53  ;;  %v1482_v58 = vadd.f32 %v2455_v52, %v3281_v38 }
 0x211   : > { %v1473_v63 = vpop.f32.mrf.mxu1 }
 0x212   : > { %v1664_v7 = vpack.c.bf16 %v1617_v55, %v1616_v54  ;;  %v1474_v59 = vadd.f32 %v3281_v38, %v1473_v63  ;;  %v1622_v57 = vmax.f32 %v1482_v58, 0.0 }
 0x213   : > { %v2456_v56 = vpop.f32.mrf.mxu1 }
 0x214   : > { %v1485_v10 = vadd.f32 %v2456_v56, %v3281_v38  ;;  %2529 = vmatprep.mubr.bf16.mxu0 %v1664_v7  ;;  %v1620_v40 = vmax.f32 %v1474_v59, 0.0 }
 0x215   : > { %v1476_v61 = vpop.f32.mrf.mxu1  ;;  %2530 = vmatmul.mubr.bf16.gmra.mxu0 %v1665_v29 }
 0x216   : > { %v1477_v21 = vadd.f32 %v3281_v38, %v1476_v61  ;;  %v1623_v62 = vmax.f32 %v1485_v10, 0.0 }
 0x217   : > { %v2459_v0 = vpop.f32.mrf.mxu1 }
 0x218   : > { %v1621_v48 = vmax.f32 %v1477_v21, 0.0  ;;  %v1667_v3 = vpack.c.bf16 %v1623_v62, %v1622_v57  ;;  %v1498_v12 = vadd.f32 %v2459_v0, %v3281_v38 }
 0x219   : > { %v1489_v1 = vpop.f32.mrf.mxu1 }
 0x21a   : > { %v1666_v2 = vpack.c.bf16 %v1621_v48, %v1620_v40  ;;  %v1490_v6 = vadd.f32 %v3281_v38, %v1489_v1  ;;  %v1626_v9 = vmax.f32 %v1498_v12, 0.0 }
 0x21b   : > { %v2460_v5 = vpop.f32.mrf.mxu1 }
 0x21c   : > { %v1501_v11 = vadd.f32 %v2460_v5, %v3281_v38  ;;  %2533 = vmatprep.mubr.bf16.mxu0 %v1666_v2  ;;  %v1624_v18 = vmax.f32 %v1490_v6, 0.0 }
 0x21d   : > { %v1492_v15 = vpop.f32.mrf.mxu1  ;;  %2534 = vmatmul.mubr.bf16.gmra.mxu0 %v1667_v3 }
 0x21e   : > { %v1493_v16 = vadd.f32 %v3281_v38, %v1492_v15  ;;  %v1627_v17 = vmax.f32 %v1501_v11, 0.0 }
 0x21f   : > { %v2463_v60 = vpop.f32.mrf.mxu1 }
 0x220   : > { %v1625_v14 = vmax.f32 %v1493_v16, 0.0  ;;  %v1669_v22 = vpack.c.bf16 %v1627_v17, %v1626_v9  ;;  %v1514_v26 = vadd.f32 %v2463_v60, %v3281_v38 }
 0x221   : > { %v1505_v31 = vpop.f32.mrf.mxu1 }
 0x222   : > { %v1668_v20 = vpack.c.bf16 %v1625_v14, %v1624_v18  ;;  %v1506_v23 = vadd.f32 %v3281_v38, %v1505_v31  ;;  %v1630_v8 = vmax.f32 %v1514_v26, 0.0 }
 0x223   : > { %v2464_v24 = vpop.f32.mrf.mxu1 }
 0x224   : > { %v1517_v25 = vadd.f32 %v2464_v24, %v3281_v38  ;;  %2537 = vmatprep.mubr.bf16.mxu0 %v1668_v20  ;;  %v1628_v50 = vmax.f32 %v1506_v23, 0.0 }
 0x225   : > { %v1508_v27 = vpop.f32.mrf.mxu1  ;;  %2538 = vmatmul.mubr.bf16.gmra.mxu0 %v1669_v22 }
 0x226   : > { %v1509_v28 = vadd.f32 %v3281_v38, %v1508_v27  ;;  %v1631_v30 = vmax.f32 %v1517_v25, 0.0 }
 0x227   : > { %v2467_v13 = vpop.f32.mrf.mxu1 }
 0x228   : > { %v1629_v32 = vmax.f32 %v1509_v28, 0.0  ;;  %v1671_v37 = vpack.c.bf16 %v1631_v30, %v1630_v8  ;;  %v1530_v42 = vadd.f32 %v2467_v13, %v3281_v38  ;;  %v3350_v28 = vld [vmem:[%s3562_s8] ss:$0 sm:$0xff] }
 0x229   : > { %v1521_v34 = vpop.f32.mrf.mxu1 }
 0x22a   : > { %v1670_v36 = vpack.c.bf16 %v1629_v32, %v1628_v50  ;;  %v1522_v41 = vadd.f32 %v3281_v38, %v1521_v34  ;;  %v1634_v46 = vmax.f32 %v1530_v42, 0.0 }
 0x22b   : > { %v2468_v39 = vpop.f32.mrf.mxu1 }
 0x22c   : > { %v1533_v33 = vadd.f32 %v2468_v39, %v3281_v38  ;;  %2541 = vmatprep.mubr.bf16.mxu0 %v1670_v36  ;;  %v1632_v19 = vmax.f32 %v1522_v41, 0.0 }
 0x22d   : > { %v1524_v43 = vpop.f32.mrf.mxu1  ;;  %2542 = vmatmul.mubr.bf16.gmra.mxu0 %v1671_v37 }
 0x22e   : > { %v1525_v4 = vadd.f32 %v3281_v38, %v1524_v43  ;;  %v1635_v44 = vmax.f32 %v1533_v33, 0.0 }
 0x22f   : > { %v2471_v35 = vpop.f32.mrf.mxu1 }
 0x230   : > { %v1633_v45 = vmax.f32 %v1525_v4, 0.0  ;;  %v1673_v51 = vpack.c.bf16 %v1635_v44, %v1634_v46  ;;  %v1546_v53 = vadd.f32 %v2471_v35, %v3281_v38 }
 0x231   : > { %v1537_v47 = vpop.f32.mrf.mxu1 }
 0x232   : > { %v1672_v49 = vpack.c.bf16 %v1633_v45, %v1632_v19  ;;  %v1538_v54 = vadd.f32 %v3281_v38, %v1537_v47  ;;  %v1638_v58 = vmax.f32 %v1546_v53, 0.0 }
 0x233   : > { %v2472_v52 = vpop.f32.mrf.mxu1 }
 0x234   : > { %v1549_v55 = vadd.f32 %v2472_v52, %v3281_v38  ;;  %2545 = vmatprep.mubr.bf16.mxu0 %v1672_v49  ;;  %v1636_v59 = vmax.f32 %v1538_v54, 0.0 }
 0x235   : > { %v1540_v63 = vpop.f32.mrf.mxu1  ;;  %2546 = vmatmul.mubr.bf16.gmra.mxu0 %v1673_v51 }
 0x236   : > { %v1541_v7 = vadd.f32 %v3281_v38, %v1540_v63  ;;  %v1639_v29 = vmax.f32 %v1549_v55, 0.0 }
 0x237   : > { %v2475_v56 = vpop.f32.mrf.mxu1 }
 0x238   : > { %v1637_v10 = vmax.f32 %v1541_v7, 0.0  ;;  %v1675_v62 = vpack.c.bf16 %v1639_v29, %v1638_v58  ;;  %v1562_v57 = vadd.f32 %v2475_v56, %v3281_v38 }
 0x239   : > { %v1553_v61 = vpop.f32.mrf.mxu1 }
 0x23a   : > { %v1674_v21 = vpack.c.bf16 %v1637_v10, %v1636_v59  ;;  %v1554_v40 = vadd.f32 %v3281_v38, %v1553_v61  ;;  %v1642_v12 = vmax.f32 %v1562_v57, 0.0 }
 0x23b   : > { %v2476_v0 = vpop.f32.mrf.mxu1 }
 0x23c   : > { %v1565_v48 = vadd.f32 %v2476_v0, %v3281_v38  ;;  %2549 = vmatprep.mubr.bf16.mxu0 %v1674_v21  ;;  %v1640_v6 = vmax.f32 %v1554_v40, 0.0 }
 0x23d   : > { %v1556_v1 = vpop.f32.mrf.mxu1  ;;  %2550 = vmatmul.mubr.bf16.gmra.mxu0 %v1675_v62 }
 0x23e   : > { %v1557_v2 = vadd.f32 %v3281_v38, %v1556_v1  ;;  %v1643_v3 = vmax.f32 %v1565_v48, 0.0 }
 0x23f   : > { %v2479_v5 = vpop.f32.mrf.mxu1 }
 0x240   : > { %v1641_v11 = vmax.f32 %v1557_v2, 0.0  ;;  %v1677_v17 = vpack.c.bf16 %v1643_v3, %v1642_v12  ;;  %v1578_v9 = vadd.f32 %v2479_v5, %v3281_v38 }
 0x241   : > { %v1569_v15 = vpop.f32.mrf.mxu1 }
 0x242   : > { %v1676_v16 = vpack.c.bf16 %v1641_v11, %v1640_v6  ;;  %v1570_v18 = vadd.f32 %v3281_v38, %v1569_v15  ;;  %v1646_v25 = vmax.f32 %v1578_v9, 0.0 }
 0x243   : > { %v2480_v60 = vpop.f32.mrf.mxu1 }
 0x244   : > { %v1581_v14 = vadd.f32 %v2480_v60, %v3281_v38  ;;  %2553 = vmatprep.mubr.bf16.mxu0 %v1676_v16  ;;  %v1644_v24 = vmax.f32 %v1570_v18, 0.0 }
 0x245   : > { %v1572_v31 = vpop.f32.mrf.mxu1  ;;  %2554 = vmatmul.mubr.bf16.gmra.mxu0 %v1677_v17 }
 0x246   : > { %v1573_v20 = vadd.f32 %v3281_v38, %v1572_v31  ;;  %v1647_v22 = vmax.f32 %v1581_v14, 0.0 }
 0x248   : > { %v1645_v23 = vmax.f32 %v1573_v20, 0.0  ;;  %v1679_v27 = vpack.c.bf16 %v1647_v22, %v1646_v25 }
 0x24a   : > { %v1678_v26 = vpack.c.bf16 %v1645_v23, %v1644_v24 }
 0x24c   : > { %2557 = vmatprep.mubr.bf16.mxu0 %v1678_v26 }
 0x24d   : > { %2558 = vmatmul.mubr.bf16.gmra.mxu0 %v1679_v27 }
 0x293   : > { %v2499_v38 = vpop.f32.mrf.mxu0 }
 0x294   : > { %v1794_v30 = vadd.f32 %v2499_v38, %v3350_v28 }
 0x295   : > { %v1785_v13 = vpop.f32.mrf.mxu0 }
 0x296   : > { %2043 = vst.msk [vmem:[%s3357_s22 + $0x10] sm:$0xff] %vm2040_vm1, %v1794_v30  ;;  %v1786_v50 = vadd.f32 %v3350_v28, %v1785_v13 }
 0x297   : > { %v2500_v32 = vpop.f32.mrf.mxu0 }
 0x298   : > { %2041 = vst.msk [vmem:[%s3357_s22] sm:$0xff] %vm2040_vm1, %v1786_v50  ;;  %v1797_v8 = vadd.f32 %v2500_v32, %v3350_v28 }
 0x299   : > { %v1788_v34 = vpop.f32.mrf.mxu0 }
 0x29a   : > { %2044 = vst.msk [vmem:[%s3357_s22 + $0x18] sm:$0xff] %vm2040_vm1, %v1797_v8  ;;  %v1789_v36 = vadd.f32 %v3350_v28, %v1788_v34 }
 0x29b   : > { %v2503_v37 = vpop.f32.mrf.mxu0 }
 0x29c   : > { %2042 = vst.msk [vmem:[%s3357_s22 + $0x8] sm:$0xff] %vm2040_vm1, %v1789_v36  ;;  %v1810_v39 = vadd.f32 %v2503_v37, %v3350_v28 }
 0x29d   : > { %v1801_v41 = vpop.f32.mrf.mxu0 }
 0x29e   : > { %2047 = vst.msk [vmem:[%s3357_s22 + $0x30] sm:$0xff] %vm2040_vm1, %v1810_v39  ;;  %v1802_v33 = vadd.f32 %v3350_v28, %v1801_v41 }
 0x29f   : > { %v2504_v42 = vpop.f32.mrf.mxu0 }
 0x2a0   : > { %2045 = vst.msk [vmem:[%s3357_s22 + $0x20] sm:$0xff] %vm2040_vm1, %v1802_v33  ;;  %v1813_v43 = vadd.f32 %v2504_v42, %v3350_v28 }
 0x2a1   : > { %v1804_v4 = vpop.f32.mrf.mxu0 }
 0x2a2   : > { %2048 = vst.msk [vmem:[%s3357_s22 + $0x38] sm:$0xff] %vm2040_vm1, %v1813_v43  ;;  %v1805_v44 = vadd.f32 %v3350_v28, %v1804_v4 }
 0x2a4   : > { %2046 = vst.msk [vmem:[%s3357_s22 + $0x28] sm:$0xff] %vm2040_vm1, %v1805_v44 }
 0x2a5   : > { %v2507_v35 = vpop.f32.mrf.mxu0 }
 0x2a6   : > { %v1826_v19 = vadd.f32 %v2507_v35, %v3350_v28 }
 0x2a7   : > { %v1817_v45 = vpop.f32.mrf.mxu0 }
 0x2a8   : > { %2051 = vst.msk [vmem:[%s3357_s22 + $0x50] sm:$0xff] %vm2040_vm1, %v1826_v19  ;;  %v1818_v46 = vadd.f32 %v3350_v28, %v1817_v45 }
 0x2a9   : > { %v2508_v47 = vpop.f32.mrf.mxu0 }
 0x2aa   : > { %2049 = vst.msk [vmem:[%s3357_s22 + $0x40] sm:$0xff] %vm2040_vm1, %v1818_v46  ;;  %v1829_v49 = vadd.f32 %v2508_v47, %v3350_v28 }
 0x2ab   : > { %v1820_v51 = vpop.f32.mrf.mxu0 }
 0x2ac   : > { %2052 = vst.msk [vmem:[%s3357_s22 + $0x58] sm:$0xff] %vm2040_vm1, %v1829_v49  ;;  %v1821_v52 = vadd.f32 %v3350_v28, %v1820_v51 }
 0x2ad   : > { %v2511_v54 = vpop.f32.mrf.mxu0 }
 0x2ae   : > { %2050 = vst.msk [vmem:[%s3357_s22 + $0x48] sm:$0xff] %vm2040_vm1, %v1821_v52  ;;  %v1842_v55 = vadd.f32 %v2511_v54, %v3350_v28 }
 0x2af   : > { %v1833_v53 = vpop.f32.mrf.mxu0 }
 0x2b0   : > { %2055 = vst.msk [vmem:[%s3357_s22 + $0x70] sm:$0xff] %vm2040_vm1, %v1842_v55  ;;  %v1834_v63 = vadd.f32 %v3350_v28, %v1833_v53 }
 0x2b1   : > { %v2512_v7 = vpop.f32.mrf.mxu0 }
 0x2b2   : > { %2053 = vst.msk [vmem:[%s3357_s22 + $0x60] sm:$0xff] %vm2040_vm1, %v1834_v63  ;;  %v1845_v29 = vadd.f32 %v2512_v7, %v3350_v28 }
 0x2b3   : > { %v1836_v56 = vpop.f32.mrf.mxu0 }
 0x2b4   : > { %2056 = vst.msk [vmem:[%s3357_s22 + $0x78] sm:$0xff] %vm2040_vm1, %v1845_v29  ;;  %v1837_v59 = vadd.f32 %v3350_v28, %v1836_v56 }
 0x2b5   : > { %v2515_v10 = vpop.f32.mrf.mxu0 }
 0x2b6   : > { %2054 = vst.msk [vmem:[%s3357_s22 + $0x68] sm:$0xff] %vm2040_vm1, %v1837_v59  ;;  %v1858_v58 = vadd.f32 %v2515_v10, %v3350_v28 }
 0x2b7   : > { %v1849_v61 = vpop.f32.mrf.mxu0 }
 0x2b8   : > { %2059 = vst.msk [vmem:[%s3357_s22 + $0x90] sm:$0xff] %vm2040_vm1, %v1858_v58  ;;  %v1850_v21 = vadd.f32 %v3350_v28, %v1849_v61 }
 0x2b9   : > { %v2516_v62 = vpop.f32.mrf.mxu0 }
 0x2ba   : > { %2057 = vst.msk [vmem:[%s3357_s22 + $0x80] sm:$0xff] %vm2040_vm1, %v1850_v21  ;;  %v1861_v0 = vadd.f32 %v2516_v62, %v3350_v28 }
 0x2bb   : > { %v1852_v40 = vpop.f32.mrf.mxu0 }
 0x2bc   : > { %2060 = vst.msk [vmem:[%s3357_s22 + $0x98] sm:$0xff] %vm2040_vm1, %v1861_v0  ;;  %v1853_v48 = vadd.f32 %v3350_v28, %v1852_v40 }
 0x2bd   : > { %v2519_v57 = vpop.f32.mrf.mxu0 }
 0x2be   : > { %2058 = vst.msk [vmem:[%s3357_s22 + $0x88] sm:$0xff] %vm2040_vm1, %v1853_v48  ;;  %v1874_v1 = vadd.f32 %v2519_v57, %v3350_v28 }
 0x2bf   : > { %v1865_v2 = vpop.f32.mrf.mxu0 }
 0x2c0   : > { %2063 = vst.msk [vmem:[%s3357_s22 + $0xb0] sm:$0xff] %vm2040_vm1, %v1874_v1  ;;  %v1866_v3 = vadd.f32 %v3350_v28, %v1865_v2 }
 0x2c1   : > { %v2520_v5 = vpop.f32.mrf.mxu0 }
 0x2c2   : > { %2061 = vst.msk [vmem:[%s3357_s22 + $0xa0] sm:$0xff] %vm2040_vm1, %v1866_v3  ;;  %v1877_v6 = vadd.f32 %v2520_v5, %v3350_v28 }
 0x2c3   : > { %v1868_v11 = vpop.f32.mrf.mxu0 }
 0x2c4   : > { %2064 = vst.msk [vmem:[%s3357_s22 + $0xb8] sm:$0xff] %vm2040_vm1, %v1877_v6  ;;  %v1869_v12 = vadd.f32 %v3350_v28, %v1868_v11 }
 0x2c5   : > { %v2523_v15 = vpop.f32.mrf.mxu0 }
 0x2c6   : > { %2062 = vst.msk [vmem:[%s3357_s22 + $0xa8] sm:$0xff] %vm2040_vm1, %v1869_v12  ;;  %v1890_v16 = vadd.f32 %v2523_v15, %v3350_v28 }
 0x2c7   : > { %v1881_v17 = vpop.f32.mrf.mxu0 }
 0x2c8   : > { %2067 = vst.msk [vmem:[%s3357_s22 + $0xd0] sm:$0xff] %vm2040_vm1, %v1890_v16  ;;  %v1882_v60 = vadd.f32 %v3350_v28, %v1881_v17 }
 0x2c9   : > { %v2524_v18 = vpop.f32.mrf.mxu0 }
 0x2ca   : > { %2065 = vst.msk [vmem:[%s3357_s22 + $0xc0] sm:$0xff] %vm2040_vm1, %v1882_v60  ;;  %v1893_v14 = vadd.f32 %v2524_v18, %v3350_v28 }
 0x2cb   : > { %v1884_v9 = vpop.f32.mrf.mxu0 }
 0x2cc   : > { %2068 = vst.msk [vmem:[%s3357_s22 + $0xd8] sm:$0xff] %vm2040_vm1, %v1893_v14  ;;  %v1885_v31 = vadd.f32 %v3350_v28, %v1884_v9 }
 0x2cd   : > { %v2527_v20 = vpop.f32.mrf.mxu0 }
 0x2ce   : > { %2066 = vst.msk [vmem:[%s3357_s22 + $0xc8] sm:$0xff] %vm2040_vm1, %v1885_v31  ;;  %v1906_v22 = vadd.f32 %v2527_v20, %v3350_v28 }
 0x2cf   : > { %v1897_v24 = vpop.f32.mrf.mxu0 }
 0x2d0   : > { %2071 = vst.msk [vmem:[%s3357_s22 + $0xf0] sm:$0xff] %vm2040_vm1, %v1906_v22  ;;  %v1898_v23 = vadd.f32 %v3350_v28, %v1897_v24 }
 0x2d1   : > { %v2528_v25 = vpop.f32.mrf.mxu0 }
 0x2d2   : > { %2069 = vst.msk [vmem:[%s3357_s22 + $0xe0] sm:$0xff] %vm2040_vm1, %v1898_v23  ;;  %v1909_v26 = vadd.f32 %v2528_v25, %v3350_v28 }
 0x2d3   : > { %v1900_v27 = vpop.f32.mrf.mxu0 }
 0x2d4   : > { %2072 = vst.msk [vmem:[%s3357_s22 + $0xf8] sm:$0xff] %vm2040_vm1, %v1909_v26  ;;  %v1901_v38 = vadd.f32 %v3350_v28, %v1900_v27 }
 0x2d5   : > { %v2531_v30 = vpop.f32.mrf.mxu0 }
 0x2d6   : > { %2070 = vst.msk [vmem:[%s3357_s22 + $0xe8] sm:$0xff] %vm2040_vm1, %v1901_v38  ;;  %v1922_v13 = vadd.f32 %v2531_v30, %v3350_v28 }
 0x2d7   : > { %v1913_v50 = vpop.f32.mrf.mxu0 }
 0x2d8   : > { %2075 = vst.msk [vmem:[%s3357_s22 + $0x110] sm:$0xff] %vm2040_vm1, %v1922_v13  ;;  %v1914_v32 = vadd.f32 %v3350_v28, %v1913_v50 }
 0x2d9   : > { %v2532_v8 = vpop.f32.mrf.mxu0 }
 0x2da   : > { %2073 = vst.msk [vmem:[%s3357_s22 + $0x100] sm:$0xff] %vm2040_vm1, %v1914_v32  ;;  %v1925_v34 = vadd.f32 %v2532_v8, %v3350_v28 }
 0x2db   : > { %v1916_v36 = vpop.f32.mrf.mxu0 }
 0x2dc   : > { %2076 = vst.msk [vmem:[%s3357_s22 + $0x118] sm:$0xff] %vm2040_vm1, %v1925_v34  ;;  %v1917_v37 = vadd.f32 %v3350_v28, %v1916_v36 }
 0x2dd   : > { %v2535_v39 = vpop.f32.mrf.mxu0 }
 0x2de   : > { %2074 = vst.msk [vmem:[%s3357_s22 + $0x108] sm:$0xff] %vm2040_vm1, %v1917_v37  ;;  %v1938_v41 = vadd.f32 %v2535_v39, %v3350_v28 }
 0x2df   : > { %v1929_v33 = vpop.f32.mrf.mxu0 }
 0x2e0   : > { %2079 = vst.msk [vmem:[%s3357_s22 + $0x130] sm:$0xff] %vm2040_vm1, %v1938_v41  ;;  %v1930_v42 = vadd.f32 %v3350_v28, %v1929_v33 }
 0x2e1   : > { %v2536_v43 = vpop.f32.mrf.mxu0 }
 0x2e2   : > { %2077 = vst.msk [vmem:[%s3357_s22 + $0x120] sm:$0xff] %vm2040_vm1, %v1930_v42  ;;  %v1941_v4 = vadd.f32 %v2536_v43, %v3350_v28 }
 0x2e3   : > { %v1932_v44 = vpop.f32.mrf.mxu0 }
 0x2e4   : > { %2080 = vst.msk [vmem:[%s3357_s22 + $0x138] sm:$0xff] %vm2040_vm1, %v1941_v4  ;;  %v1933_v35 = vadd.f32 %v3350_v28, %v1932_v44 }
 0x2e5   : > { %v2539_v19 = vpop.f32.mrf.mxu0 }
 0x2e6   : > { %2078 = vst.msk [vmem:[%s3357_s22 + $0x128] sm:$0xff] %vm2040_vm1, %v1933_v35  ;;  %v1954_v45 = vadd.f32 %v2539_v19, %v3350_v28 }
 0x2e7   : > { %v1945_v46 = vpop.f32.mrf.mxu0 }
 0x2e8   : > { %2083 = vst.msk [vmem:[%s3357_s22 + $0x150] sm:$0xff] %vm2040_vm1, %v1954_v45  ;;  %v1946_v47 = vadd.f32 %v3350_v28, %v1945_v46 }
 0x2e9   : > { %v2540_v49 = vpop.f32.mrf.mxu0 }
 0x2ea   : > { %2081 = vst.msk [vmem:[%s3357_s22 + $0x140] sm:$0xff] %vm2040_vm1, %v1946_v47  ;;  %v1957_v51 = vadd.f32 %v2540_v49, %v3350_v28 }
 0x2eb   : > { %v1948_v52 = vpop.f32.mrf.mxu0 }
 0x2ec   : > { %2084 = vst.msk [vmem:[%s3357_s22 + $0x158] sm:$0xff] %vm2040_vm1, %v1957_v51  ;;  %v1949_v54 = vadd.f32 %v3350_v28, %v1948_v52 }
 0x2ed   : > { %v2543_v55 = vpop.f32.mrf.mxu0 }
 0x2ee   : > { %2082 = vst.msk [vmem:[%s3357_s22 + $0x148] sm:$0xff] %vm2040_vm1, %v1949_v54  ;;  %v1970_v53 = vadd.f32 %v2543_v55, %v3350_v28 }
 0x2ef   : > { %v1961_v63 = vpop.f32.mrf.mxu0 }
 0x2f0   : > { %2087 = vst.msk [vmem:[%s3357_s22 + $0x170] sm:$0xff] %vm2040_vm1, %v1970_v53  ;;  %v1962_v7 = vadd.f32 %v3350_v28, %v1961_v63 }
 0x2f1   : > { %v2544_v29 = vpop.f32.mrf.mxu0 }
 0x2f2   : > { %2085 = vst.msk [vmem:[%s3357_s22 + $0x160] sm:$0xff] %vm2040_vm1, %v1962_v7  ;;  %v1973_v56 = vadd.f32 %v2544_v29, %v3350_v28 }
 0x2f3   : > { %v1964_v59 = vpop.f32.mrf.mxu0 }
 0x2f4   : > { %2088 = vst.msk [vmem:[%s3357_s22 + $0x178] sm:$0xff] %vm2040_vm1, %v1973_v56  ;;  %v1965_v10 = vadd.f32 %v3350_v28, %v1964_v59 }
 0x2f5   : > { %v2547_v58 = vpop.f32.mrf.mxu0 }
 0x2f6   : > { %2086 = vst.msk [vmem:[%s3357_s22 + $0x168] sm:$0xff] %vm2040_vm1, %v1965_v10  ;;  %v1986_v61 = vadd.f32 %v2547_v58, %v3350_v28 }
 0x2f7   : > { %v1977_v21 = vpop.f32.mrf.mxu0 }
 0x2f8   : > { %2091 = vst.msk [vmem:[%s3357_s22 + $0x190] sm:$0xff] %vm2040_vm1, %v1986_v61  ;;  %v1978_v62 = vadd.f32 %v3350_v28, %v1977_v21 }
 0x2f9   : > { %v2548_v0 = vpop.f32.mrf.mxu0 }
 0x2fa   : > { %2089 = vst.msk [vmem:[%s3357_s22 + $0x180] sm:$0xff] %vm2040_vm1, %v1978_v62  ;;  %v1989_v40 = vadd.f32 %v2548_v0, %v3350_v28 }
 0x2fb   : > { %v1980_v48 = vpop.f32.mrf.mxu0 }
 0x2fc   : > { %2092 = vst.msk [vmem:[%s3357_s22 + $0x198] sm:$0xff] %vm2040_vm1, %v1989_v40  ;;  %v1981_v57 = vadd.f32 %v3350_v28, %v1980_v48 }
 0x2fd   : > { %v2551_v1 = vpop.f32.mrf.mxu0 }
 0x2fe   : > { %2090 = vst.msk [vmem:[%s3357_s22 + $0x188] sm:$0xff] %vm2040_vm1, %v1981_v57  ;;  %v2002_v2 = vadd.f32 %v2551_v1, %v3350_v28 }
 0x2ff   : > { %v1993_v3 = vpop.f32.mrf.mxu0 }
 0x300   : > { %2095 = vst.msk [vmem:[%s3357_s22 + $0x1b0] sm:$0xff] %vm2040_vm1, %v2002_v2  ;;  %v1994_v5 = vadd.f32 %v3350_v28, %v1993_v3 }
 0x301   : > { %v2552_v6 = vpop.f32.mrf.mxu0 }
 0x302   : > { %2093 = vst.msk [vmem:[%s3357_s22 + $0x1a0] sm:$0xff] %vm2040_vm1, %v1994_v5  ;;  %v2005_v11 = vadd.f32 %v2552_v6, %v3350_v28 }
 0x303   : > { %v1996_v12 = vpop.f32.mrf.mxu0 }
 0x304   : > { %2096 = vst.msk [vmem:[%s3357_s22 + $0x1b8] sm:$0xff] %vm2040_vm1, %v2005_v11  ;;  %v1997_v15 = vadd.f32 %v3350_v28, %v1996_v12 }
 0x305   : > { %v2555_v16 = vpop.f32.mrf.mxu0 }
 0x306   : > { %2094 = vst.msk [vmem:[%s3357_s22 + $0x1a8] sm:$0xff] %vm2040_vm1, %v1997_v15  ;;  %v2018_v17 = vadd.f32 %v2555_v16, %v3350_v28 }
 0x307   : > { %v2009_v60 = vpop.f32.mrf.mxu0 }
 0x308   : > { %2099 = vst.msk [vmem:[%s3357_s22 + $0x1d0] sm:$0xff] %vm2040_vm1, %v2018_v17  ;;  %v2010_v18 = vadd.f32 %v3350_v28, %v2009_v60 }
 0x309   : > { %v2556_v14 = vpop.f32.mrf.mxu0 }
 0x30a   : > { %2097 = vst.msk [vmem:[%s3357_s22 + $0x1c0] sm:$0xff] %vm2040_vm1, %v2010_v18  ;;  %v2021_v9 = vadd.f32 %v2556_v14, %v3350_v28 }
 0x30b   : > { %v2012_v31 = vpop.f32.mrf.mxu0 }
 0x30c   : > { %2100 = vst.msk [vmem:[%s3357_s22 + $0x1d8] sm:$0xff] %vm2040_vm1, %v2021_v9  ;;  %v2013_v20 = vadd.f32 %v3350_v28, %v2012_v31 }
 0x30d   : > { %v2559_v22 = vpop.f32.mrf.mxu0 }
 0x30e   : > { %2098 = vst.msk [vmem:[%s3357_s22 + $0x1c8] sm:$0xff] %vm2040_vm1, %v2013_v20  ;;  %v2034_v24 = vadd.f32 %v2559_v22, %v3350_v28 }
 0x30f   : > { %v2025_v23 = vpop.f32.mrf.mxu0 }
 0x310   : > { %2103 = vst.msk [vmem:[%s3357_s22 + $0x1f0] sm:$0xff] %vm2040_vm1, %v2034_v24  ;;  %v2026_v25 = vadd.f32 %v3350_v28, %v2025_v23 }
 0x311   : > { %v2560_v26 = vpop.f32.mrf.mxu0 }
 0x312   : > { %2101 = vst.msk [vmem:[%s3357_s22 + $0x1e0] sm:$0xff] %vm2040_vm1, %v2026_v25  ;;  %v2037_v27 = vadd.f32 %v2560_v26, %v3350_v28 }
 0x313   : > { %v2028_v38 = vpop.f32.mrf.mxu0 }
 0x314   : > { %2104 = vst.msk [vmem:[%s3357_s22 + $0x1f8] sm:$0xff] %vm2040_vm1, %v2037_v27  ;;  %v2029_v30 = vadd.f32 %v3350_v28, %v2028_v38 }
 0x316   : > { %2102 = vst.msk [vmem:[%s3357_s22 + $0x1e8] sm:$0xff] %vm2040_vm1, %v2029_v30 }
 0x317 PF: > { %s19_s30 = sadd.s32 1, %s2616_s30  }
 0x318   : > { %p16_p4 = scmp.ge.s32.totalorder %s19_s30, 4  }
 0x31a   :  { %18 = sbr.rel (!%p16_p4) target bundleno = 1 (0x1), region = 86 }

// kernel: tpu_custom_call.1
= control target key start
LH: loop header
LB: loop body
LE: loop exit
PB: predicated region body
PF: predicated region fallthrough
CT: control target
= control target key end

     0   :  { %s2669_s30 = smov 0   ;;  %s3554_s0 = inlined_call_operand.vmem [shape: f32[1024,4], index: 0, kind: input, shape index: {}]   ;;  %s3555_s1 = inlined_call_operand.vmem [shape: f32[1,4], index: 1, kind: input, shape index: {}]   ;;  %s3556_s2 = inlined_call_operand.vmem [shape: f32[1,4], index: 2, kind: input, shape index: {}]   ;;  %s3557_s3 = inlined_call_operand.vmem [shape: bf16[128,128], index: 3, kind: input, shape index: {}]   ;;  %s3558_s4 = inlined_call_operand.vmem [shape: f32[1,128], index: 4, kind: input, shape index: {}]   ;;  %s3559_s5 = inlined_call_operand.vmem [shape: bf16[128,128], index: 5, kind: input, shape index: {}]   ;;  %s3560_s6 = inlined_call_operand.vmem [shape: f32[1,128], index: 6, kind: input, shape index: {}]   ;;  %s3561_s7 = inlined_call_operand.vmem [shape: bf16[128,128], index: 7, kind: input, shape index: {}]   ;;  %s3562_s8 = inlined_call_operand.vmem [shape: f32[1,128], index: 8, kind: input, shape index: {}]   ;;  %s3563_s9 = inlined_call_operand.vmem [shape: f32[1024,2], index: 9, kind: output, shape index: {}]  }
   0x1 LB: > { %s2161_s10 = sadd.s32 4294967295, %s2616_s30   ;;  %p2165_p0 = scmp.ge.s32.totalorder %s2616_s30, 1  ;;  %s2616_s30 = sphi %s2669_s30, %s19_s30  }
   0x2   : > { %p288_p1 = scmp.lt.s32.totalorder %s2616_s30, 3 }
   0x4   : > { %p289_p2 = pnand %p2165_p0, %p288_p1 }
   0x5   : > { %s2166_s13 = sshll.u32 (!%p289_p2), %s2161_s10, 6 }
   0x6   : > { %292 = sbr.rel (%p289_p2) target bundleno = 791 (0x317), region = 56  ;;  %p325_p3 = scmp.lt.s32.totalorder (!%p289_p2), %s2166_s13, 127 }
   0xb   : > { %v2680_v0 = vld [vmem:[%s3557_s3 + $0x38] sm:$0xff]   ;;  %v2685_v1 = vld [vmem:[%s3557_s3 + $0x30] sm:$0xff]   ;;  %s3565_s13 = smov (!%p325_p3, %s2166_s13), 127  ;;  %v2618_v2 = vmov 0.0   ;;  %v2588_v3 = vld [vmem:[%s3557_s3 + $0x28] sm:$0xff]   ;;  %vm607_vm0 = vcmask 31744  }
   0xc   : > { %2321 = vmatprep.subr.bf16.mxu0 %v2680_v0  ;;  %2561 = vmatprep.subr.bf16.mxu1 %v2680_v0  ;;  %337 = vst [vmem:[#allocation2] sm:$0xff] %v2618_v2  ;;  %338 = vst [vmem:[#allocation2 + $0x8] sm:$0xff] %v2618_v2  ;;  %s2167_s18 = sshll.u32 %s3565_s13, 3  ;;  %v2774_v4 = vld [vmem:[%s3557_s3 + $0x20] sm:$0xff]   ;;  %v2796_v13 = vld [vmem:[%s3557_s3 + $0x18] sm:$0xff]   ;;  %vm2040_vm1 = vcmask 15360  }
   0xd   : > { %2322 = vmatpush3.bf16.msra.mxu0 %v2680_v0  ;;  %339 = vst [vmem:[#allocation2 + $0x10] sm:$0xff] %v2618_v2  ;;  %340 = vst [vmem:[#allocation2 + $0x18] sm:$0xff] %v2618_v2  ;;  %2569 = vmatpush3.bf16.msra.mxu1 %v2680_v0  ;;  %s2768_s21 = scalar_lea.vmem %s3554_s0, %s2167_s18  ;;  %v2782_v7 = vld [vmem:[%s3555_s1] ss:$0 sm:$0xff]  ;;  %v2849_v52 = vld [vmem:[%s3557_s3 + $0x10] sm:$0xff]   ;;  %s3357_s22 = scalar_lea.vmem %s3563_s9, %s2167_s18 }
   0xe   : > { %341 = vst [vmem:[#allocation2 + $0x20] sm:$0xff] %v2618_v2  ;;  %342 = vst [vmem:[#allocation2 + $0x28] sm:$0xff] %v2618_v2  ;;  %2323 = vmatprep.subr.bf16.mxu0 %v2685_v1  ;;  %2562 = vmatprep.subr.bf16.mxu1 %v2685_v1  ;;  %v401_v5 = vld [vmem:[%s2768_s21] sm:$0xff]  ;;  %v402_v6 = vld [vmem:[%s2768_s21 + $0x8] sm:$0xff] }
   0xf   : > { %343 = vst [vmem:[#allocation2 + $0x30] sm:$0xff] %v2618_v2  ;;  %344 = vst [vmem:[#allocation2 + $0x38] sm:$0xff] %v2618_v2  ;;  %v472_v8 = vsub.f32 %v401_v5, %v2782_v7  ;;  %v473_v9 = vsub.f32 %v402_v6, %v2782_v7  ;;  %v2789_v10 = vld [vmem:[%s3556_s2] ss:$0 sm:$0xff]  ;;  %v403_v11 = vld [vmem:[%s2768_s21 + $0x10] sm:$0xff] }
  0x10   : > { %345 = vst [vmem:[#allocation2 + $0x40] sm:$0xff] %v2618_v2  ;;  %346 = vst [vmem:[#allocation2 + $0x48] sm:$0xff] %v2618_v2  ;;  %v404_v12 = vld [vmem:[%s2768_s21 + $0x18] sm:$0xff]  ;;  %v474_v14 = vsub.f32 %v403_v11, %v2782_v7  ;;  %v405_v16 = vld [vmem:[%s2768_s21 + $0x20] sm:$0xff] }
  0x11   : > { %347 = vst [vmem:[#allocation2 + $0x50] sm:$0xff] %v2618_v2  ;;  %348 = vst [vmem:[#allocation2 + $0x58] sm:$0xff] %v2618_v2  ;;  %2324 = vmatpush3.bf16.msra.mxu0 %v2685_v1  ;;  %2570 = vmatpush3.bf16.msra.mxu1 %v2685_v1  ;;  %v475_v15 = vsub.f32 %v404_v12, %v2782_v7  ;;  %v406_v17 = vld [vmem:[%s2768_s21 + $0x28] sm:$0xff]  ;;  %v407_v18 = vld [vmem:[%s2768_s21 + $0x30] sm:$0xff]  ;;  %v543_v19 = vmul.f32 %v2789_v10, %v472_v8 }
  0x12   : > { %349 = vst [vmem:[#allocation2 + $0x60] sm:$0xff] %v2618_v2  ;;  %350 = vst [vmem:[#allocation2 + $0x68] sm:$0xff] %v2618_v2  ;;  %2325 = vmatprep.subr.bf16.mxu0 %v2588_v3  ;;  %2563 = vmatprep.subr.bf16.mxu1 %v2588_v3  ;;  %v544_v20 = vmul.f32 %v2789_v10, %v473_v9  ;;  %v476_v21 = vsub.f32 %v405_v16, %v2782_v7  ;;  %v408_v23 = vld [vmem:[%s2768_s21 + $0x38] sm:$0xff]  ;;  %v409_v24 = vld [vmem:[%s2768_s21 + $0x40] sm:$0xff] }
  0x13   : > { %351 = vst [vmem:[#allocation2 + $0x70] sm:$0xff] %v2618_v2  ;;  %352 = vst [vmem:[#allocation2 + $0x78] sm:$0xff] %v2618_v2  ;;  %v477_v22 = vsub.f32 %v406_v17, %v2782_v7  ;;  %v410_v25 = vld [vmem:[%s2768_s21 + $0x48] sm:$0xff]  ;;  %v545_v26 = vmul.f32 %v2789_v10, %v474_v14  ;;  %v546_v27 = vmul.f32 %v2789_v10, %v475_v15  ;;  %v411_v30 = vld [vmem:[%s2768_s21 + $0x50] sm:$0xff] }
  0x14   : > { %353 = vst [vmem:[#allocation2 + $0x80] sm:$0xff] %v2618_v2  ;;  %354 = vst [vmem:[#allocation2 + $0x88] sm:$0xff] %v2618_v2  ;;  %v478_v28 = vsub.f32 %v407_v18, %v2782_v7  ;;  %v479_v29 = vsub.f32 %v408_v23, %v2782_v7  ;;  %v412_v31 = vld [vmem:[%s2768_s21 + $0x58] sm:$0xff]  ;;  %v413_v32 = vld [vmem:[%s2768_s21 + $0x60] sm:$0xff]  ;;  %v547_v33 = vmul.f32 %v2789_v10, %v476_v21 }
  0x15   : > { %355 = vst [vmem:[#allocation2 + $0x90] sm:$0xff] %v2618_v2  ;;  %356 = vst [vmem:[#allocation2 + $0x98] sm:$0xff] %v2618_v2  ;;  %2326 = vmatpush3.bf16.msra.mxu0 %v2588_v3  ;;  %v548_v34 = vmul.f32 %v2789_v10, %v477_v22  ;;  %v480_v35 = vsub.f32 %v409_v24, %v2782_v7  ;;  %v481_v36 = vsub.f32 %v410_v25, %v2782_v7  ;;  %v414_v37 = vld [vmem:[%s2768_s21 + $0x68] sm:$0xff]  ;;  %v415_v38 = vld [vmem:[%s2768_s21 + $0x70] sm:$0xff] }
  0x16   : > { %357 = vst [vmem:[#allocation2 + $0xa0] sm:$0xff] %v2618_v2  ;;  %358 = vst [vmem:[#allocation2 + $0xa8] sm:$0xff] %v2618_v2  ;;  %2327 = vmatprep.subr.bf16.mxu0 %v2774_v4  ;;  %v416_v39 = vld [vmem:[%s2768_s21 + $0x78] sm:$0xff]  ;;  %2571 = vmatpush3.bf16.msra.mxu1 %v2588_v3  ;;  %v549_v40 = vmul.f32 %v2789_v10, %v478_v28  ;;  %v550_v41 = vmul.f32 %v2789_v10, %v479_v29  ;;  %v417_v44 = vld [vmem:[%s2768_s21 + $0x80] sm:$0xff] }
  0x17   : > { %359 = vst [vmem:[#allocation2 + $0xb0] sm:$0xff] %v2618_v2  ;;  %360 = vst [vmem:[#allocation2 + $0xb8] sm:$0xff] %v2618_v2  ;;  %v482_v42 = vsub.f32 %v411_v30, %v2782_v7  ;;  %v483_v43 = vsub.f32 %v412_v31, %v2782_v7  ;;  %v418_v45 = vld [vmem:[%s2768_s21 + $0x88] sm:$0xff]  ;;  %2564 = vmatprep.subr.bf16.mxu1 %v2774_v4  ;;  %v551_v46 = vmul.f32 %v2789_v10, %v480_v35  ;;  %v419_v50 = vld [vmem:[%s2768_s21 + $0x90] sm:$0xff] }
  0x18   : > { %361 = vst [vmem:[#allocation2 + $0xc0] sm:$0xff] %v2618_v2  ;;  %362 = vst [vmem:[#allocation2 + $0xc8] sm:$0xff] %v2618_v2  ;;  %v552_v47 = vmul.f32 %v2789_v10, %v481_v36  ;;  %v484_v48 = vsub.f32 %v413_v32, %v2782_v7  ;;  %v485_v49 = vsub.f32 %v414_v37, %v2782_v7  ;;  %v420_v51 = vld [vmem:[%s2768_s21 + $0x98] sm:$0xff]  ;;  %v421_v57 = vld [vmem:[%s2768_s21 + $0xa0] sm:$0xff] }
  0x19   : > { %363 = vst [vmem:[#allocation2 + $0xd0] sm:$0xff] %v2618_v2  ;;  %364 = vst [vmem:[#allocation2 + $0xd8] sm:$0xff] %v2618_v2  ;;  %2328 = vmatpush3.bf16.msra.mxu0 %v2774_v4  ;;  %v553_v53 = vmul.f32 %v2789_v10, %v482_v42  ;;  %v554_v54 = vmul.f32 %v2789_v10, %v483_v43  ;;  %v486_v55 = vsub.f32 %v415_v38, %v2782_v7  ;;  %v422_v58 = vld [vmem:[%s2768_s21 + $0xa8] sm:$0xff]  ;;  %v423_v63 = vld [vmem:[%s2768_s21 + $0xb0] sm:$0xff] }
  0x1a   : > { %365 = vst [vmem:[#allocation2 + $0xe0] sm:$0xff] %v2618_v2  ;;  %366 = vst [vmem:[#allocation2 + $0xe8] sm:$0xff] %v2618_v2  ;;  %2329 = vmatprep.subr.bf16.mxu0 %v2796_v13  ;;  %v487_v56 = vsub.f32 %v416_v39, %v2782_v7  ;;  %v555_v59 = vmul.f32 %v2789_v10, %v484_v48  ;;  %v556_v60 = vmul.f32 %v2789_v10, %v485_v49  ;;  %v424_v0 = vld [vmem:[%s2768_s21 + $0xb8] sm:$0xff]  ;;  %v425_v6 = vld [vmem:[%s2768_s21 + $0xc0] sm:$0xff] }
  0x1b   : > { %367 = vst [vmem:[#allocation2 + $0xf0] sm:$0xff] %v2618_v2  ;;  %368 = vst [vmem:[#allocation2 + $0xf8] sm:$0xff] %v2618_v2  ;;  %v488_v61 = vsub.f32 %v417_v44, %v2782_v7  ;;  %v489_v62 = vsub.f32 %v418_v45, %v2782_v7  ;;  %2572 = vmatpush3.bf16.msra.mxu1 %v2774_v4  ;;  %v557_v1 = vmul.f32 %v2789_v10, %v486_v55  ;;  %v2880_v4 = vld [vmem:[%s3557_s3 + $0x8] sm:$0xff]   ;;  %v427_v21 = vld [vmem:[%s2768_s21 + $0xd0] sm:$0xff] }
  0x1c   : > { %369 = vst [vmem:[#allocation2 + $0x100] sm:$0xff] %v2618_v2  ;;  %370 = vst [vmem:[#allocation2 + $0x108] sm:$0xff] %v2618_v2  ;;  %v490_v3 = vsub.f32 %v419_v50, %v2782_v7  ;;  %v491_v5 = vsub.f32 %v420_v51, %v2782_v7  ;;  %2565 = vmatprep.subr.bf16.mxu1 %v2796_v13  ;;  %v492_v11 = vsub.f32 %v421_v57, %v2782_v7  ;;  %v426_v14 = vld [vmem:[%s2768_s21 + $0xc8] sm:$0xff]  ;;  %v2923_v35 = vld [vmem:[%s3557_s3] sm:$0xff]  }
  0x1d   : > { %371 = vst [vmem:[#allocation2 + $0x110] sm:$0xff] %v2618_v2  ;;  %372 = vst [vmem:[#allocation2 + $0x118] sm:$0xff] %v2618_v2  ;;  %2330 = vmatpush3.bf16.msra.mxu0 %v2796_v13  ;;  %v559_v8 = vmul.f32 %v2789_v10, %v488_v61  ;;  %v560_v9 = vmul.f32 %v2789_v10, %v489_v62  ;;  %v493_v12 = vsub.f32 %v422_v58, %v2782_v7  ;;  %v430_v31 = vld [vmem:[%s2768_s21 + $0xe8] sm:$0xff]  ;;  %v433_v39 = vld [vmem:[%s2768_s21 + $0x100] sm:$0xff] }
  0x1e   : > { %373 = vst [vmem:[#allocation2 + $0x120] sm:$0xff] %v2618_v2  ;;  %374 = vst [vmem:[#allocation2 + $0x128] sm:$0xff] %v2618_v2  ;;  %2331 = vmatprep.subr.bf16.mxu0 %v2849_v52  ;;  %v561_v17 = vmul.f32 %v2789_v10, %v490_v3  ;;  %v562_v18 = vmul.f32 %v2789_v10, %v491_v5  ;;  %v563_v23 = vmul.f32 %v2789_v10, %v492_v11  ;;  %v434_v43 = vld [vmem:[%s2768_s21 + $0x108] sm:$0xff]  ;;  %v435_v44 = vld [vmem:[%s2768_s21 + $0x110] sm:$0xff] }
  0x1f   : > { %375 = vst [vmem:[#allocation2 + $0x130] sm:$0xff] %v2618_v2  ;;  %376 = vst [vmem:[#allocation2 + $0x138] sm:$0xff] %v2618_v2  ;;  %v564_v24 = vmul.f32 %v2789_v10, %v493_v12  ;;  %2573 = vmatpush3.bf16.msra.mxu1 %v2796_v13  ;;  %v496_v25 = vsub.f32 %v425_v6, %v2782_v7  ;;  %v497_v30 = vsub.f32 %v426_v14, %v2782_v7  ;;  %v431_v13 = vld [vmem:[%s2768_s21 + $0xf0] sm:$0xff]  ;;  %v436_v48 = vld [vmem:[%s2768_s21 + $0x118] sm:$0xff] }
  0x20   : > { %377 = vst [vmem:[#allocation2 + $0x140] sm:$0xff] %v2618_v2  ;;  %378 = vst [vmem:[#allocation2 + $0x148] sm:$0xff] %v2618_v2  ;;  %2566 = vmatprep.subr.bf16.mxu1 %v2849_v52  ;;  %v502_v42 = vsub.f32 %v431_v13, %v2782_v7  ;;  %v437_v49 = vld [vmem:[%s2768_s21 + $0x120] sm:$0xff]  ;;  %v438_v55 = vld [vmem:[%s2768_s21 + $0x128] sm:$0xff] }
  0x21   : > { %379 = vst [vmem:[#allocation2 + $0x150] sm:$0xff] %v2618_v2  ;;  %380 = vst [vmem:[#allocation2 + $0x158] sm:$0xff] %v2618_v2  ;;  %2332 = vmatpush3.bf16.msra.mxu0 %v2849_v52  ;;  %v567_v32 = vmul.f32 %v2789_v10, %v496_v25  ;;  %v568_v36 = vmul.f32 %v2789_v10, %v497_v30  ;;  %v439_v61 = vld [vmem:[%s2768_s21 + $0x130] sm:$0xff]  ;;  %v444_v11 = vld [vmem:[%s2768_s21 + $0x158] sm:$0xff] }
  0x22   : > { %381 = vst [vmem:[#allocation2 + $0x160] sm:$0xff] %v2618_v2  ;;  %382 = vst [vmem:[#allocation2 + $0x168] sm:$0xff] %v2618_v2  ;;  %2333 = vmatprep.subr.bf16.mxu0 %v2880_v4 }
  0x23   : > { %383 = vst [vmem:[#allocation2 + $0x170] sm:$0xff] %v2618_v2  ;;  %384 = vst [vmem:[#allocation2 + $0x178] sm:$0xff] %v2618_v2  ;;  %2574 = vmatpush3.bf16.msra.mxu1 %v2849_v52 }
  0x24   : > { %385 = vst [vmem:[#allocation2 + $0x180] sm:$0xff] %v2618_v2  ;;  %386 = vst [vmem:[#allocation2 + $0x188] sm:$0xff] %v2618_v2  ;;  %2567 = vmatprep.subr.bf16.mxu1 %v2880_v4 }
  0x25   : > { %387 = vst [vmem:[#allocation2 + $0x190] sm:$0xff] %v2618_v2  ;;  %388 = vst [vmem:[#allocation2 + $0x198] sm:$0xff] %v2618_v2  ;;  %2334 = vmatpush3.bf16.msra.mxu0 %v2880_v4 }
  0x26   : > { %389 = vst [vmem:[#allocation2 + $0x1a0] sm:$0xff] %v2618_v2  ;;  %390 = vst [vmem:[#allocation2 + $0x1a8] sm:$0xff] %v2618_v2  ;;  %2335 = vmatprep.subr.bf16.mxu0 %v2923_v35 }
  0x27   : > { %391 = vst [vmem:[#allocation2 + $0x1b0] sm:$0xff] %v2618_v2  ;;  %392 = vst [vmem:[#allocation2 + $0x1b8] sm:$0xff] %v2618_v2  ;;  %2575 = vmatpush3.bf16.msra.mxu1 %v2880_v4  ;;  %v509_v4 = vsub.f32 %v438_v55, %v2782_v7 }
  0x28   : > { %393 = vst [vmem:[#allocation2 + $0x1c0] sm:$0xff] %v2618_v2  ;;  %394 = vst [vmem:[#allocation2 + $0x1c8] sm:$0xff] %v2618_v2  ;;  %2568 = vmatprep.subr.bf16.mxu1 %v2923_v35 }
  0x29   : > { %395 = vst [vmem:[#allocation2 + $0x1d0] sm:$0xff] %v2618_v2  ;;  %396 = vst [vmem:[#allocation2 + $0x1d8] sm:$0xff] %v2618_v2  ;;  %2336 = vmatpush3.bf16.msra.mxu0 %v2923_v35 }
  0x2a   : > { %397 = vst [vmem:[#allocation2 + $0x1e0] sm:$0xff] %v2618_v2  ;;  %398 = vst [vmem:[#allocation2 + $0x1e8] sm:$0xff] %v2618_v2 }
  0x2b   : > { %399 = vst [vmem:[#allocation2 + $0x1f0] sm:$0xff] %v2618_v2  ;;  %400 = vst [vmem:[#allocation2 + $0x1f8] sm:$0xff] %v2618_v2  ;;  %v558_v2 = vmul.f32 %v2789_v10, %v487_v56  ;;  %2576 = vmatpush3.bf16.msra.mxu1 %v2923_v35 }
  0x2c   : > { %608 = vst.msk [vmem:[#allocation2] sm:$0xff] %vm607_vm0, %v543_v19  ;;  %609 = vst.msk [vmem:[#allocation2 + $0x8] sm:$0xff] %vm607_vm0, %v544_v20  ;;  %v494_v19 = vsub.f32 %v423_v63, %v2782_v7  ;;  %v495_v20 = vsub.f32 %v424_v0, %v2782_v7  ;;  %v507_v63 = vsub.f32 %v436_v48, %v2782_v7 }
  0x2d   : > { %610 = vst.msk [vmem:[#allocation2 + $0x10] sm:$0xff] %vm607_vm0, %v545_v26  ;;  %611 = vst.msk [vmem:[#allocation2 + $0x18] sm:$0xff] %vm607_vm0, %v546_v27  ;;  %v428_v26 = vld [vmem:[%s2768_s21 + $0xd8] sm:$0xff]  ;;  %v429_v27 = vld [vmem:[%s2768_s21 + $0xe0] sm:$0xff]  ;;  %v508_v0 = vsub.f32 %v437_v49, %v2782_v7 }
  0x2e   : > { %612 = vst.msk [vmem:[#allocation2 + $0x20] sm:$0xff] %vm607_vm0, %v547_v33  ;;  %613 = vst.msk [vmem:[#allocation2 + $0x28] sm:$0xff] %vm607_vm0, %v548_v34  ;;  %v565_v28 = vmul.f32 %v2789_v10, %v494_v19  ;;  %v566_v29 = vmul.f32 %v2789_v10, %v495_v20  ;;  %v498_v33 = vsub.f32 %v427_v21, %v2782_v7  ;;  %v432_v34 = vld [vmem:[%s2768_s21 + $0xf8] sm:$0xff]  ;;  %v446_v21 = vld [vmem:[%s2768_s21 + $0x168] sm:$0xff] }
  0x2f   : > { %614 = vst.msk [vmem:[#allocation2 + $0x30] sm:$0xff] %vm607_vm0, %v549_v40  ;;  %615 = vst.msk [vmem:[#allocation2 + $0x38] sm:$0xff] %vm607_vm0, %v550_v41  ;;  %v499_v37 = vsub.f32 %v428_v26, %v2782_v7  ;;  %v500_v38 = vsub.f32 %v429_v27, %v2782_v7  ;;  %v501_v41 = vsub.f32 %v430_v31, %v2782_v7  ;;  %v447_v27 = vld [vmem:[%s2768_s21 + $0x170] sm:$0xff] }
  0x30   : > { %616 = vst.msk [vmem:[#allocation2 + $0x40] sm:$0xff] %vm607_vm0, %v551_v46  ;;  %617 = vst.msk [vmem:[#allocation2 + $0x48] sm:$0xff] %vm607_vm0, %v552_v47  ;;  %v569_v40 = vmul.f32 %v2789_v10, %v498_v33  ;;  %v503_v47 = vsub.f32 %v432_v34, %v2782_v7  ;;  %v578_v14 = vmul.f32 %v2789_v10, %v507_v63  ;;  %v450_v33 = vld [vmem:[%s2768_s21 + $0x188] sm:$0xff] }
  0x31   : > { %618 = vst.msk [vmem:[#allocation2 + $0x50] sm:$0xff] %vm607_vm0, %v553_v53  ;;  %619 = vst.msk [vmem:[#allocation2 + $0x58] sm:$0xff] %vm607_vm0, %v554_v54  ;;  %v570_v45 = vmul.f32 %v2789_v10, %v499_v37  ;;  %v571_v46 = vmul.f32 %v2789_v10, %v500_v38  ;;  %v572_v52 = vmul.f32 %v2789_v10, %v501_v41 }
  0x32   : > { %620 = vst.msk [vmem:[#allocation2 + $0x60] sm:$0xff] %vm607_vm0, %v555_v59  ;;  %621 = vst.msk [vmem:[#allocation2 + $0x68] sm:$0xff] %vm607_vm0, %v556_v60  ;;  %v573_v53 = vmul.f32 %v2789_v10, %v502_v42  ;;  %v504_v54 = vsub.f32 %v433_v39, %v2782_v7  ;;  %v574_v58 = vmul.f32 %v2789_v10, %v503_v47 }
  0x33   : > { %v672_v15 = vld [vmem:[#allocation2] sm:$0xff]  ;;  %v673_v16 = vld [vmem:[#allocation2 + $0x8] sm:$0xff]  ;;  %622 = vst.msk [vmem:[#allocation2 + $0x70] sm:$0xff] %vm607_vm0, %v557_v1  ;;  %623 = vst.msk [vmem:[#allocation2 + $0x78] sm:$0xff] %vm607_vm0, %v558_v2  ;;  %v505_v59 = vsub.f32 %v434_v43, %v2782_v7  ;;  %v506_v60 = vsub.f32 %v435_v44, %v2782_v7  ;;  %v515_v26 = vsub.f32 %v444_v11, %v2782_v7 }
  0x34   : > { %v736_v22 = vpack.c.bf16 %v673_v16, %v672_v15  ;;  %624 = vst.msk [vmem:[#allocation2 + $0x80] sm:$0xff] %vm607_vm0, %v559_v8  ;;  %625 = vst.msk [vmem:[#allocation2 + $0x88] sm:$0xff] %vm607_vm0, %v560_v9  ;;  %v674_v50 = vld [vmem:[#allocation2 + $0x10] sm:$0xff]  ;;  %v675_v51 = vld [vmem:[#allocation2 + $0x18] sm:$0xff]  ;;  %v575_v62 = vmul.f32 %v2789_v10, %v504_v54  ;;  %v579_v15 = vmul.f32 %v2789_v10, %v508_v0 }
  0x35   : > { %626 = vst.msk [vmem:[#allocation2 + $0x90] sm:$0xff] %vm607_vm0, %v561_v17  ;;  %627 = vst.msk [vmem:[#allocation2 + $0x98] sm:$0xff] %vm607_vm0, %v562_v18  ;;  %v676_v56 = vld [vmem:[#allocation2 + $0x20] sm:$0xff]  ;;  %v677_v57 = vld [vmem:[#allocation2 + $0x28] sm:$0xff]  ;;  %v737_v3 = vpack.c.bf16 %v675_v51, %v674_v50  ;;  %v576_v5 = vmul.f32 %v2789_v10, %v505_v59  ;;  %v577_v6 = vmul.f32 %v2789_v10, %v506_v60 }
  0x36   : > { %2337 = vmatprep.mubr.bf16.mxu0 %v736_v22  ;;  %628 = vst.msk [vmem:[#allocation2 + $0xa0] sm:$0xff] %vm607_vm0, %v563_v23  ;;  %629 = vst.msk [vmem:[#allocation2 + $0xa8] sm:$0xff] %vm607_vm0, %v564_v24  ;;  %v440_v1 = vld [vmem:[%s2768_s21 + $0x138] sm:$0xff]  ;;  %v441_v2 = vld [vmem:[%s2768_s21 + $0x140] sm:$0xff]  ;;  %v738_v12 = vpack.c.bf16 %v677_v57, %v676_v56  ;;  %v510_v16 = vsub.f32 %v439_v61, %v2782_v7  ;;  %v580_v18 = vmul.f32 %v2789_v10, %v509_v4 }
  0x37   : > { %630 = vst.msk [vmem:[#allocation2 + $0xb0] sm:$0xff] %vm607_vm0, %v565_v28  ;;  %631 = vst.msk [vmem:[#allocation2 + $0xb8] sm:$0xff] %vm607_vm0, %v566_v29  ;;  %v442_v8 = vld [vmem:[%s2768_s21 + $0x148] sm:$0xff]  ;;  %v443_v9 = vld [vmem:[%s2768_s21 + $0x150] sm:$0xff]  ;;  %v511_v19 = vsub.f32 %v440_v1, %v2782_v7  ;;  %v512_v20 = vsub.f32 %v441_v2, %v2782_v7  ;;  %2338 = vmatmul.mubr.bf16.vlgmr.msra.gmra.mxu0 %v737_v3  ;;  %v586_v38 = vmul.f32 %v2789_v10, %v515_v26 }
  0x38   : > { %632 = vst.msk [vmem:[#allocation2 + $0xc0] sm:$0xff] %vm607_vm0, %v567_v32  ;;  %633 = vst.msk [vmem:[#allocation2 + $0xc8] sm:$0xff] %vm607_vm0, %v568_v36  ;;  %v445_v17 = vld [vmem:[%s2768_s21 + $0x160] sm:$0xff]  ;;  %v2986_v22 = vld [vmem:[#allocation2 + $0x30] sm:$0xff]  ;;  %v581_v23 = vmul.f32 %v2789_v10, %v510_v16  ;;  %v513_v24 = vsub.f32 %v442_v8, %v2782_v7  ;;  %v514_v25 = vsub.f32 %v443_v9, %v2782_v7  ;;  %2341 = vmatprep.mubr.bf16.mxu0 %v738_v12 }
  0x39   : > { %634 = vst.msk [vmem:[#allocation2 + $0xd0] sm:$0xff] %vm607_vm0, %v569_v40  ;;  %635 = vst.msk [vmem:[#allocation2 + $0xd8] sm:$0xff] %vm607_vm0, %v570_v45  ;;  %v448_v28 = vld [vmem:[%s2768_s21 + $0x178] sm:$0xff]  ;;  %v582_v30 = vmul.f32 %v2789_v10, %v511_v19  ;;  %v583_v31 = vmul.f32 %v2789_v10, %v512_v20  ;;  %v516_v13 = vsub.f32 %v445_v17, %v2782_v7  ;;  %v449_v32 = vld [vmem:[%s2768_s21 + $0x180] sm:$0xff] }
  0x3a   : > { %636 = vst.msk [vmem:[#allocation2 + $0xe0] sm:$0xff] %vm607_vm0, %v571_v46  ;;  %637 = vst.msk [vmem:[#allocation2 + $0xe8] sm:$0xff] %vm607_vm0, %v572_v52  ;;  %v2997_v29 = vld [vmem:[#allocation2 + $0x38] sm:$0xff]  ;;  %v3005_v34 = vld [vmem:[#allocation2 + $0x40] sm:$0xff]  ;;  %v584_v36 = vmul.f32 %v2789_v10, %v513_v24  ;;  %v585_v37 = vmul.f32 %v2789_v10, %v514_v25  ;;  %v517_v39 = vsub.f32 %v446_v21, %v2782_v7 }
  0x3b   : > { %638 = vst.msk [vmem:[#allocation2 + $0xf0] sm:$0xff] %vm607_vm0, %v573_v53  ;;  %639 = vst.msk [vmem:[#allocation2 + $0xf8] sm:$0xff] %vm607_vm0, %v574_v58  ;;  %v3007_v35 = vld [vmem:[#allocation2 + $0x48] sm:$0xff]  ;;  %v451_v40 = vld [vmem:[%s2768_s21 + $0x190] sm:$0xff]  ;;  %v587_v41 = vmul.f32 %v2789_v10, %v516_v13  ;;  %v518_v42 = vsub.f32 %v447_v27, %v2782_v7  ;;  %v519_v43 = vsub.f32 %v448_v28, %v2782_v7 }
  0x3c   : > { %640 = vst.msk [vmem:[#allocation2 + $0x100] sm:$0xff] %vm607_vm0, %v575_v62  ;;  %641 = vst.msk [vmem:[#allocation2 + $0x108] sm:$0xff] %vm607_vm0, %v576_v5  ;;  %v452_v44 = vld [vmem:[%s2768_s21 + $0x198] sm:$0xff]  ;;  %v453_v45 = vld [vmem:[%s2768_s21 + $0x1a0] sm:$0xff]  ;;  %v739_v46 = vpack.c.bf16 %v2997_v29, %v2986_v22  ;;  %v588_v47 = vmul.f32 %v2789_v10, %v517_v39  ;;  %v520_v48 = vsub.f32 %v449_v32, %v2782_v7 }
  0x3d   : > { %642 = vst.msk [vmem:[#allocation2 + $0x110] sm:$0xff] %vm607_vm0, %v577_v6  ;;  %643 = vst.msk [vmem:[#allocation2 + $0x118] sm:$0xff] %vm607_vm0, %v578_v14  ;;  %v521_v49 = vsub.f32 %v450_v33, %v2782_v7  ;;  %v454_v50 = vld [vmem:[%s2768_s21 + $0x1a8] sm:$0xff]  ;;  %v455_v51 = vld [vmem:[%s2768_s21 + $0x1b0] sm:$0xff]  ;;  %v740_v52 = vpack.c.bf16 %v3007_v35, %v3005_v34  ;;  %v589_v54 = vmul.f32 %v2789_v10, %v518_v42 }
  0x3e   : > { %644 = vst.msk [vmem:[#allocation2 + $0x120] sm:$0xff] %vm607_vm0, %v579_v15  ;;  %645 = vst.msk [vmem:[#allocation2 + $0x128] sm:$0xff] %vm607_vm0, %v580_v18  ;;  %v590_v55 = vmul.f32 %v2789_v10, %v519_v43  ;;  %v522_v56 = vsub.f32 %v451_v40, %v2782_v7  ;;  %v456_v57 = vld [vmem:[%s2768_s21 + $0x1b8] sm:$0xff]  ;;  %v457_v58 = vld [vmem:[%s2768_s21 + $0x1c0] sm:$0xff]  ;;  %v591_v61 = vmul.f32 %v2789_v10, %v520_v48 }
  0x3f   : > { %646 = vst.msk [vmem:[#allocation2 + $0x130] sm:$0xff] %vm607_vm0, %v581_v23  ;;  %647 = vst.msk [vmem:[#allocation2 + $0x138] sm:$0xff] %vm607_vm0, %v582_v30  ;;  %v592_v62 = vmul.f32 %v2789_v10, %v521_v49  ;;  %v523_v63 = vsub.f32 %v452_v44, %v2782_v7  ;;  %v524_v0 = vsub.f32 %v453_v45, %v2782_v7  ;;  %v458_v1 = vld [vmem:[%s2768_s21 + $0x1c8] sm:$0xff]  ;;  %v3046_v2 = vld [vmem:[#allocation2 + $0x50] sm:$0xff]  ;;  %2342 = vmatmul.mubr.bf16.gmra.mxu0 %v739_v46 }
  0x40   : > { %648 = vst.msk [vmem:[#allocation2 + $0x140] sm:$0xff] %vm607_vm0, %v583_v31  ;;  %649 = vst.msk [vmem:[#allocation2 + $0x148] sm:$0xff] %vm607_vm0, %v584_v36  ;;  %v3048_v3 = vld [vmem:[#allocation2 + $0x58] sm:$0xff]  ;;  %v593_v8 = vmul.f32 %v2789_v10, %v522_v56  ;;  %v525_v9 = vsub.f32 %v454_v50, %v2782_v7  ;;  %v526_v11 = vsub.f32 %v455_v51, %v2782_v7  ;;  %v459_v12 = vld [vmem:[%s2768_s21 + $0x1d0] sm:$0xff]  ;;  %2345 = vmatprep.mubr.bf16.mxu0 %v740_v52 }
  0x41   : > { %650 = vst.msk [vmem:[#allocation2 + $0x150] sm:$0xff] %vm607_vm0, %v585_v37  ;;  %651 = vst.msk [vmem:[#allocation2 + $0x158] sm:$0xff] %vm607_vm0, %v586_v38  ;;  %v594_v16 = vmul.f32 %v2789_v10, %v523_v63  ;;  %v595_v17 = vmul.f32 %v2789_v10, %v524_v0  ;;  %v527_v18 = vsub.f32 %v456_v57, %v2782_v7  ;;  %v460_v19 = vld [vmem:[%s2768_s21 + $0x1d8] sm:$0xff]  ;;  %v461_v20 = vld [vmem:[%s2768_s21 + $0x1e0] sm:$0xff] }
  0x42   : > { %652 = vst.msk [vmem:[#allocation2 + $0x160] sm:$0xff] %vm607_vm0, %v587_v41  ;;  %653 = vst.msk [vmem:[#allocation2 + $0x168] sm:$0xff] %vm607_vm0, %v588_v47  ;;  %v684_v21 = vld [vmem:[#allocation2 + $0x60] sm:$0xff]  ;;  %v685_v22 = vld [vmem:[#allocation2 + $0x68] sm:$0xff]  ;;  %v596_v24 = vmul.f32 %v2789_v10, %v525_v9  ;;  %v597_v25 = vmul.f32 %v2789_v10, %v526_v11  ;;  %v528_v29 = vsub.f32 %v457_v58, %v2782_v7 }
  0x43   : > { %v704_v53 = vld [vmem:[#allocation2 + $0x100] sm:$0xff]  ;;  %v705_v59 = vld [vmem:[#allocation2 + $0x108] sm:$0xff]  ;;  %654 = vst.msk [vmem:[#allocation2 + $0x170] sm:$0xff] %vm607_vm0, %v589_v54  ;;  %655 = vst.msk [vmem:[#allocation2 + $0x178] sm:$0xff] %vm607_vm0, %v590_v55  ;;  %v598_v28 = vmul.f32 %v2789_v10, %v527_v18  ;;  %v529_v30 = vsub.f32 %v458_v1, %v2782_v7  ;;  %v530_v33 = vsub.f32 %v459_v12, %v2782_v7 }
  0x44   : > { %v706_v60 = vld [vmem:[#allocation2 + $0x110] sm:$0xff]  ;;  %v752_v5 = vpack.c.bf16 %v705_v59, %v704_v53  ;;  %v707_v6 = vld [vmem:[#allocation2 + $0x118] sm:$0xff]  ;;  %656 = vst.msk [vmem:[#allocation2 + $0x180] sm:$0xff] %vm607_vm0, %v591_v61  ;;  %657 = vst.msk [vmem:[#allocation2 + $0x188] sm:$0xff] %vm607_vm0, %v592_v62  ;;  %v531_v34 = vsub.f32 %v460_v19, %v2782_v7  ;;  %v532_v35 = vsub.f32 %v461_v20, %v2782_v7 }
  0x45   : > { %v708_v4 = vld [vmem:[#allocation2 + $0x120] sm:$0xff]  ;;  %v753_v14 = vpack.c.bf16 %v707_v6, %v706_v60  ;;  %v709_v15 = vld [vmem:[#allocation2 + $0x128] sm:$0xff]  ;;  %658 = vst.msk [vmem:[#allocation2 + $0x190] sm:$0xff] %vm607_vm0, %v593_v8  ;;  %659 = vst.msk [vmem:[#allocation2 + $0x198] sm:$0xff] %vm607_vm0, %v594_v16  ;;  %v741_v37 = vpack.c.bf16 %v3048_v3, %v3046_v2  ;;  %v599_v39 = vmul.f32 %v2789_v10, %v528_v29 }
  0x46   : > { %2369 = vmatprep.mubr.bf16.mxu1 %v752_v5  ;;  %v754_v23 = vpack.c.bf16 %v709_v15, %v708_v4  ;;  %v462_v26 = vld [vmem:[%s2768_s21 + $0x1e8] sm:$0xff]  ;;  %v710_v27 = vld [vmem:[#allocation2 + $0x130] sm:$0xff]  ;;  %660 = vst.msk [vmem:[#allocation2 + $0x1a0] sm:$0xff] %vm607_vm0, %v595_v17  ;;  %v711_v13 = vld [vmem:[#allocation2 + $0x138] sm:$0xff]  ;;  %v600_v40 = vmul.f32 %v2789_v10, %v529_v30  ;;  %v601_v42 = vmul.f32 %v2789_v10, %v530_v33 }
  0x47   : > { %2370 = vmatmul.mubr.bf16.vlgmr.msra.gmra.mxu1 %v753_v14  ;;  %v463_v31 = vld [vmem:[%s2768_s21 + $0x1f0] sm:$0xff]  ;;  %v712_v32 = vld [vmem:[#allocation2 + $0x140] sm:$0xff]  ;;  %661 = vst.msk [vmem:[#allocation2 + $0x1a8] sm:$0xff] %vm607_vm0, %v596_v24  ;;  %662 = vst.msk [vmem:[#allocation2 + $0x1b0] sm:$0xff] %vm607_vm0, %v597_v25  ;;  %v602_v43 = vmul.f32 %v2789_v10, %v531_v34  ;;  %v533_v44 = vsub.f32 %v462_v26, %v2782_v7  ;;  %v603_v45 = vmul.f32 %v2789_v10, %v532_v35 }
  0x48   : > { %2373 = vmatprep.mubr.bf16.mxu1 %v754_v23  ;;  %v464_v36 = vld [vmem:[%s2768_s21 + $0x1f8] sm:$0xff]  ;;  %v713_v38 = vld [vmem:[#allocation2 + $0x148] sm:$0xff]  ;;  %663 = vst.msk [vmem:[#allocation2 + $0x1b8] sm:$0xff] %vm607_vm0, %v598_v28  ;;  %v742_v46 = vpack.c.bf16 %v685_v22, %v684_v21  ;;  %v755_v47 = vpack.c.bf16 %v711_v13, %v710_v27  ;;  %664 = vst.msk [vmem:[#allocation2 + $0x1c0] sm:$0xff] %vm607_vm0, %v599_v39  ;;  %v534_v48 = vsub.f32 %v463_v31, %v2782_v7 }
  0x49   : > { %v2594_v41 = vld [vmem:[%s3559_s5 + $0x38] sm:$0xff]   ;;  %665 = vst.msk [vmem:[#allocation2 + $0x1c8] sm:$0xff] %vm607_vm0, %v600_v40  ;;  %v535_v49 = vsub.f32 %v464_v36, %v2782_v7  ;;  %v2595_v50 = vld [vmem:[%s3559_s5 + $0x30] sm:$0xff]   ;;  %v756_v51 = vpack.c.bf16 %v713_v38, %v712_v32  ;;  %666 = vst.msk [vmem:[#allocation2 + $0x1d0] sm:$0xff] %vm607_vm0, %v601_v42  ;;  %v604_v52 = vmul.f32 %v2789_v10, %v533_v44  ;;  %2346 = vmatmul.mubr.bf16.gmra.mxu0 %v741_v37 }
  0x4a   : > { %2401 = vmatprep.subr.bf16.mxu1 %v2594_v41  ;;  %667 = vst.msk [vmem:[#allocation2 + $0x1d8] sm:$0xff] %vm607_vm0, %v602_v43  ;;  %668 = vst.msk [vmem:[#allocation2 + $0x1e0] sm:$0xff] %vm607_vm0, %v603_v45  ;;  %v686_v53 = vld [vmem:[#allocation2 + $0x70] sm:$0xff]  ;;  %v687_v54 = vld [vmem:[#allocation2 + $0x78] sm:$0xff]  ;;  %v605_v55 = vmul.f32 %v2789_v10, %v534_v48  ;;  %2349 = vmatprep.mubr.bf16.mxu0 %v742_v46 }
  0x4b   : > { %2402 = vmatpush3.bf16.msra.mxu1 %v2594_v41  ;;  %v606_v7 = vmul.f32 %v2789_v10, %v535_v49  ;;  %v2596_v56 = vld [vmem:[%s3559_s5 + $0x28] sm:$0xff]   ;;  %v688_v57 = vld [vmem:[#allocation2 + $0x80] sm:$0xff]  ;;  %669 = vst.msk [vmem:[#allocation2 + $0x1e8] sm:$0xff] %vm607_vm0, %v604_v52  ;;  %v714_v59 = vld [vmem:[#allocation2 + $0x150] sm:$0xff]  ;;  %v743_v63 = vpack.c.bf16 %v687_v54, %v686_v53 }
  0x4c   : > { %2403 = vmatprep.subr.bf16.mxu1 %v2595_v50  ;;  %v689_v58 = vld [vmem:[#allocation2 + $0x88] sm:$0xff]  ;;  %v715_v60 = vld [vmem:[#allocation2 + $0x158] sm:$0xff]  ;;  %670 = vst.msk [vmem:[#allocation2 + $0x1f0] sm:$0xff] %vm607_vm0, %v605_v55  ;;  %v716_v10 = vld [vmem:[#allocation2 + $0x160] sm:$0xff] }
  0x4d   : > { %671 = vst.msk [vmem:[#allocation2 + $0x1f8] sm:$0xff] %vm607_vm0, %v606_v7  ;;  %v717_v61 = vld [vmem:[#allocation2 + $0x168] sm:$0xff]  ;;  %v2597_v62 = vld [vmem:[%s3559_s5 + $0x20] sm:$0xff]   ;;  %v744_v0 = vpack.c.bf16 %v689_v58, %v688_v57  ;;  %v757_v1 = vpack.c.bf16 %v715_v60, %v714_v59  ;;  %v690_v3 = vld [vmem:[#allocation2 + $0x90] sm:$0xff] }
  0x4e   : > { %v758_v2 = vpack.c.bf16 %v717_v61, %v716_v10  ;;  %v691_v5 = vld [vmem:[#allocation2 + $0x98] sm:$0xff]  ;;  %v692_v4 = vld [vmem:[#allocation2 + $0xa0] sm:$0xff]  ;;  %v693_v8 = vld [vmem:[#allocation2 + $0xa8] sm:$0xff] }
  0x4f   : > { %2374 = vmatmul.mubr.bf16.gmra.mxu1 %v755_v47  ;;  %v2598_v6 = vld [vmem:[%s3559_s5 + $0x18] sm:$0xff]   ;;  %v718_v9 = vld [vmem:[#allocation2 + $0x170] sm:$0xff]  ;;  %v720_v12 = vld [vmem:[#allocation2 + $0x180] sm:$0xff]  ;;  %v745_v16 = vpack.c.bf16 %v691_v5, %v690_v3  ;;  %v746_v17 = vpack.c.bf16 %v693_v8, %v692_v4 }
  0x50   : > { %2377 = vmatprep.mubr.bf16.mxu1 %v756_v51  ;;  %2404 = vmatpush3.bf16.msra.mxu1 %v2595_v50  ;;  %v719_v11 = vld [vmem:[#allocation2 + $0x178] sm:$0xff]  ;;  %v721_v14 = vld [vmem:[#allocation2 + $0x188] sm:$0xff]  ;;  %v2599_v15 = vld [vmem:[%s3559_s5 + $0x10] sm:$0xff]  }
  0x51   : > { %2405 = vmatprep.subr.bf16.mxu1 %v2596_v56  ;;  %2350 = vmatmul.mubr.bf16.gmra.mxu0 %v743_v63  ;;  %v759_v18 = vpack.c.bf16 %v719_v11, %v718_v9  ;;  %v760_v19 = vpack.c.bf16 %v721_v14, %v720_v12  ;;  %v2600_v20 = vld [vmem:[%s3559_s5 + $0x8] sm:$0xff]   ;;  %v694_v21 = vld [vmem:[#allocation2 + $0xb0] sm:$0xff]  ;;  %v695_v22 = vld [vmem:[#allocation2 + $0xb8] sm:$0xff] }
  0x52   : > { %2353 = vmatprep.mubr.bf16.mxu0 %v744_v0  ;;  %v696_v23 = vld [vmem:[#allocation2 + $0xc0] sm:$0xff]  ;;  %v697_v24 = vld [vmem:[#allocation2 + $0xc8] sm:$0xff]  ;;  %v722_v25 = vld [vmem:[#allocation2 + $0x190] sm:$0xff]  ;;  %v747_v29 = vpack.c.bf16 %v695_v22, %v694_v21 }
  0x53   : > { %v723_v26 = vld [vmem:[#allocation2 + $0x198] sm:$0xff]  ;;  %v724_v27 = vld [vmem:[#allocation2 + $0x1a0] sm:$0xff]  ;;  %v725_v28 = vld [vmem:[#allocation2 + $0x1a8] sm:$0xff]  ;;  %v748_v30 = vpack.c.bf16 %v697_v24, %v696_v23 }
  0x54   : > { %2406 = vmatpush3.bf16.msra.mxu1 %v2596_v56  ;;  %v761_v31 = vpack.c.bf16 %v723_v26, %v722_v25  ;;  %v762_v13 = vpack.c.bf16 %v725_v28, %v724_v27  ;;  %v698_v32 = vld [vmem:[#allocation2 + $0xd0] sm:$0xff]  ;;  %v699_v33 = vld [vmem:[#allocation2 + $0xd8] sm:$0xff]  ;;  %v700_v34 = vld [vmem:[#allocation2 + $0xe0] sm:$0xff] }
  0x55   : > { %2407 = vmatprep.subr.bf16.mxu1 %v2597_v62  ;;  %v701_v35 = vld [vmem:[#allocation2 + $0xe8] sm:$0xff]  ;;  %v726_v36 = vld [vmem:[#allocation2 + $0x1b0] sm:$0xff]  ;;  %v727_v37 = vld [vmem:[#allocation2 + $0x1b8] sm:$0xff]  ;;  %v749_v40 = vpack.c.bf16 %v699_v33, %v698_v32 }
  0x56   : > { %v728_v38 = vld [vmem:[#allocation2 + $0x1c0] sm:$0xff]  ;;  %v729_v39 = vld [vmem:[#allocation2 + $0x1c8] sm:$0xff]  ;;  %v750_v41 = vpack.c.bf16 %v701_v35, %v700_v34  ;;  %v763_v42 = vpack.c.bf16 %v727_v37, %v726_v36  ;;  %v702_v44 = vld [vmem:[#allocation2 + $0xf0] sm:$0xff] }
  0x57   : > { %2378 = vmatmul.mubr.bf16.gmra.mxu1 %v757_v1  ;;  %v764_v43 = vpack.c.bf16 %v729_v39, %v728_v38  ;;  %v703_v45 = vld [vmem:[#allocation2 + $0xf8] sm:$0xff]  ;;  %v730_v46 = vld [vmem:[#allocation2 + $0x1d0] sm:$0xff]  ;;  %v732_v48 = vld [vmem:[#allocation2 + $0x1e0] sm:$0xff] }
  0x58   : > { %2381 = vmatprep.mubr.bf16.mxu1 %v758_v2  ;;  %2408 = vmatpush3.bf16.msra.mxu1 %v2597_v62  ;;  %v731_v47 = vld [vmem:[#allocation2 + $0x1d8] sm:$0xff]  ;;  %v733_v49 = vld [vmem:[#allocation2 + $0x1e8] sm:$0xff]  ;;  %v751_v50 = vpack.c.bf16 %v703_v45, %v702_v44  ;;  %v734_v53 = vld [vmem:[#allocation2 + $0x1f0] sm:$0xff] }
  0x59   : > { %2409 = vmatprep.subr.bf16.mxu1 %v2598_v6  ;;  %2354 = vmatmul.mubr.bf16.gmra.mxu0 %v745_v16  ;;  %v765_v51 = vpack.c.bf16 %v731_v47, %v730_v46  ;;  %v766_v52 = vpack.c.bf16 %v733_v49, %v732_v48  ;;  %v735_v54 = vld [vmem:[#allocation2 + $0x1f8] sm:$0xff]  ;;  %v2601_v7 = vld [vmem:[%s3559_s5] sm:$0xff]   ;;  %v2603_v0 = vld [vmem:[%s3561_s7 + $0x30] sm:$0xff]  }
  0x5a   : > { %2357 = vmatprep.mubr.bf16.mxu0 %v746_v17  ;;  %v767_v55 = vpack.c.bf16 %v735_v54, %v734_v53  ;;  %v3128_v58 = vld [vmem:[%s3558_s4] ss:$0 sm:$0xff]  ;;  %v2602_v63 = vld [vmem:[%s3561_s7 + $0x38] sm:$0xff]   ;;  %v2604_v11 = vld [vmem:[%s3561_s7 + $0x28] sm:$0xff]  }
  0x5b   : > { %2481 = vmatprep.subr.bf16.mxu0 %v2602_v63  ;;  %v2605_v22 = vld [vmem:[%s3561_s7 + $0x20] sm:$0xff]  }
  0x5c   : > { %2410 = vmatpush3.bf16.msra.mxu1 %v2598_v6  ;;  %2482 = vmatpush3.bf16.msra.mxu0 %v2602_v63 }
  0x5d   : > { %2411 = vmatprep.subr.bf16.mxu1 %v2599_v15  ;;  %2483 = vmatprep.subr.bf16.mxu0 %v2603_v0 }
  0x5f   : > { %2382 = vmatmul.mubr.bf16.gmra.mxu1 %v759_v18 }
  0x60   : > { %2385 = vmatprep.mubr.bf16.mxu1 %v760_v19  ;;  %2412 = vmatpush3.bf16.msra.mxu1 %v2599_v15 }
  0x61   : > { %2413 = vmatprep.subr.bf16.mxu1 %v2600_v20  ;;  %2358 = vmatmul.mubr.bf16.gmra.mxu0 %v747_v29 }
  0x62   : > { %2361 = vmatprep.mubr.bf16.mxu0 %v748_v30  ;;  %2484 = vmatpush3.bf16.msra.mxu0 %v2603_v0 }
  0x63   : > { %2485 = vmatprep.subr.bf16.mxu0 %v2604_v11 }
  0x64   : > { %2414 = vmatpush3.bf16.msra.mxu1 %v2600_v20 }
  0x65   : > { %2415 = vmatprep.subr.bf16.mxu1 %v2601_v7 }
  0x66   : > { %2486 = vmatpush3.bf16.msra.mxu0 %v2604_v11 }
  0x67   : > { %2386 = vmatmul.mubr.bf16.gmra.mxu1 %v761_v31  ;;  %2487 = vmatprep.subr.bf16.mxu0 %v2605_v22 }
  0x68   : > { %2389 = vmatprep.mubr.bf16.mxu1 %v762_v13  ;;  %2416 = vmatpush3.bf16.msra.mxu1 %v2601_v7  ;;  %v2606_v13 = vld [vmem:[%s3561_s7 + $0x18] sm:$0xff]  }
  0x69   : > { %2362 = vmatmul.mubr.bf16.gmra.mxu0 %v749_v40 }
  0x6a   : > { %2365 = vmatprep.mubr.bf16.mxu0 %v750_v41  ;;  %2488 = vmatpush3.bf16.msra.mxu0 %v2605_v22  ;;  %v2607_v41 = vld [vmem:[%s3561_s7 + $0x10] sm:$0xff]  }
  0x6b   : > { %2489 = vmatprep.subr.bf16.mxu0 %v2606_v13 }
  0x6e   : > { %2490 = vmatpush3.bf16.msra.mxu0 %v2606_v13 }
  0x6f   : > { %2390 = vmatmul.mubr.bf16.gmra.mxu1 %v763_v42  ;;  %2491 = vmatprep.subr.bf16.mxu0 %v2607_v41 }
  0x70   : > { %2393 = vmatprep.mubr.bf16.mxu1 %v764_v43 }
  0x71   : > { %2366 = vmatmul.mubr.bf16.gmra.mxu0 %v751_v50 }
  0x72   : > { %2492 = vmatpush3.bf16.msra.mxu0 %v2607_v41 }
  0x77   : > { %2394 = vmatmul.mubr.bf16.gmra.mxu1 %v765_v51  ;;  %v2608_v51 = vld [vmem:[%s3561_s7 + $0x8] sm:$0xff]  }
  0x78   : > { %2397 = vmatprep.mubr.bf16.mxu1 %v766_v52  ;;  %2493 = vmatprep.subr.bf16.mxu0 %v2608_v51 }
  0x79   : > { %2494 = vmatpush3.bf16.msra.mxu0 %v2608_v51 }
  0x7f   : > { %2398 = vmatmul.mubr.bf16.gmra.mxu1 %v767_v55 }
  0xf7   : > { %v2339_v56 = vpop.f32.mrf.mxu0 }
  0xf8   : > { %v882_v61 = vadd.f32 %v2339_v56, %v3128_v58 }
  0xf9   : > { %v873_v57 = vpop.f32.mrf.mxu0 }
  0xfa   : > { %v874_v60 = vadd.f32 %v3128_v58, %v873_v57  ;;  %v1130_v8 = vmax.f32 %v882_v61, 0.0 }
  0xfb   : > { %v2340_v59 = vpop.f32.mrf.mxu0 }
  0xfc   : > { %v885_v10 = vadd.f32 %v2340_v59, %v3128_v58  ;;  %v1128_v5 = vmax.f32 %v874_v60, 0.0 }
  0xfd   : > { %v876_v62 = vpop.f32.mrf.mxu0 }
  0xfe   : > { %v877_v1 = vadd.f32 %v3128_v58, %v876_v62  ;;  %v1131_v2 = vmax.f32 %v885_v10, 0.0 }
  0xff   : > { %v2343_v3 = vpop.f32.mrf.mxu0 }
 0x100   : > { %v1129_v6 = vmax.f32 %v877_v1, 0.0  ;;  %v1193_v15 = vpack.c.bf16 %v1131_v2, %v1130_v8  ;;  %v898_v20 = vadd.f32 %v2343_v3, %v3128_v58 }
 0x101   : > { %v889_v9 = vpop.f32.mrf.mxu0 }
 0x102   : > { %v1192_v12 = vpack.c.bf16 %v1129_v6, %v1128_v5  ;;  %v890_v17 = vadd.f32 %v3128_v58, %v889_v9  ;;  %v1134_v30 = vmax.f32 %v898_v20, 0.0 }
 0x103   : > { %v2344_v16 = vpop.f32.mrf.mxu0 }
 0x104   : > { %v901_v18 = vadd.f32 %v2344_v16, %v3128_v58  ;;  %2417 = vmatprep.mubr.bf16.mxu1 %v1192_v12  ;;  %v1132_v27 = vmax.f32 %v890_v17, 0.0 }
 0x105   : > { %v892_v21 = vpop.f32.mrf.mxu0  ;;  %2418 = vmatmul.mubr.bf16.vlgmr.msra.gmra.mxu1 %v1193_v15 }
 0x106   : > { %v893_v23 = vadd.f32 %v3128_v58, %v892_v21  ;;  %v1135_v25 = vmax.f32 %v901_v18, 0.0 }
 0x107   : > { %v3140_v4 = vpop.f32.mrf.mxu1 }
 0x108   : > { %v1133_v28 = vmax.f32 %v893_v23, 0.0  ;;  %v1195_v34 = vpack.c.bf16 %v1135_v25, %v1134_v30 }
 0x109   : > { %v3145_v14 = vpop.f32.mrf.mxu1  ;;  %v2347_v26 = vpop.f32.mrf.mxu0 }
 0x10a   : > { %v1194_v32 = vpack.c.bf16 %v1133_v28, %v1132_v27  ;;  %v914_v39 = vadd.f32 %v2347_v26, %v3128_v58 }
 0x10b   : > { %v3149_v19 = vpop.f32.mrf.mxu1  ;;  %v905_v31 = vpop.f32.mrf.mxu0 }
 0x10c   : > { %v906_v36 = vadd.f32 %v3128_v58, %v905_v31  ;;  %2421 = vmatprep.mubr.bf16.mxu1 %v1194_v32  ;;  %v1138_v49 = vmax.f32 %v914_v39, 0.0 }
 0x10d   : > { %v3156_v24 = vpop.f32.mrf.mxu1  ;;  %v2348_v35 = vpop.f32.mrf.mxu0  ;;  %2422 = vmatmul.mubr.bf16.gmra.mxu1 %v1195_v34 }
 0x10e   : > { %v917_v37 = vadd.f32 %v2348_v35, %v3128_v58  ;;  %v1136_v46 = vmax.f32 %v906_v36, 0.0 }
 0x10f   : > { %v3158_v29 = vpop.f32.mrf.mxu1  ;;  %v908_v40 = vpop.f32.mrf.mxu0 }
 0x110   : > { %v909_v42 = vadd.f32 %v3128_v58, %v908_v40  ;;  %v1139_v44 = vmax.f32 %v917_v37, 0.0 }
 0x111   : > { %v3163_v33 = vpop.f32.mrf.mxu1  ;;  %v2351_v45 = vpop.f32.mrf.mxu0 }
 0x112   : > { %v1137_v47 = vmax.f32 %v909_v42, 0.0  ;;  %v1197_v54 = vpack.c.bf16 %v1139_v44, %v1138_v49  ;;  %v930_v59 = vadd.f32 %v2351_v45, %v3128_v58 }
 0x113   : > { %v3167_v38 = vpop.f32.mrf.mxu1  ;;  %v921_v50 = vpop.f32.mrf.mxu0 }
 0x114   : > { %v1196_v52 = vpack.c.bf16 %v1137_v47, %v1136_v46  ;;  %v922_v7 = vadd.f32 %v3128_v58, %v921_v50  ;;  %v1142_v2 = vmax.f32 %v930_v59, 0.0 }
 0x115   : > { %v3174_v43 = vpop.f32.mrf.mxu1  ;;  %v2352_v55 = vpop.f32.mrf.mxu0 }
 0x116   : > { %v933_v56 = vadd.f32 %v2352_v55, %v3128_v58  ;;  %2425 = vmatprep.mubr.bf16.mxu1 %v1196_v52  ;;  %v1140_v0 = vmax.f32 %v922_v7, 0.0 }
 0x117   : > { %v3176_v48 = vpop.f32.mrf.mxu1  ;;  %v924_v60 = vpop.f32.mrf.mxu0  ;;  %2426 = vmatmul.mubr.bf16.gmra.mxu1 %v1197_v54 }
 0x118   : > { %v925_v10 = vadd.f32 %v3128_v58, %v924_v60  ;;  %v1143_v61 = vmax.f32 %v933_v56, 0.0 }
 0x119   : > { %v3181_v53 = vpop.f32.mrf.mxu1  ;;  %v2355_v62 = vpop.f32.mrf.mxu0 }
 0x11a   : > { %v1141_v1 = vmax.f32 %v925_v10, 0.0  ;;  %v1199_v6 = vpack.c.bf16 %v1143_v61, %v1142_v2  ;;  %v946_v15 = vadd.f32 %v2355_v62, %v3128_v58  ;;  %v1002_v2 = vadd.f32 %v3128_v58, %v3145_v14 }
 0x11b   : > { %v3185_v57 = vpop.f32.mrf.mxu1  ;;  %v937_v3 = vpop.f32.mrf.mxu0 }
 0x11c   : > { %v1198_v5 = vpack.c.bf16 %v1141_v1, %v1140_v0  ;;  %v938_v11 = vadd.f32 %v3128_v58, %v937_v3  ;;  %v1146_v25 = vmax.f32 %v946_v15, 0.0  ;;  %v1005_v3 = vadd.f32 %v3128_v58, %v3156_v24 }
 0x11d   : > { %v3189_v63 = vpop.f32.mrf.mxu1  ;;  %v2356_v8 = vpop.f32.mrf.mxu0 }
 0x11e   : > { %v949_v12 = vadd.f32 %v2356_v8, %v3128_v58  ;;  %2429 = vmatprep.mubr.bf16.mxu1 %v1198_v5  ;;  %v1144_v22 = vmax.f32 %v938_v11, 0.0  ;;  %v1161_v14 = vmax.f32 %v1005_v3, 0.0 }
 0x11f   : > { %v3191_v9 = vpop.f32.mrf.mxu1  ;;  %v940_v16 = vpop.f32.mrf.mxu0  ;;  %2430 = vmatmul.mubr.bf16.gmra.mxu1 %v1199_v6 }
 0x120   : > { %v941_v17 = vadd.f32 %v3128_v58, %v940_v16  ;;  %v1147_v18 = vmax.f32 %v949_v12, 0.0 }
 0x121   : > { %v2359_v20 = vpop.f32.mrf.mxu0  ;;  %v3197_v21 = vpop.f32.mrf.mxu1 }
 0x122   : > { %v1145_v23 = vmax.f32 %v941_v17, 0.0  ;;  %v1201_v28 = vpack.c.bf16 %v1147_v18, %v1146_v25  ;;  %v962_v34 = vadd.f32 %v2359_v20, %v3128_v58  ;;  %v1160_v17 = vmax.f32 %v1002_v2, 0.0 }
 0x123   : > { %v953_v26 = vpop.f32.mrf.mxu0  ;;  %v3199_v31 = vpop.f32.mrf.mxu1  ;;  %v1058_v2 = vadd.f32 %v3191_v9, %v3128_v58 }
 0x124   : > { %v1200_v27 = vpack.c.bf16 %v1145_v23, %v1144_v22  ;;  %v954_v13 = vadd.f32 %v3128_v58, %v953_v26  ;;  %v1150_v44 = vmax.f32 %v962_v34, 0.0  ;;  %v1013_v34 = vadd.f32 %v3149_v19, %v3128_v58 }
 0x125   : > { %v2360_v30 = vpop.f32.mrf.mxu0  ;;  %v3205_v40 = vpop.f32.mrf.mxu1  ;;  %v1026_v19 = vadd.f32 %v3158_v29, %v3128_v58  ;;  %v1042_v29 = vadd.f32 %v3176_v48, %v3128_v58  ;;  %v1061_v3 = vadd.f32 %v3199_v31, %v3128_v58 }
 0x126   : > { %v965_v32 = vadd.f32 %v2360_v30, %v3128_v58  ;;  %2433 = vmatprep.mubr.bf16.mxu1 %v1200_v27  ;;  %v1148_v41 = vmax.f32 %v954_v13, 0.0  ;;  %v1208_v27 = vpack.c.bf16 %v1161_v14, %v1160_v17  ;;  %v1021_v30 = vadd.f32 %v3128_v58, %v3174_v43 }
 0x127   : > { %v956_v35 = vpop.f32.mrf.mxu0  ;;  %2434 = vmatmul.mubr.bf16.gmra.mxu1 %v1201_v28  ;;  %v3207_v50 = vpop.f32.mrf.mxu1  ;;  %v1018_v28 = vadd.f32 %v3128_v58, %v3163_v33  ;;  %v1010_v13 = vadd.f32 %v3140_v4, %v3128_v58  ;;  %v1034_v43 = vadd.f32 %v3128_v58, %v3181_v53  ;;  %v1037_v4 = vadd.f32 %v3128_v58, %v3189_v63 }
 0x128   : > { %v957_v36 = vadd.f32 %v3128_v58, %v956_v35  ;;  %v1151_v37 = vmax.f32 %v965_v32, 0.0  ;;  %v1050_v53 = vadd.f32 %v3128_v58, %v3197_v21  ;;  %v1053_v63 = vadd.f32 %v3128_v58, %v3205_v40 }
 0x129   : > { %v2363_v39 = vpop.f32.mrf.mxu0  ;;  %v3213_v60 = vpop.f32.mrf.mxu1  ;;  %v1170_v21 = vmax.f32 %v1042_v29, 0.0  ;;  %v1074_v9 = vadd.f32 %v3207_v50, %v3128_v58 }
 0x12a   : > { %v1149_v42 = vmax.f32 %v957_v36, 0.0  ;;  %v1203_v47 = vpack.c.bf16 %v1151_v37, %v1150_v44  ;;  %v978_v54 = vadd.f32 %v2363_v39, %v3128_v58  ;;  %v1164_v36 = vmax.f32 %v1018_v28, 0.0 }
 0x12b   : > { %v969_v45 = vpop.f32.mrf.mxu0  ;;  %v3219_v8 = vpop.f32.mrf.mxu1  ;;  %v1165_v37 = vmax.f32 %v1021_v30, 0.0  ;;  %v1162_v39 = vmax.f32 %v1010_v13, 0.0  ;;  %v1066_v48 = vadd.f32 %v3128_v58, %v3213_v60 }
 0x12c   : > { %v1202_v46 = vpack.c.bf16 %v1149_v42, %v1148_v41  ;;  %v970_v51 = vadd.f32 %v3128_v58, %v969_v45  ;;  %v1154_v62 = vmax.f32 %v978_v54, 0.0  ;;  %v1163_v41 = vmax.f32 %v1013_v34, 0.0 }
 0x12d   : > { %v2364_v49 = vpop.f32.mrf.mxu0  ;;  %v1068_v22 = vpop.f32.mrf.mxu1  ;;  %v1210_v42 = vpack.c.bf16 %v1165_v37, %v1164_v36  ;;  %v1029_v45 = vadd.f32 %v3167_v38, %v3128_v58  ;;  %v1045_v38 = vadd.f32 %v3185_v57, %v3128_v58  ;;  %v1077_v31 = vadd.f32 %v3219_v8, %v3128_v58 }
 0x12e   : > { %v981_v52 = vadd.f32 %v2364_v49, %v3128_v58  ;;  %2437 = vmatprep.mubr.bf16.mxu1 %v1202_v46  ;;  %v1152_v10 = vmax.f32 %v970_v51, 0.0  ;;  %v1209_v44 = vpack.c.bf16 %v1163_v41, %v1162_v39  ;;  %v1169_v49 = vmax.f32 %v1037_v4, 0.0 }
 0x12f   : > { %v972_v55 = vpop.f32.mrf.mxu0  ;;  %2438 = vmatmul.mubr.bf16.gmra.mxu1 %v1203_v47  ;;  %v3233_v35 = vpop.f32.mrf.mxu1  ;;  %v1168_v47 = vmax.f32 %v1034_v43, 0.0  ;;  %v1166_v51 = vmax.f32 %v1026_v19, 0.0  ;;  %v1069_v57 = vadd.f32 %v3128_v58, %v1068_v22 }
 0x130   : > { %v973_v7 = vadd.f32 %v3128_v58, %v972_v55  ;;  %v1155_v56 = vmax.f32 %v981_v52, 0.0  ;;  %v1167_v52 = vmax.f32 %v1029_v45, 0.0  ;;  %v1090_v50 = vadd.f32 %v3233_v35, %v3128_v58 }
 0x131   : > { %v2367_v59 = vpop.f32.mrf.mxu0  ;;  %v1081_v33 = vpop.f32.mrf.mxu1  ;;  %v1212_v55 = vpack.c.bf16 %v1169_v49, %v1168_v47 }
 0x132   : > { %v1153_v61 = vmax.f32 %v973_v7, 0.0  ;;  %v1205_v5 = vpack.c.bf16 %v1155_v56, %v1154_v62  ;;  %v994_v15 = vadd.f32 %v2367_v59, %v3128_v58  ;;  %v1211_v7 = vpack.c.bf16 %v1167_v52, %v1166_v51  ;;  %v2609_v59 = vld [vmem:[%s3561_s7] sm:$0xff]  }
 0x133   : > { %v985_v0 = vpop.f32.mrf.mxu0  ;;  %v2392_v46 = vpop.f32.mrf.mxu1  ;;  %v1171_v62 = vmax.f32 %v1045_v38, 0.0  ;;  %2495 = vmatprep.subr.bf16.mxu0 %v2609_v59  ;;  %v1082_v60 = vadd.f32 %v3128_v58, %v1081_v33  ;;  %v1182_v37 = vmax.f32 %v1090_v50, 0.0  ;;  %v3281_v38 = vld [vmem:[%s3560_s6] ss:$0 sm:$0xff] }
 0x134   : > { %v1204_v1 = vpack.c.bf16 %v1153_v61, %v1152_v10  ;;  %v986_v11 = vadd.f32 %v3128_v58, %v985_v0  ;;  %v1158_v25 = vmax.f32 %v994_v15, 0.0  ;;  %v1172_v10 = vmax.f32 %v1050_v53, 0.0  ;;  %2496 = vmatpush3.bf16.msra.mxu0 %v2609_v59 }
 0x135   : > { %v2368_v6 = vpop.f32.mrf.mxu0  ;;  %v1084_v54 = vpop.f32.mrf.mxu1  ;;  %v1173_v61 = vmax.f32 %v1053_v63, 0.0  ;;  %v1175_v15 = vmax.f32 %v1061_v3, 0.0  ;;  %v1180_v22 = vmax.f32 %v1082_v60, 0.0 }
 0x136   : > { %v997_v12 = vadd.f32 %v2368_v6, %v3128_v58  ;;  %2441 = vmatprep.mubr.bf16.mxu1 %v1204_v1  ;;  %v1156_v24 = vmax.f32 %v986_v11, 0.0  ;;  %v1213_v1 = vpack.c.bf16 %v1171_v62, %v1170_v21  ;;  %v1176_v6 = vmax.f32 %v1066_v48, 0.0 }
 0x137   : > { %v988_v16 = vpop.f32.mrf.mxu0  ;;  %2442 = vmatmul.mubr.bf16.gmra.mxu1 %v1205_v5  ;;  %v2395_v56 = vpop.f32.mrf.mxu1  ;;  %v1214_v40 = vpack.c.bf16 %v1173_v61, %v1172_v10  ;;  %v1177_v11 = vmax.f32 %v1069_v57, 0.0 }
 0x138   : > { %v989_v18 = vadd.f32 %v3128_v58, %v988_v16  ;;  %v1159_v20 = vmax.f32 %v997_v12, 0.0  ;;  %v1174_v12 = vmax.f32 %v1058_v2, 0.0 }
 0x139   : > { %v1097_v0 = vpop.f32.mrf.mxu1  ;;  %v1216_v17 = vpack.c.bf16 %v1177_v11, %v1176_v6 }
 0x13a   : > { %v1157_v23 = vmax.f32 %v989_v18, 0.0  ;;  %v1207_v32 = vpack.c.bf16 %v1159_v20, %v1158_v25  ;;  %v1085_v18 = vadd.f32 %v3128_v58, %v1084_v54  ;;  %v1215_v14 = vpack.c.bf16 %v1175_v15, %v1174_v12 }
 0x13b   : > { %v2396_v5 = vpop.f32.mrf.mxu1  ;;  %v1179_v25 = vmax.f32 %v1077_v31, 0.0  ;;  %v1098_v28 = vadd.f32 %v3128_v58, %v1097_v0 }
 0x13c   : > { %v1206_v26 = vpack.c.bf16 %v1157_v23, %v1156_v24  ;;  %v1181_v24 = vmax.f32 %v1085_v18, 0.0  ;;  %v1178_v23 = vmax.f32 %v1074_v9, 0.0  ;;  %v1109_v35 = vadd.f32 %v2396_v5, %v3128_v58 }
 0x13d   : > { %v1100_v16 = vpop.f32.mrf.mxu1  ;;  %v1184_v34 = vmax.f32 %v1098_v28, 0.0 }
 0x13e   : > { %2445 = vmatprep.mubr.bf16.mxu1 %v1206_v26  ;;  %v1101_v30 = vadd.f32 %v3128_v58, %v1100_v16  ;;  %v1217_v13 = vpack.c.bf16 %v1179_v25, %v1178_v23  ;;  %v1187_v47 = vmax.f32 %v1109_v35, 0.0 }
 0x13f   : > { %2446 = vmatmul.mubr.bf16.gmra.mxu1 %v1207_v32  ;;  %v2399_v20 = vpop.f32.mrf.mxu1  ;;  %v1093_v32 = vadd.f32 %v2392_v46, %v3128_v58 }
 0x140   : > { %2449 = vmatprep.mubr.bf16.mxu1 %v1208_v27  ;;  %v1218_v27 = vpack.c.bf16 %v1181_v24, %v1180_v22  ;;  %v1185_v36 = vmax.f32 %v1101_v30, 0.0  ;;  %v1122_v52 = vadd.f32 %v2399_v20, %v3128_v58 }
 0x141   : > { %v1113_v26 = vpop.f32.mrf.mxu1  ;;  %v1183_v39 = vmax.f32 %v1093_v32, 0.0 }
 0x142   : > { %v1220_v33 = vpack.c.bf16 %v1185_v36, %v1184_v34 }
 0x143   : > { %v2400_v8 = vpop.f32.mrf.mxu1  ;;  %v1219_v4 = vpack.c.bf16 %v1183_v39, %v1182_v37 }
 0x144   : > { %v1125_v54 = vadd.f32 %v2400_v8, %v3128_v58 }
 0x145   : > { %v1116_v41 = vpop.f32.mrf.mxu1 }
 0x146   : > { %v1117_v43 = vadd.f32 %v3128_v58, %v1116_v41  ;;  %v1191_v53 = vmax.f32 %v1125_v54, 0.0 }
 0x147   : > { %2450 = vmatmul.mubr.bf16.gmra.mxu1 %v1209_v44  ;;  %v1106_v44 = vadd.f32 %v2395_v56, %v3128_v58 }
 0x148   : > { %2453 = vmatprep.mubr.bf16.mxu1 %v1210_v42  ;;  %v1114_v42 = vadd.f32 %v3128_v58, %v1113_v26  ;;  %v1189_v45 = vmax.f32 %v1117_v43, 0.0 }
 0x149   : > { %v1186_v46 = vmax.f32 %v1106_v44, 0.0 }
 0x14a   : > { %v1188_v19 = vmax.f32 %v1114_v42, 0.0 }
 0x14b   : > { %v1221_v51 = vpack.c.bf16 %v1187_v47, %v1186_v46 }
 0x14c   : > { %v1222_v49 = vpack.c.bf16 %v1189_v45, %v1188_v19 }
 0x14f   : > { %2454 = vmatmul.mubr.bf16.gmra.mxu1 %v1211_v7 }
 0x150   : > { %2457 = vmatprep.mubr.bf16.mxu1 %v1212_v55  ;;  %v1190_v55 = vmax.f32 %v1122_v52, 0.0 }
 0x152   : > { %v1223_v63 = vpack.c.bf16 %v1191_v53, %v1190_v55 }
 0x157   : > { %2458 = vmatmul.mubr.bf16.gmra.mxu1 %v1213_v1 }
 0x158   : > { %2461 = vmatprep.mubr.bf16.mxu1 %v1214_v40 }
 0x15f   : > { %2462 = vmatmul.mubr.bf16.gmra.mxu1 %v1215_v14 }
 0x160   : > { %2465 = vmatprep.mubr.bf16.mxu1 %v1216_v17 }
 0x167   : > { %2466 = vmatmul.mubr.bf16.gmra.mxu1 %v1217_v13 }
 0x168   : > { %2469 = vmatprep.mubr.bf16.mxu1 %v1218_v27 }
 0x16f   : > { %2470 = vmatmul.mubr.bf16.gmra.mxu1 %v1219_v4 }
 0x170   : > { %2473 = vmatprep.mubr.bf16.mxu1 %v1220_v33 }
 0x177   : > { %2474 = vmatmul.mubr.bf16.gmra.mxu1 %v1221_v51 }
 0x178   : > { %2477 = vmatprep.mubr.bf16.mxu1 %v1222_v49 }
 0x17f   : > { %2478 = vmatmul.mubr.bf16.gmra.mxu1 %v1223_v63 }
 0x1c5   : > { %v2419_v7 = vpop.f32.mrf.mxu1 }
 0x1c6   : > { %v1338_v58 = vadd.f32 %v2419_v7, %v3281_v38 }
 0x1c7   : > { %v1329_v29 = vpop.f32.mrf.mxu1 }
 0x1c8   : > { %v1330_v59 = vadd.f32 %v3281_v38, %v1329_v29  ;;  %v1586_v57 = vmax.f32 %v1338_v58, 0.0 }
 0x1c9   : > { %v2420_v56 = vpop.f32.mrf.mxu1 }
 0x1ca   : > { %v1341_v10 = vadd.f32 %v2420_v56, %v3281_v38  ;;  %v1584_v40 = vmax.f32 %v1330_v59, 0.0 }
 0x1cb   : > { %v1332_v61 = vpop.f32.mrf.mxu1 }
 0x1cc   : > { %v1333_v21 = vadd.f32 %v3281_v38, %v1332_v61  ;;  %v1587_v62 = vmax.f32 %v1341_v10, 0.0 }
 0x1cd   : > { %v2423_v0 = vpop.f32.mrf.mxu1 }
 0x1ce   : > { %v1585_v48 = vmax.f32 %v1333_v21, 0.0  ;;  %v1649_v3 = vpack.c.bf16 %v1587_v62, %v1586_v57  ;;  %v1354_v12 = vadd.f32 %v2423_v0, %v3281_v38 }
 0x1cf   : > { %v1345_v1 = vpop.f32.mrf.mxu1 }
 0x1d0   : > { %v1648_v2 = vpack.c.bf16 %v1585_v48, %v1584_v40  ;;  %v1346_v6 = vadd.f32 %v3281_v38, %v1345_v1  ;;  %v1590_v9 = vmax.f32 %v1354_v12, 0.0 }
 0x1d1   : > { %v2424_v5 = vpop.f32.mrf.mxu1 }
 0x1d2   : > { %v1357_v11 = vadd.f32 %v2424_v5, %v3281_v38  ;;  %2497 = vmatprep.mubr.bf16.mxu0 %v1648_v2  ;;  %v1588_v18 = vmax.f32 %v1346_v6, 0.0 }
 0x1d3   : > { %v1348_v15 = vpop.f32.mrf.mxu1  ;;  %2498 = vmatmul.mubr.bf16.vlgmr.msra.gmra.mxu0 %v1649_v3 }
 0x1d4   : > { %v1349_v16 = vadd.f32 %v3281_v38, %v1348_v15  ;;  %v1591_v17 = vmax.f32 %v1357_v11, 0.0 }
 0x1d6   : > { %v1589_v14 = vmax.f32 %v1349_v16, 0.0  ;;  %v1651_v22 = vpack.c.bf16 %v1591_v17, %v1590_v9 }
 0x1d7   : > { %v2427_v60 = vpop.f32.mrf.mxu1 }
 0x1d8   : > { %v1650_v20 = vpack.c.bf16 %v1589_v14, %v1588_v18  ;;  %v1370_v26 = vadd.f32 %v2427_v60, %v3281_v38 }
 0x1d9   : > { %v1361_v31 = vpop.f32.mrf.mxu1 }
 0x1da   : > { %v1362_v23 = vadd.f32 %v3281_v38, %v1361_v31  ;;  %2501 = vmatprep.mubr.bf16.mxu0 %v1650_v20  ;;  %v1594_v8 = vmax.f32 %v1370_v26, 0.0 }
 0x1db   : > { %v2428_v24 = vpop.f32.mrf.mxu1  ;;  %2502 = vmatmul.mubr.bf16.gmra.mxu0 %v1651_v22 }
 0x1dc   : > { %v1373_v25 = vadd.f32 %v2428_v24, %v3281_v38  ;;  %v1592_v50 = vmax.f32 %v1362_v23, 0.0 }
 0x1dd   : > { %v1364_v27 = vpop.f32.mrf.mxu1 }
 0x1de   : > { %v1365_v28 = vadd.f32 %v3281_v38, %v1364_v27  ;;  %v1595_v30 = vmax.f32 %v1373_v25, 0.0 }
 0x1df   : > { %v2431_v13 = vpop.f32.mrf.mxu1 }
 0x1e0   : > { %v1593_v32 = vmax.f32 %v1365_v28, 0.0  ;;  %v1653_v37 = vpack.c.bf16 %v1595_v30, %v1594_v8  ;;  %v1386_v42 = vadd.f32 %v2431_v13, %v3281_v38 }
 0x1e1   : > { %v1377_v34 = vpop.f32.mrf.mxu1 }
 0x1e2   : > { %v1652_v36 = vpack.c.bf16 %v1593_v32, %v1592_v50  ;;  %v1378_v41 = vadd.f32 %v3281_v38, %v1377_v34  ;;  %v1598_v46 = vmax.f32 %v1386_v42, 0.0 }
 0x1e3   : > { %v2432_v39 = vpop.f32.mrf.mxu1 }
 0x1e4   : > { %v1389_v33 = vadd.f32 %v2432_v39, %v3281_v38  ;;  %2505 = vmatprep.mubr.bf16.mxu0 %v1652_v36  ;;  %v1596_v19 = vmax.f32 %v1378_v41, 0.0 }
 0x1e5   : > { %v1380_v43 = vpop.f32.mrf.mxu1  ;;  %2506 = vmatmul.mubr.bf16.gmra.mxu0 %v1653_v37 }
 0x1e6   : > { %v1381_v4 = vadd.f32 %v3281_v38, %v1380_v43  ;;  %v1599_v44 = vmax.f32 %v1389_v33, 0.0 }
 0x1e7   : > { %v2435_v35 = vpop.f32.mrf.mxu1 }
 0x1e8   : > { %v1597_v45 = vmax.f32 %v1381_v4, 0.0  ;;  %v1655_v51 = vpack.c.bf16 %v1599_v44, %v1598_v46  ;;  %v1402_v53 = vadd.f32 %v2435_v35, %v3281_v38 }
 0x1e9   : > { %v1393_v47 = vpop.f32.mrf.mxu1 }
 0x1ea   : > { %v1654_v49 = vpack.c.bf16 %v1597_v45, %v1596_v19  ;;  %v1394_v54 = vadd.f32 %v3281_v38, %v1393_v47  ;;  %v1602_v58 = vmax.f32 %v1402_v53, 0.0 }
 0x1eb   : > { %v2436_v52 = vpop.f32.mrf.mxu1 }
 0x1ec   : > { %v1405_v55 = vadd.f32 %v2436_v52, %v3281_v38  ;;  %2509 = vmatprep.mubr.bf16.mxu0 %v1654_v49  ;;  %v1600_v59 = vmax.f32 %v1394_v54, 0.0 }
 0x1ed   : > { %v1396_v63 = vpop.f32.mrf.mxu1  ;;  %2510 = vmatmul.mubr.bf16.gmra.mxu0 %v1655_v51 }
 0x1ee   : > { %v1397_v7 = vadd.f32 %v3281_v38, %v1396_v63  ;;  %v1603_v29 = vmax.f32 %v1405_v55, 0.0 }
 0x1ef   : > { %v2439_v56 = vpop.f32.mrf.mxu1 }
 0x1f0   : > { %v1601_v10 = vmax.f32 %v1397_v7, 0.0  ;;  %v1657_v62 = vpack.c.bf16 %v1603_v29, %v1602_v58  ;;  %v1418_v57 = vadd.f32 %v2439_v56, %v3281_v38 }
 0x1f1   : > { %v1409_v61 = vpop.f32.mrf.mxu1 }
 0x1f2   : > { %v1656_v21 = vpack.c.bf16 %v1601_v10, %v1600_v59  ;;  %v1410_v40 = vadd.f32 %v3281_v38, %v1409_v61  ;;  %v1606_v12 = vmax.f32 %v1418_v57, 0.0 }
 0x1f3   : > { %v2440_v0 = vpop.f32.mrf.mxu1 }
 0x1f4   : > { %v1421_v48 = vadd.f32 %v2440_v0, %v3281_v38  ;;  %2513 = vmatprep.mubr.bf16.mxu0 %v1656_v21  ;;  %v1604_v6 = vmax.f32 %v1410_v40, 0.0 }
 0x1f5   : > { %v1412_v1 = vpop.f32.mrf.mxu1  ;;  %2514 = vmatmul.mubr.bf16.gmra.mxu0 %v1657_v62 }
 0x1f6   : > { %v1413_v2 = vadd.f32 %v3281_v38, %v1412_v1  ;;  %v1607_v3 = vmax.f32 %v1421_v48, 0.0 }
 0x1f7   : > { %v2443_v5 = vpop.f32.mrf.mxu1 }
 0x1f8   : > { %v1605_v11 = vmax.f32 %v1413_v2, 0.0  ;;  %v1659_v17 = vpack.c.bf16 %v1607_v3, %v1606_v12  ;;  %v1434_v9 = vadd.f32 %v2443_v5, %v3281_v38 }
 0x1f9   : > { %v1425_v15 = vpop.f32.mrf.mxu1 }
 0x1fa   : > { %v1658_v16 = vpack.c.bf16 %v1605_v11, %v1604_v6  ;;  %v1426_v18 = vadd.f32 %v3281_v38, %v1425_v15  ;;  %v1610_v26 = vmax.f32 %v1434_v9, 0.0 }
 0x1fb   : > { %v2444_v60 = vpop.f32.mrf.mxu1 }
 0x1fc   : > { %v1437_v14 = vadd.f32 %v2444_v60, %v3281_v38  ;;  %2517 = vmatprep.mubr.bf16.mxu0 %v1658_v16  ;;  %v1608_v23 = vmax.f32 %v1426_v18, 0.0 }
 0x1fd   : > { %v1428_v31 = vpop.f32.mrf.mxu1  ;;  %2518 = vmatmul.mubr.bf16.gmra.mxu0 %v1659_v17 }
 0x1fe   : > { %v1429_v20 = vadd.f32 %v3281_v38, %v1428_v31  ;;  %v1611_v22 = vmax.f32 %v1437_v14, 0.0 }
 0x1ff   : > { %v2447_v24 = vpop.f32.mrf.mxu1 }
 0x200   : > { %v1609_v25 = vmax.f32 %v1429_v20, 0.0  ;;  %v1661_v30 = vpack.c.bf16 %v1611_v22, %v1610_v26  ;;  %v1450_v8 = vadd.f32 %v2447_v24, %v3281_v38 }
 0x201   : > { %v1441_v27 = vpop.f32.mrf.mxu1 }
 0x202   : > { %v1660_v28 = vpack.c.bf16 %v1609_v25, %v1608_v23  ;;  %v1442_v50 = vadd.f32 %v3281_v38, %v1441_v27  ;;  %v1614_v42 = vmax.f32 %v1450_v8, 0.0 }
 0x203   : > { %v2448_v13 = vpop.f32.mrf.mxu1 }
 0x204   : > { %v1453_v32 = vadd.f32 %v2448_v13, %v3281_v38  ;;  %2521 = vmatprep.mubr.bf16.mxu0 %v1660_v28  ;;  %v1612_v41 = vmax.f32 %v1442_v50, 0.0 }
 0x205   : > { %v1444_v34 = vpop.f32.mrf.mxu1  ;;  %2522 = vmatmul.mubr.bf16.gmra.mxu0 %v1661_v30 }
 0x206   : > { %v1445_v36 = vadd.f32 %v3281_v38, %v1444_v34  ;;  %v1615_v37 = vmax.f32 %v1453_v32, 0.0 }
 0x207   : > { %v2451_v39 = vpop.f32.mrf.mxu1 }
 0x208   : > { %v1613_v33 = vmax.f32 %v1445_v36, 0.0  ;;  %v1663_v44 = vpack.c.bf16 %v1615_v37, %v1614_v42  ;;  %v1466_v46 = vadd.f32 %v2451_v39, %v3281_v38 }
 0x209   : > { %v1457_v43 = vpop.f32.mrf.mxu1 }
 0x20a   : > { %v1662_v4 = vpack.c.bf16 %v1613_v33, %v1612_v41  ;;  %v1458_v19 = vadd.f32 %v3281_v38, %v1457_v43  ;;  %v1618_v53 = vmax.f32 %v1466_v46, 0.0 }
 0x20b   : > { %v2452_v35 = vpop.f32.mrf.mxu1 }
 0x20c   : > { %v1469_v45 = vadd.f32 %v2452_v35, %v3281_v38  ;;  %2525 = vmatprep.mubr.bf16.mxu0 %v1662_v4  ;;  %v1616_v54 = vmax.f32 %v1458_v19, 0.0 }
 0x20d   : > { %v1460_v47 = vpop.f32.mrf.mxu1  ;;  %2526 = vmatmul.mubr.bf16.gmra.mxu0 %v1663_v44 }
 0x20e   : > { %v1461_v49 = vadd.f32 %v3281_v38, %v1460_v47  ;;  %v1619_v51 = vmax.f32 %v1469_v45, 0.0 }
 0x20f   : > { %v2455_v52 = vpop.f32.mrf.mxu1 }
 0x210   : > { %v1617_v55 = vmax.f32 %v1461_v49, 0.0  ;;  %v1665_v29 = vpack.c.bf16 %v1619_v51, %v1618_v53  ;;  %v1482_v58 = vadd.f32 %v2455_v52, %v3281_v38 }
 0x211   : > { %v1473_v63 = vpop.f32.mrf.mxu1 }
 0x212   : > { %v1664_v7 = vpack.c.bf16 %v1617_v55, %v1616_v54  ;;  %v1474_v59 = vadd.f32 %v3281_v38, %v1473_v63  ;;  %v1622_v57 = vmax.f32 %v1482_v58, 0.0 }
 0x213   : > { %v2456_v56 = vpop.f32.mrf.mxu1 }
 0x214   : > { %v1485_v10 = vadd.f32 %v2456_v56, %v3281_v38  ;;  %2529 = vmatprep.mubr.bf16.mxu0 %v1664_v7  ;;  %v1620_v40 = vmax.f32 %v1474_v59, 0.0 }
 0x215   : > { %v1476_v61 = vpop.f32.mrf.mxu1  ;;  %2530 = vmatmul.mubr.bf16.gmra.mxu0 %v1665_v29 }
 0x216   : > { %v1477_v21 = vadd.f32 %v3281_v38, %v1476_v61  ;;  %v1623_v62 = vmax.f32 %v1485_v10, 0.0 }
 0x217   : > { %v2459_v0 = vpop.f32.mrf.mxu1 }
 0x218   : > { %v1621_v48 = vmax.f32 %v1477_v21, 0.0  ;;  %v1667_v3 = vpack.c.bf16 %v1623_v62, %v1622_v57  ;;  %v1498_v12 = vadd.f32 %v2459_v0, %v3281_v38 }
 0x219   : > { %v1489_v1 = vpop.f32.mrf.mxu1 }
 0x21a   : > { %v1666_v2 = vpack.c.bf16 %v1621_v48, %v1620_v40  ;;  %v1490_v6 = vadd.f32 %v3281_v38, %v1489_v1  ;;  %v1626_v9 = vmax.f32 %v1498_v12, 0.0 }
 0x21b   : > { %v2460_v5 = vpop.f32.mrf.mxu1 }
 0x21c   : > { %v1501_v11 = vadd.f32 %v2460_v5, %v3281_v38  ;;  %2533 = vmatprep.mubr.bf16.mxu0 %v1666_v2  ;;  %v1624_v18 = vmax.f32 %v1490_v6, 0.0 }
 0x21d   : > { %v1492_v15 = vpop.f32.mrf.mxu1  ;;  %2534 = vmatmul.mubr.bf16.gmra.mxu0 %v1667_v3 }
 0x21e   : > { %v1493_v16 = vadd.f32 %v3281_v38, %v1492_v15  ;;  %v1627_v17 = vmax.f32 %v1501_v11, 0.0 }
 0x21f   : > { %v2463_v60 = vpop.f32.mrf.mxu1 }
 0x220   : > { %v1625_v14 = vmax.f32 %v1493_v16, 0.0  ;;  %v1669_v22 = vpack.c.bf16 %v1627_v17, %v1626_v9  ;;  %v1514_v26 = vadd.f32 %v2463_v60, %v3281_v38 }
 0x221   : > { %v1505_v31 = vpop.f32.mrf.mxu1 }
 0x222   : > { %v1668_v20 = vpack.c.bf16 %v1625_v14, %v1624_v18  ;;  %v1506_v23 = vadd.f32 %v3281_v38, %v1505_v31  ;;  %v1630_v8 = vmax.f32 %v1514_v26, 0.0 }
 0x223   : > { %v2464_v24 = vpop.f32.mrf.mxu1 }
 0x224   : > { %v1517_v25 = vadd.f32 %v2464_v24, %v3281_v38  ;;  %2537 = vmatprep.mubr.bf16.mxu0 %v1668_v20  ;;  %v1628_v50 = vmax.f32 %v1506_v23, 0.0 }
 0x225   : > { %v1508_v27 = vpop.f32.mrf.mxu1  ;;  %2538 = vmatmul.mubr.bf16.gmra.mxu0 %v1669_v22 }
 0x226   : > { %v1509_v28 = vadd.f32 %v3281_v38, %v1508_v27  ;;  %v1631_v30 = vmax.f32 %v1517_v25, 0.0 }
 0x227   : > { %v2467_v13 = vpop.f32.mrf.mxu1 }
 0x228   : > { %v1629_v32 = vmax.f32 %v1509_v28, 0.0  ;;  %v1671_v37 = vpack.c.bf16 %v1631_v30, %v1630_v8  ;;  %v1530_v42 = vadd.f32 %v2467_v13, %v3281_v38  ;;  %v3350_v28 = vld [vmem:[%s3562_s8] ss:$0 sm:$0xff] }
 0x229   : > { %v1521_v34 = vpop.f32.mrf.mxu1 }
 0x22a   : > { %v1670_v36 = vpack.c.bf16 %v1629_v32, %v1628_v50  ;;  %v1522_v41 = vadd.f32 %v3281_v38, %v1521_v34  ;;  %v1634_v46 = vmax.f32 %v1530_v42, 0.0 }
 0x22b   : > { %v2468_v39 = vpop.f32.mrf.mxu1 }
 0x22c   : > { %v1533_v33 = vadd.f32 %v2468_v39, %v3281_v38  ;;  %2541 = vmatprep.mubr.bf16.mxu0 %v1670_v36  ;;  %v1632_v19 = vmax.f32 %v1522_v41, 0.0 }
 0x22d   : > { %v1524_v43 = vpop.f32.mrf.mxu1  ;;  %2542 = vmatmul.mubr.bf16.gmra.mxu0 %v1671_v37 }
 0x22e   : > { %v1525_v4 = vadd.f32 %v3281_v38, %v1524_v43  ;;  %v1635_v44 = vmax.f32 %v1533_v33, 0.0 }
 0x22f   : > { %v2471_v35 = vpop.f32.mrf.mxu1 }
 0x230   : > { %v1633_v45 = vmax.f32 %v1525_v4, 0.0  ;;  %v1673_v51 = vpack.c.bf16 %v1635_v44, %v1634_v46  ;;  %v1546_v53 = vadd.f32 %v2471_v35, %v3281_v38 }
 0x231   : > { %v1537_v47 = vpop.f32.mrf.mxu1 }
 0x232   : > { %v1672_v49 = vpack.c.bf16 %v1633_v45, %v1632_v19  ;;  %v1538_v54 = vadd.f32 %v3281_v38, %v1537_v47  ;;  %v1638_v58 = vmax.f32 %v1546_v53, 0.0 }
 0x233   : > { %v2472_v52 = vpop.f32.mrf.mxu1 }
 0x234   : > { %v1549_v55 = vadd.f32 %v2472_v52, %v3281_v38  ;;  %2545 = vmatprep.mubr.bf16.mxu0 %v1672_v49  ;;  %v1636_v59 = vmax.f32 %v1538_v54, 0.0 }
 0x235   : > { %v1540_v63 = vpop.f32.mrf.mxu1  ;;  %2546 = vmatmul.mubr.bf16.gmra.mxu0 %v1673_v51 }
 0x236   : > { %v1541_v7 = vadd.f32 %v3281_v38, %v1540_v63  ;;  %v1639_v29 = vmax.f32 %v1549_v55, 0.0 }
 0x237   : > { %v2475_v56 = vpop.f32.mrf.mxu1 }
 0x238   : > { %v1637_v10 = vmax.f32 %v1541_v7, 0.0  ;;  %v1675_v62 = vpack.c.bf16 %v1639_v29, %v1638_v58  ;;  %v1562_v57 = vadd.f32 %v2475_v56, %v3281_v38 }
 0x239   : > { %v1553_v61 = vpop.f32.mrf.mxu1 }
 0x23a   : > { %v1674_v21 = vpack.c.bf16 %v1637_v10, %v1636_v59  ;;  %v1554_v40 = vadd.f32 %v3281_v38, %v1553_v61  ;;  %v1642_v12 = vmax.f32 %v1562_v57, 0.0 }
 0x23b   : > { %v2476_v0 = vpop.f32.mrf.mxu1 }
 0x23c   : > { %v1565_v48 = vadd.f32 %v2476_v0, %v3281_v38  ;;  %2549 = vmatprep.mubr.bf16.mxu0 %v1674_v21  ;;  %v1640_v6 = vmax.f32 %v1554_v40, 0.0 }
 0x23d   : > { %v1556_v1 = vpop.f32.mrf.mxu1  ;;  %2550 = vmatmul.mubr.bf16.gmra.mxu0 %v1675_v62 }
 0x23e   : > { %v1557_v2 = vadd.f32 %v3281_v38, %v1556_v1  ;;  %v1643_v3 = vmax.f32 %v1565_v48, 0.0 }
 0x23f   : > { %v2479_v5 = vpop.f32.mrf.mxu1 }
 0x240   : > { %v1641_v11 = vmax.f32 %v1557_v2, 0.0  ;;  %v1677_v17 = vpack.c.bf16 %v1643_v3, %v1642_v12  ;;  %v1578_v9 = vadd.f32 %v2479_v5, %v3281_v38 }
 0x241   : > { %v1569_v15 = vpop.f32.mrf.mxu1 }
 0x242   : > { %v1676_v16 = vpack.c.bf16 %v1641_v11, %v1640_v6  ;;  %v1570_v18 = vadd.f32 %v3281_v38, %v1569_v15  ;;  %v1646_v25 = vmax.f32 %v1578_v9, 0.0 }
 0x243   : > { %v2480_v60 = vpop.f32.mrf.mxu1 }
 0x244   : > { %v1581_v14 = vadd.f32 %v2480_v60, %v3281_v38  ;;  %2553 = vmatprep.mubr.bf16.mxu0 %v1676_v16  ;;  %v1644_v24 = vmax.f32 %v1570_v18, 0.0 }
 0x245   : > { %v1572_v31 = vpop.f32.mrf.mxu1  ;;  %2554 = vmatmul.mubr.bf16.gmra.mxu0 %v1677_v17 }
 0x246   : > { %v1573_v20 = vadd.f32 %v3281_v38, %v1572_v31  ;;  %v1647_v22 = vmax.f32 %v1581_v14, 0.0 }
 0x248   : > { %v1645_v23 = vmax.f32 %v1573_v20, 0.0  ;;  %v1679_v27 = vpack.c.bf16 %v1647_v22, %v1646_v25 }
 0x24a   : > { %v1678_v26 = vpack.c.bf16 %v1645_v23, %v1644_v24 }
 0x24c   : > { %2557 = vmatprep.mubr.bf16.mxu0 %v1678_v26 }
 0x24d   : > { %2558 = vmatmul.mubr.bf16.gmra.mxu0 %v1679_v27 }
 0x293   : > { %v2499_v38 = vpop.f32.mrf.mxu0 }
 0x294   : > { %v1794_v30 = vadd.f32 %v2499_v38, %v3350_v28 }
 0x295   : > { %v1785_v13 = vpop.f32.mrf.mxu0 }
 0x296   : > { %2043 = vst.msk [vmem:[%s3357_s22 + $0x10] sm:$0xff] %vm2040_vm1, %v1794_v30  ;;  %v1786_v50 = vadd.f32 %v3350_v28, %v1785_v13 }
 0x297   : > { %v2500_v32 = vpop.f32.mrf.mxu0 }
 0x298   : > { %2041 = vst.msk [vmem:[%s3357_s22] sm:$0xff] %vm2040_vm1, %v1786_v50  ;;  %v1797_v8 = vadd.f32 %v2500_v32, %v3350_v28 }
 0x299   : > { %v1788_v34 = vpop.f32.mrf.mxu0 }
 0x29a   : > { %2044 = vst.msk [vmem:[%s3357_s22 + $0x18] sm:$0xff] %vm2040_vm1, %v1797_v8  ;;  %v1789_v36 = vadd.f32 %v3350_v28, %v1788_v34 }
 0x29b   : > { %v2503_v37 = vpop.f32.mrf.mxu0 }
 0x29c   : > { %2042 = vst.msk [vmem:[%s3357_s22 + $0x8] sm:$0xff] %vm2040_vm1, %v1789_v36  ;;  %v1810_v39 = vadd.f32 %v2503_v37, %v3350_v28 }
 0x29d   : > { %v1801_v41 = vpop.f32.mrf.mxu0 }
 0x29e   : > { %2047 = vst.msk [vmem:[%s3357_s22 + $0x30] sm:$0xff] %vm2040_vm1, %v1810_v39  ;;  %v1802_v33 = vadd.f32 %v3350_v28, %v1801_v41 }
 0x29f   : > { %v2504_v42 = vpop.f32.mrf.mxu0 }
 0x2a0   : > { %2045 = vst.msk [vmem:[%s3357_s22 + $0x20] sm:$0xff] %vm2040_vm1, %v1802_v33  ;;  %v1813_v43 = vadd.f32 %v2504_v42, %v3350_v28 }
 0x2a1   : > { %v1804_v4 = vpop.f32.mrf.mxu0 }
 0x2a2   : > { %2048 = vst.msk [vmem:[%s3357_s22 + $0x38] sm:$0xff] %vm2040_vm1, %v1813_v43  ;;  %v1805_v44 = vadd.f32 %v3350_v28, %v1804_v4 }
 0x2a4   : > { %2046 = vst.msk [vmem:[%s3357_s22 + $0x28] sm:$0xff] %vm2040_vm1, %v1805_v44 }
 0x2a5   : > { %v2507_v35 = vpop.f32.mrf.mxu0 }
 0x2a6   : > { %v1826_v19 = vadd.f32 %v2507_v35, %v3350_v28 }
 0x2a7   : > { %v1817_v45 = vpop.f32.mrf.mxu0 }
 0x2a8   : > { %2051 = vst.msk [vmem:[%s3357_s22 + $0x50] sm:$0xff] %vm2040_vm1, %v1826_v19  ;;  %v1818_v46 = vadd.f32 %v3350_v28, %v1817_v45 }
 0x2a9   : > { %v2508_v47 = vpop.f32.mrf.mxu0 }
 0x2aa   : > { %2049 = vst.msk [vmem:[%s3357_s22 + $0x40] sm:$0xff] %vm2040_vm1, %v1818_v46  ;;  %v1829_v49 = vadd.f32 %v2508_v47, %v3350_v28 }
 0x2ab   : > { %v1820_v51 = vpop.f32.mrf.mxu0 }
 0x2ac   : > { %2052 = vst.msk [vmem:[%s3357_s22 + $0x58] sm:$0xff] %vm2040_vm1, %v1829_v49  ;;  %v1821_v52 = vadd.f32 %v3350_v28, %v1820_v51 }
 0x2ad   : > { %v2511_v54 = vpop.f32.mrf.mxu0 }
 0x2ae   : > { %2050 = vst.msk [vmem:[%s3357_s22 + $0x48] sm:$0xff] %vm2040_vm1, %v1821_v52  ;;  %v1842_v55 = vadd.f32 %v2511_v54, %v3350_v28 }
 0x2af   : > { %v1833_v53 = vpop.f32.mrf.mxu0 }
 0x2b0   : > { %2055 = vst.msk [vmem:[%s3357_s22 + $0x70] sm:$0xff] %vm2040_vm1, %v1842_v55  ;;  %v1834_v63 = vadd.f32 %v3350_v28, %v1833_v53 }
 0x2b1   : > { %v2512_v7 = vpop.f32.mrf.mxu0 }
 0x2b2   : > { %2053 = vst.msk [vmem:[%s3357_s22 + $0x60] sm:$0xff] %vm2040_vm1, %v1834_v63  ;;  %v1845_v29 = vadd.f32 %v2512_v7, %v3350_v28 }
 0x2b3   : > { %v1836_v56 = vpop.f32.mrf.mxu0 }
 0x2b4   : > { %2056 = vst.msk [vmem:[%s3357_s22 + $0x78] sm:$0xff] %vm2040_vm1, %v1845_v29  ;;  %v1837_v59 = vadd.f32 %v3350_v28, %v1836_v56 }
 0x2b5   : > { %v2515_v10 = vpop.f32.mrf.mxu0 }
 0x2b6   : > { %2054 = vst.msk [vmem:[%s3357_s22 + $0x68] sm:$0xff] %vm2040_vm1, %v1837_v59  ;;  %v1858_v58 = vadd.f32 %v2515_v10, %v3350_v28 }
 0x2b7   : > { %v1849_v61 = vpop.f32.mrf.mxu0 }
 0x2b8   : > { %2059 = vst.msk [vmem:[%s3357_s22 + $0x90] sm:$0xff] %vm2040_vm1, %v1858_v58  ;;  %v1850_v21 = vadd.f32 %v3350_v28, %v1849_v61 }
 0x2b9   : > { %v2516_v62 = vpop.f32.mrf.mxu0 }
 0x2ba   : > { %2057 = vst.msk [vmem:[%s3357_s22 + $0x80] sm:$0xff] %vm2040_vm1, %v1850_v21  ;;  %v1861_v0 = vadd.f32 %v2516_v62, %v3350_v28 }
 0x2bb   : > { %v1852_v40 = vpop.f32.mrf.mxu0 }
 0x2bc   : > { %2060 = vst.msk [vmem:[%s3357_s22 + $0x98] sm:$0xff] %vm2040_vm1, %v1861_v0  ;;  %v1853_v48 = vadd.f32 %v3350_v28, %v1852_v40 }
 0x2bd   : > { %v2519_v57 = vpop.f32.mrf.mxu0 }
 0x2be   : > { %2058 = vst.msk [vmem:[%s3357_s22 + $0x88] sm:$0xff] %vm2040_vm1, %v1853_v48  ;;  %v1874_v1 = vadd.f32 %v2519_v57, %v3350_v28 }
 0x2bf   : > { %v1865_v2 = vpop.f32.mrf.mxu0 }
 0x2c0   : > { %2063 = vst.msk [vmem:[%s3357_s22 + $0xb0] sm:$0xff] %vm2040_vm1, %v1874_v1  ;;  %v1866_v3 = vadd.f32 %v3350_v28, %v1865_v2 }
 0x2c1   : > { %v2520_v5 = vpop.f32.mrf.mxu0 }
 0x2c2   : > { %2061 = vst.msk [vmem:[%s3357_s22 + $0xa0] sm:$0xff] %vm2040_vm1, %v1866_v3  ;;  %v1877_v6 = vadd.f32 %v2520_v5, %v3350_v28 }
 0x2c3   : > { %v1868_v11 = vpop.f32.mrf.mxu0 }
 0x2c4   : > { %2064 = vst.msk [vmem:[%s3357_s22 + $0xb8] sm:$0xff] %vm2040_vm1, %v1877_v6  ;;  %v1869_v12 = vadd.f32 %v3350_v28, %v1868_v11 }
 0x2c5   : > { %v2523_v15 = vpop.f32.mrf.mxu0 }
 0x2c6   : > { %2062 = vst.msk [vmem:[%s3357_s22 + $0xa8] sm:$0xff] %vm2040_vm1, %v1869_v12  ;;  %v1890_v16 = vadd.f32 %v2523_v15, %v3350_v28 }
 0x2c7   : > { %v1881_v17 = vpop.f32.mrf.mxu0 }
 0x2c8   : > { %2067 = vst.msk [vmem:[%s3357_s22 + $0xd0] sm:$0xff] %vm2040_vm1, %v1890_v16  ;;  %v1882_v60 = vadd.f32 %v3350_v28, %v1881_v17 }
 0x2c9   : > { %v2524_v18 = vpop.f32.mrf.mxu0 }
 0x2ca   : > { %2065 = vst.msk [vmem:[%s3357_s22 + $0xc0] sm:$0xff] %vm2040_vm1, %v1882_v60  ;;  %v1893_v14 = vadd.f32 %v2524_v18, %v3350_v28 }
 0x2cb   : > { %v1884_v9 = vpop.f32.mrf.mxu0 }
 0x2cc   : > { %2068 = vst.msk [vmem:[%s3357_s22 + $0xd8] sm:$0xff] %vm2040_vm1, %v1893_v14  ;;  %v1885_v31 = vadd.f32 %v3350_v28, %v1884_v9 }
 0x2cd   : > { %v2527_v20 = vpop.f32.mrf.mxu0 }
 0x2ce   : > { %2066 = vst.msk [vmem:[%s3357_s22 + $0xc8] sm:$0xff] %vm2040_vm1, %v1885_v31  ;;  %v1906_v22 = vadd.f32 %v2527_v20, %v3350_v28 }
 0x2cf   : > { %v1897_v24 = vpop.f32.mrf.mxu0 }
 0x2d0   : > { %2071 = vst.msk [vmem:[%s3357_s22 + $0xf0] sm:$0xff] %vm2040_vm1, %v1906_v22  ;;  %v1898_v23 = vadd.f32 %v3350_v28, %v1897_v24 }
 0x2d1   : > { %v2528_v25 = vpop.f32.mrf.mxu0 }
 0x2d2   : > { %2069 = vst.msk [vmem:[%s3357_s22 + $0xe0] sm:$0xff] %vm2040_vm1, %v1898_v23  ;;  %v1909_v26 = vadd.f32 %v2528_v25, %v3350_v28 }
 0x2d3   : > { %v1900_v27 = vpop.f32.mrf.mxu0 }
 0x2d4   : > { %2072 = vst.msk [vmem:[%s3357_s22 + $0xf8] sm:$0xff] %vm2040_vm1, %v1909_v26  ;;  %v1901_v38 = vadd.f32 %v3350_v28, %v1900_v27 }
 0x2d5   : > { %v2531_v30 = vpop.f32.mrf.mxu0 }
 0x2d6   : > { %2070 = vst.msk [vmem:[%s3357_s22 + $0xe8] sm:$0xff] %vm2040_vm1, %v1901_v38  ;;  %v1922_v13 = vadd.f32 %v2531_v30, %v3350_v28 }
 0x2d7   : > { %v1913_v50 = vpop.f32.mrf.mxu0 }
 0x2d8   : > { %2075 = vst.msk [vmem:[%s3357_s22 + $0x110] sm:$0xff] %vm2040_vm1, %v1922_v13  ;;  %v1914_v32 = vadd.f32 %v3350_v28, %v1913_v50 }
 0x2d9   : > { %v2532_v8 = vpop.f32.mrf.mxu0 }
 0x2da   : > { %2073 = vst.msk [vmem:[%s3357_s22 + $0x100] sm:$0xff] %vm2040_vm1, %v1914_v32  ;;  %v1925_v34 = vadd.f32 %v2532_v8, %v3350_v28 }
 0x2db   : > { %v1916_v36 = vpop.f32.mrf.mxu0 }
 0x2dc   : > { %2076 = vst.msk [vmem:[%s3357_s22 + $0x118] sm:$0xff] %vm2040_vm1, %v1925_v34  ;;  %v1917_v37 = vadd.f32 %v3350_v28, %v1916_v36 }
 0x2dd   : > { %v2535_v39 = vpop.f32.mrf.mxu0 }
 0x2de   : > { %2074 = vst.msk [vmem:[%s3357_s22 + $0x108] sm:$0xff] %vm2040_vm1, %v1917_v37  ;;  %v1938_v41 = vadd.f32 %v2535_v39, %v3350_v28 }
 0x2df   : > { %v1929_v33 = vpop.f32.mrf.mxu0 }
 0x2e0   : > { %2079 = vst.msk [vmem:[%s3357_s22 + $0x130] sm:$0xff] %vm2040_vm1, %v1938_v41  ;;  %v1930_v42 = vadd.f32 %v3350_v28, %v1929_v33 }
 0x2e1   : > { %v2536_v43 = vpop.f32.mrf.mxu0 }
 0x2e2   : > { %2077 = vst.msk [vmem:[%s3357_s22 + $0x120] sm:$0xff] %vm2040_vm1, %v1930_v42  ;;  %v1941_v4 = vadd.f32 %v2536_v43, %v3350_v28 }
 0x2e3   : > { %v1932_v44 = vpop.f32.mrf.mxu0 }
 0x2e4   : > { %2080 = vst.msk [vmem:[%s3357_s22 + $0x138] sm:$0xff] %vm2040_vm1, %v1941_v4  ;;  %v1933_v35 = vadd.f32 %v3350_v28, %v1932_v44 }
 0x2e5   : > { %v2539_v19 = vpop.f32.mrf.mxu0 }
 0x2e6   : > { %2078 = vst.msk [vmem:[%s3357_s22 + $0x128] sm:$0xff] %vm2040_vm1, %v1933_v35  ;;  %v1954_v45 = vadd.f32 %v2539_v19, %v3350_v28 }
 0x2e7   : > { %v1945_v46 = vpop.f32.mrf.mxu0 }
 0x2e8   : > { %2083 = vst.msk [vmem:[%s3357_s22 + $0x150] sm:$0xff] %vm2040_vm1, %v1954_v45  ;;  %v1946_v47 = vadd.f32 %v3350_v28, %v1945_v46 }
 0x2e9   : > { %v2540_v49 = vpop.f32.mrf.mxu0 }
 0x2ea   : > { %2081 = vst.msk [vmem:[%s3357_s22 + $0x140] sm:$0xff] %vm2040_vm1, %v1946_v47  ;;  %v1957_v51 = vadd.f32 %v2540_v49, %v3350_v28 }
 0x2eb   : > { %v1948_v52 = vpop.f32.mrf.mxu0 }
 0x2ec   : > { %2084 = vst.msk [vmem:[%s3357_s22 + $0x158] sm:$0xff] %vm2040_vm1, %v1957_v51  ;;  %v1949_v54 = vadd.f32 %v3350_v28, %v1948_v52 }
 0x2ed   : > { %v2543_v55 = vpop.f32.mrf.mxu0 }
 0x2ee   : > { %2082 = vst.msk [vmem:[%s3357_s22 + $0x148] sm:$0xff] %vm2040_vm1, %v1949_v54  ;;  %v1970_v53 = vadd.f32 %v2543_v55, %v3350_v28 }
 0x2ef   : > { %v1961_v63 = vpop.f32.mrf.mxu0 }
 0x2f0   : > { %2087 = vst.msk [vmem:[%s3357_s22 + $0x170] sm:$0xff] %vm2040_vm1, %v1970_v53  ;;  %v1962_v7 = vadd.f32 %v3350_v28, %v1961_v63 }
 0x2f1   : > { %v2544_v29 = vpop.f32.mrf.mxu0 }
 0x2f2   : > { %2085 = vst.msk [vmem:[%s3357_s22 + $0x160] sm:$0xff] %vm2040_vm1, %v1962_v7  ;;  %v1973_v56 = vadd.f32 %v2544_v29, %v3350_v28 }
 0x2f3   : > { %v1964_v59 = vpop.f32.mrf.mxu0 }
 0x2f4   : > { %2088 = vst.msk [vmem:[%s3357_s22 + $0x178] sm:$0xff] %vm2040_vm1, %v1973_v56  ;;  %v1965_v10 = vadd.f32 %v3350_v28, %v1964_v59 }
 0x2f5   : > { %v2547_v58 = vpop.f32.mrf.mxu0 }
 0x2f6   : > { %2086 = vst.msk [vmem:[%s3357_s22 + $0x168] sm:$0xff] %vm2040_vm1, %v1965_v10  ;;  %v1986_v61 = vadd.f32 %v2547_v58, %v3350_v28 }
 0x2f7   : > { %v1977_v21 = vpop.f32.mrf.mxu0 }
 0x2f8   : > { %2091 = vst.msk [vmem:[%s3357_s22 + $0x190] sm:$0xff] %vm2040_vm1, %v1986_v61  ;;  %v1978_v62 = vadd.f32 %v3350_v28, %v1977_v21 }
 0x2f9   : > { %v2548_v0 = vpop.f32.mrf.mxu0 }
 0x2fa   : > { %2089 = vst.msk [vmem:[%s3357_s22 + $0x180] sm:$0xff] %vm2040_vm1, %v1978_v62  ;;  %v1989_v40 = vadd.f32 %v2548_v0, %v3350_v28 }
 0x2fb   : > { %v1980_v48 = vpop.f32.mrf.mxu0 }
 0x2fc   : > { %2092 = vst.msk [vmem:[%s3357_s22 + $0x198] sm:$0xff] %vm2040_vm1, %v1989_v40  ;;  %v1981_v57 = vadd.f32 %v3350_v28, %v1980_v48 }
 0x2fd   : > { %v2551_v1 = vpop.f32.mrf.mxu0 }
 0x2fe   : > { %2090 = vst.msk [vmem:[%s3357_s22 + $0x188] sm:$0xff] %vm2040_vm1, %v1981_v57  ;;  %v2002_v2 = vadd.f32 %v2551_v1, %v3350_v28 }
 0x2ff   : > { %v1993_v3 = vpop.f32.mrf.mxu0 }
 0x300   : > { %2095 = vst.msk [vmem:[%s3357_s22 + $0x1b0] sm:$0xff] %vm2040_vm1, %v2002_v2  ;;  %v1994_v5 = vadd.f32 %v3350_v28, %v1993_v3 }
 0x301   : > { %v2552_v6 = vpop.f32.mrf.mxu0 }
 0x302   : > { %2093 = vst.msk [vmem:[%s3357_s22 + $0x1a0] sm:$0xff] %vm2040_vm1, %v1994_v5  ;;  %v2005_v11 = vadd.f32 %v2552_v6, %v3350_v28 }
 0x303   : > { %v1996_v12 = vpop.f32.mrf.mxu0 }
 0x304   : > { %2096 = vst.msk [vmem:[%s3357_s22 + $0x1b8] sm:$0xff] %vm2040_vm1, %v2005_v11  ;;  %v1997_v15 = vadd.f32 %v3350_v28, %v1996_v12 }
 0x305   : > { %v2555_v16 = vpop.f32.mrf.mxu0 }
 0x306   : > { %2094 = vst.msk [vmem:[%s3357_s22 + $0x1a8] sm:$0xff] %vm2040_vm1, %v1997_v15  ;;  %v2018_v17 = vadd.f32 %v2555_v16, %v3350_v28 }
 0x307   : > { %v2009_v60 = vpop.f32.mrf.mxu0 }
 0x308   : > { %2099 = vst.msk [vmem:[%s3357_s22 + $0x1d0] sm:$0xff] %vm2040_vm1, %v2018_v17  ;;  %v2010_v18 = vadd.f32 %v3350_v28, %v2009_v60 }
 0x309   : > { %v2556_v14 = vpop.f32.mrf.mxu0 }
 0x30a   : > { %2097 = vst.msk [vmem:[%s3357_s22 + $0x1c0] sm:$0xff] %vm2040_vm1, %v2010_v18  ;;  %v2021_v9 = vadd.f32 %v2556_v14, %v3350_v28 }
 0x30b   : > { %v2012_v31 = vpop.f32.mrf.mxu0 }
 0x30c   : > { %2100 = vst.msk [vmem:[%s3357_s22 + $0x1d8] sm:$0xff] %vm2040_vm1, %v2021_v9  ;;  %v2013_v20 = vadd.f32 %v3350_v28, %v2012_v31 }
 0x30d   : > { %v2559_v22 = vpop.f32.mrf.mxu0 }
 0x30e   : > { %2098 = vst.msk [vmem:[%s3357_s22 + $0x1c8] sm:$0xff] %vm2040_vm1, %v2013_v20  ;;  %v2034_v24 = vadd.f32 %v2559_v22, %v3350_v28 }
 0x30f   : > { %v2025_v23 = vpop.f32.mrf.mxu0 }
 0x310   : > { %2103 = vst.msk [vmem:[%s3357_s22 + $0x1f0] sm:$0xff] %vm2040_vm1, %v2034_v24  ;;  %v2026_v25 = vadd.f32 %v3350_v28, %v2025_v23 }
 0x311   : > { %v2560_v26 = vpop.f32.mrf.mxu0 }
 0x312   : > { %2101 = vst.msk [vmem:[%s3357_s22 + $0x1e0] sm:$0xff] %vm2040_vm1, %v2026_v25  ;;  %v2037_v27 = vadd.f32 %v2560_v26, %v3350_v28 }
 0x313   : > { %v2028_v38 = vpop.f32.mrf.mxu0 }
 0x314   : > { %2104 = vst.msk [vmem:[%s3357_s22 + $0x1f8] sm:$0xff] %vm2040_vm1, %v2037_v27  ;;  %v2029_v30 = vadd.f32 %v3350_v28, %v2028_v38 }
 0x316   : > { %2102 = vst.msk [vmem:[%s3357_s22 + $0x1e8] sm:$0xff] %vm2040_vm1, %v2029_v30 }
 0x317 PF: > { %s19_s30 = sadd.s32 1, %s2616_s30  }
 0x318   : > { %p16_p4 = scmp.ge.s32.totalorder %s19_s30, 4  }
 0x31a   :  { %18 = sbr.rel (!%p16_p4) target bundleno = 1 (0x1), region = 86 }

</bundles_post_ra>
